<compile_context>
chip_gen: v6e
topology: v6e:2x2x1
jax: 0.10.0
libtpu: 0.0.40
codegen_flags: <defaults>
</compile_context>

<pallas_src>
import functools

import jax
import jax.numpy as jnp
from jax.experimental import pallas as pl
from jax.experimental.pallas import tpu as pltpu

_BN_EPS = 1e-5


def _mxu_dtype():
    """bf16 operands are MXU-native on v6e/v7x; keep f32 on v5e / unknown chips."""
    try:
        kind = jax.devices()[0].device_kind.lower()
    except Exception:
        return jnp.float32
    if "v6" in kind or "v7" in kind:
        return jnp.bfloat16
    return jnp.float32


# ----------------------------------------------------------------------------
# In-kernel building blocks (traced inside the single fused Pallas kernel).
# ----------------------------------------------------------------------------
def _mm(x, w_ref, b_ref=None, relu=True):
    """act(x @ W [+ b]): MXU matmul with f32 accumulation, f32 VPU epilogue."""
    w = w_ref[...]
    y = jnp.dot(x.astype(w.dtype), w, preferred_element_type=jnp.float32)
    if b_ref is not None:
        y = y + b_ref[...]
    if relu:
        y = jnp.maximum(y, 0.0)
    return y


def _mlp(x, refs):
    # MLP with with_final_activation=True (all MLPs in the spec use it).
    for i in range(0, len(refs), 2):
        x = _mm(x, refs[i], refs[i + 1], relu=True)
    return x


def _scatter_add(adj, x):
    # pools == ['add']: generalized_scatter == dense count-adjacency matmul.
    return jnp.dot(adj, x.astype(adj.dtype), preferred_element_type=jnp.float32)


def _parallel_layer(x, adj, adj_t, mask_l, mask_r, lp, mlp_layers):
    m2 = 2 * mlp_layers
    i = 0
    nn1 = lp[i:i + m2]; i += m2
    nn2 = lp[i:i + m2]; i += m2
    w1, b1, w2, b2, w3, b3, w4, b4 = lp[i:i + 8]; i += 8
    wo0, wo1, wo2, wo3, bo = lp[i:i + 5]; i += 5
    nn_out_rest = lp[i:]

    # Message passing in the padded combined-row space (valid rows selected by
    # the adjacency columns; padded/garbage rows never leak into real rows).
    right_info = _scatter_add(adj, x)                    # scatter_add(x_right[bip1], bip0)
    x_left_new = _mlp(x, nn1)                            # nn1(combined_xs)
    left_info = _scatter_add(adj_t, x_left_new)          # scatter_add(x_left_new[bip0], bip1)
    right_info_new = _mlp(right_info, nn2)               # nn2(right_info)
    right_left_info = _scatter_add(adj_t, right_info_new)

    # linear1..linear4 (Linear + folded BatchNorm + ReLU), all VMEM-resident.
    xl = _mm(x, w1, b1)                                  # linear1(combined_xs)
    ri_t = _mm(right_info, w2, b2)                       # linear2(right_info)
    li_t = _mm(left_info, w3, b3)                        # linear3(left_info)
    rl_t = _mm(right_left_info, w4, b4)                  # linear4(right_left_info)

    # Masked row updates: rows (batch != last) / (batch != 0) take the tmp
    # values, all other rows keep linear1's output (torch clone + masked assign).
    ri_f = xl + mask_l * (ri_t - xl)
    li_f = xl + mask_r * (li_t - xl)
    rl_f = xl + mask_r * (rl_t - xl)

    # nn_out layer 1 on cat([xl, ri_f, li_f, rl_f], -1), computed as a
    # split-weight sum (identical math, no lane-dim concatenate needed).
    h = jnp.maximum(
        _mm(xl, wo0, None, relu=False)
        + _mm(ri_f, wo1, None, relu=False)
        + _mm(li_f, wo2, None, relu=False)
        + _mm(rl_f, wo3, None, relu=False)
        + bo[...],
        0.0,
    )
    return _mlp(h, nn_out_rest)                          # remaining nn_out layers


def _gnn_fwd_kernel(*refs, nlayer, mlp_layers, enc_layers):
    xs_ref, a_ref, at_ref, ml_ref, mr_ref = refs[:5]
    out_ref = refs[-1]
    p = refs[5:-1]

    x = xs_ref[...]
    adj = a_ref[...]
    adj_t = at_ref[...]
    mask_l = ml_ref[...]
    mask_r = mr_ref[...]

    per_layer = 6 * mlp_layers + 11
    k = 0
    for _ in range(nlayer):                              # static unroll; activations stay in VMEM
        lp = p[k:k + per_layer]
        k += per_layer
        x = x + _parallel_layer(x, adj, adj_t, mask_l, mask_r, lp, mlp_layers)  # residual (dropout=0)
    if enc_layers > 0:
        x = _mlp(x, p[k:k + 2 * enc_layers])             # output encoder MLP (final ReLU)
    out_ref[...] = x.astype(out_ref.dtype)


# ----------------------------------------------------------------------------
# Parameter construction (deterministic, synthetic). All weight preprocessing
# (BatchNorm fold, nn_out first-layer split) is done ONCE here, not per forward.
# ----------------------------------------------------------------------------
def _init_linear(key, nin, nout):
    kw, kb = jax.random.split(key)
    w = jax.random.normal(kw, (nin, nout), jnp.float32) / jnp.sqrt(float(nin))
    b = jax.random.normal(kb, (nout,), jnp.float32) * 0.01
    return {"w": w, "b": b}


def _fold_bn(lin):
    # nn.Sequential(Linear, BatchNorm1d, ReLU) with eval-mode BN at init
    # (running_mean=0, running_var=1, gamma=1, beta=0) folded into the linear.
    # TODO(synk): training-mode (batch-statistics) BatchNorm not reproduced.
    s = 1.0 / jnp.sqrt(1.0 + _BN_EPS)
    return {"w": lin["w"] * s, "b": lin["b"] * s}


def _init_mlp(key, nin, nout, nlayer):
    # TODO(synk): upstream MLP source not provided; assumed = `nlayer` Linear
    # layers (hidden width = nout) with ReLU after every layer (final act on).
    keys = jax.random.split(key, nlayer)
    dims = [nin] + [nout] * nlayer
    return [_init_linear(k, dims[i], dims[i + 1]) for i, k in enumerate(keys)]


def init_parallel_layer(key, nhid, mlp_layers=2, npools=1):
    assert npools == 1, "only pools=['add'] (npools=1) is implemented"
    ks = jax.random.split(key, 7)
    h2 = nhid // 2
    nn_out = _init_mlp(ks[6], 2 * nhid, nhid, mlp_layers)
    # Split nn_out's first-layer weight by input channel group so the kernel
    # consumes the four h2-wide blended inputs without a lane concatenate.
    w0 = nn_out[0]["w"]                                   # (2*nhid, nhid) = (4*h2, nhid)
    nn_out_first = {"w_parts": [w0[i * h2:(i + 1) * h2, :] for i in range(4)],
                    "b": nn_out[0]["b"]}
    return {
        "nn1": _init_mlp(ks[0], nhid, nhid, mlp_layers),
        "nn2": _init_mlp(ks[1], npools * nhid, nhid, mlp_layers),
        "linear1": _fold_bn(_init_linear(ks[2], nhid, h2)),
        "linear2": _fold_bn(_init_linear(ks[3], npools * nhid, h2)),
        "linear3": _fold_bn(_init_linear(ks[4], npools * nhid, h2)),
        "linear4": _fold_bn(_init_linear(ks[5], npools * nhid, h2)),
        "nn_out_first": nn_out_first,
        "nn_out_rest": nn_out[1:],
    }


def init_bipartite_gnn(key, nin, nout, nlayer, mlp_layers=2, npools=1):
    keys = jax.random.split(key, nlayer + 1)
    layers = [init_parallel_layer(keys[i], nin, mlp_layers, npools) for i in range(nlayer)]
    out_enc = _init_mlp(keys[-1], nin, nout, 1) if nin != nout else None
    return {"layers": layers, "out_enc": out_enc, "mlp_layers": mlp_layers}


def _flatten_params(params, weight_dtype):
    def wc(a):
        return a.astype(weight_dtype)

    def bc(a):
        return a.reshape(1, -1).astype(jnp.float32)

    flat = []
    for lyr in params["layers"]:
        for lin in lyr["nn1"]:
            flat += [wc(lin["w"]), bc(lin["b"])]
        for lin in lyr["nn2"]:
            flat += [wc(lin["w"]), bc(lin["b"])]
        for name in ("linear1", "linear2", "linear3", "linear4"):
            flat += [wc(lyr[name]["w"]), bc(lyr[name]["b"])]
        flat += [wc(w) for w in lyr["nn_out_first"]["w_parts"]]
        flat += [bc(lyr["nn_out_first"]["b"])]
        for lin in lyr["nn_out_rest"]:
            flat += [wc(lin["w"]), bc(lin["b"])]
    enc_layers = 0
    if params["out_enc"] is not None:
        for lin in params["out_enc"]:
            flat += [wc(lin["w"]), bc(lin["b"])]
        enc_layers = len(params["out_enc"])
    return flat, enc_layers


def _full_spec(shape):
    shape = tuple(int(s) for s in shape)
    ndim = len(shape)
    return pl.BlockSpec(shape, lambda *_: (0,) * ndim)


# ----------------------------------------------------------------------------
# Forward pass: one fused pallas_call for the whole GNN (Parallel, pools=['add']).
# ----------------------------------------------------------------------------
def bipartite_gnn_apply(params, xs, k_batch, bipartites_list, group_sizes):
    N, nhid = xs.shape

    # rows sorted by batch id  (== torch.cat([xs[k_batch == i] for i in 0..n]))
    perm = jnp.argsort(k_batch, stable=True)
    combined_xs = xs[perm].astype(jnp.float32)

    # Pad the node dim ONCE per forward (sublane multiple), slice once at the end.
    N_pad = int(pl.cdiv(N, 8)) * 8
    combined_xs = jnp.pad(combined_xs, ((0, N_pad - N), (0, 0)))

    # Merge bipartites exactly as the torch code does (identity for one bipartite).
    combined_bip = bipartites_list[0]
    for bp in bipartites_list[1:]:
        off = 1 + jnp.max(combined_bip[:2], axis=1, keepdims=True)
        combined_bip = jnp.concatenate([combined_bip[:2], bp[:2] + off], axis=1)

    n0 = int(group_sizes[0])
    n_last = int(group_sizes[-1])
    N_left = N - n_last

    mxu_dtype = _mxu_dtype()

    # Dense count-adjacency realizing the 'add'-pool scatter in the padded
    # combined-row space:  A[d, n0 + s] = #edges(bip0 = d, bip1 = s), so that
    #   right_info      = A   @ combined_xs
    #   left_info       = A.T @ nn1(combined_xs)
    #   right_left_info = A.T @ nn2(right_info)
    # TODO(synk): for large graphs replace the dense O(N^2) adjacency with an
    # edge-list scatter-add kernel (scalar-prefetched edge indices); dense A is
    # the first thing to exceed v7x's 64 MiB VMEM as graphs grow.
    A_f32 = jnp.zeros((N_pad, N_pad), jnp.float32).at[
        combined_bip[0], n0 + combined_bip[1]].add(1.0)
    adj = A_f32.astype(mxu_dtype)
    adj_t = A_f32.T.astype(mxu_dtype)

    rows = jnp.arange(N_pad)[:, None]
    mask_left = (rows < N_left).astype(jnp.float32)               # batch != last
    mask_right = ((rows >= n0) & (rows < N)).astype(jnp.float32)  # batch != 0

    flat_params, enc_layers = _flatten_params(params, mxu_dtype)
    out_dim = params["out_enc"][-1]["w"].shape[1] if params["out_enc"] is not None else nhid

    args = [combined_xs, adj, adj_t, mask_left, mask_right] + flat_params

    kernel = functools.partial(
        _gnn_fwd_kernel,
        nlayer=len(params["layers"]),
        mlp_layers=params["mlp_layers"],
        enc_layers=enc_layers,
    )
    out = pl.pallas_call(
        kernel,
        out_shape=jax.ShapeDtypeStruct((N_pad, out_dim), jnp.float32),
        grid=(1,),  # whole problem is one block: all weights + activations VMEM-resident
        in_specs=[_full_spec(a.shape) for a in args],
        out_specs=_full_spec((N_pad, out_dim)),
        compiler_params=pltpu.CompilerParams(
            dimension_semantics=("arbitrary",),
            vmem_limit_bytes=32 * 1024 * 1024,  # explicit budget; re-derive for large graphs
        ),
    )(*args)

    out = out[:N]                                   # slice once
    return out[jnp.argsort(perm, stable=True)]      # un-permute back to input order


if __name__ == "__main__":
    key = jax.random.PRNGKey(0)
    k_param, k_x, k_e = jax.random.split(key, 3)

    nin, nout, nlayer = 32, 16, 2
    n_left_nodes, n_right_nodes, n_edges = 10, 14, 40
    group_sizes = (n_left_nodes, n_right_nodes)
    num_nodes = n_left_nodes + n_right_nodes

    xs = jax.random.normal(k_x, (num_nodes, nin), jnp.float32)
    k_batch = jnp.concatenate([
        jnp.zeros((n_left_nodes,), jnp.int32),
        jnp.ones((n_right_nodes,), jnp.int32),
    ])
    ke0, ke1 = jax.random.split(k_e)
    bip = jnp.stack([
        jax.random.randint(ke0, (n_edges,), 0, n_left_nodes),
        jax.random.randint(ke1, (n_edges,), 0, n_right_nodes),
    ]).astype(jnp.int32)
    bipartites_list = [bip]

    params = init_bipartite_gnn(k_param, nin, nout, nlayer, mlp_layers=2, npools=1)
    out = bipartite_gnn_apply(params, xs, k_batch, bipartites_list, group_sizes)
    out = jax.block_until_ready(out)
    assert out.shape == (num_nodes, nout), out.shape
    print("KERNEL_OK")
</pallas_src>

<mosaic_0001>
module attributes {stable_mosaic.version = 11 : i64} {
  func.func @_gnn_fwd_kernel(%arg0: i32, %arg1: memref<24x32xf32, #tpu.memory_space<vmem>>, %arg2: memref<24x24xf32, #tpu.memory_space<vmem>>, %arg3: memref<24x24xf32, #tpu.memory_space<vmem>>, %arg4: memref<24x1xf32, #tpu.memory_space<vmem>>, %arg5: memref<24x1xf32, #tpu.memory_space<vmem>>, %arg6: memref<32x32xf32, #tpu.memory_space<vmem>>, %arg7: memref<1x32xf32, #tpu.memory_space<vmem>>, %arg8: memref<32x32xf32, #tpu.memory_space<vmem>>, %arg9: memref<1x32xf32, #tpu.memory_space<vmem>>, %arg10: memref<32x32xf32, #tpu.memory_space<vmem>>, %arg11: memref<1x32xf32, #tpu.memory_space<vmem>>, %arg12: memref<32x32xf32, #tpu.memory_space<vmem>>, %arg13: memref<1x32xf32, #tpu.memory_space<vmem>>, %arg14: memref<32x16xf32, #tpu.memory_space<vmem>>, %arg15: memref<1x16xf32, #tpu.memory_space<vmem>>, %arg16: memref<32x16xf32, #tpu.memory_space<vmem>>, %arg17: memref<1x16xf32, #tpu.memory_space<vmem>>, %arg18: memref<32x16xf32, #tpu.memory_space<vmem>>, %arg19: memref<1x16xf32, #tpu.memory_space<vmem>>, %arg20: memref<32x16xf32, #tpu.memory_space<vmem>>, %arg21: memref<1x16xf32, #tpu.memory_space<vmem>>, %arg22: memref<16x32xf32, #tpu.memory_space<vmem>>, %arg23: memref<16x32xf32, #tpu.memory_space<vmem>>, %arg24: memref<16x32xf32, #tpu.memory_space<vmem>>, %arg25: memref<16x32xf32, #tpu.memory_space<vmem>>, %arg26: memref<1x32xf32, #tpu.memory_space<vmem>>, %arg27: memref<32x32xf32, #tpu.memory_space<vmem>>, %arg28: memref<1x32xf32, #tpu.memory_space<vmem>>, %arg29: memref<32x32xf32, #tpu.memory_space<vmem>>, %arg30: memref<1x32xf32, #tpu.memory_space<vmem>>, %arg31: memref<32x32xf32, #tpu.memory_space<vmem>>, %arg32: memref<1x32xf32, #tpu.memory_space<vmem>>, %arg33: memref<32x32xf32, #tpu.memory_space<vmem>>, %arg34: memref<1x32xf32, #tpu.memory_space<vmem>>, %arg35: memref<32x32xf32, #tpu.memory_space<vmem>>, %arg36: memref<1x32xf32, #tpu.memory_space<vmem>>, %arg37: memref<32x16xf32, #tpu.memory_space<vmem>>, %arg38: memref<1x16xf32, #tpu.memory_space<vmem>>, %arg39: memref<32x16xf32, #tpu.memory_space<vmem>>, %arg40: memref<1x16xf32, #tpu.memory_space<vmem>>, %arg41: memref<32x16xf32, #tpu.memory_space<vmem>>, %arg42: memref<1x16xf32, #tpu.memory_space<vmem>>, %arg43: memref<32x16xf32, #tpu.memory_space<vmem>>, %arg44: memref<1x16xf32, #tpu.memory_space<vmem>>, %arg45: memref<16x32xf32, #tpu.memory_space<vmem>>, %arg46: memref<16x32xf32, #tpu.memory_space<vmem>>, %arg47: memref<16x32xf32, #tpu.memory_space<vmem>>, %arg48: memref<16x32xf32, #tpu.memory_space<vmem>>, %arg49: memref<1x32xf32, #tpu.memory_space<vmem>>, %arg50: memref<32x32xf32, #tpu.memory_space<vmem>>, %arg51: memref<1x32xf32, #tpu.memory_space<vmem>>, %arg52: memref<32x16xf32, #tpu.memory_space<vmem>>, %arg53: memref<1x16xf32, #tpu.memory_space<vmem>>, %arg54: memref<24x16xf32, #tpu.memory_space<vmem>>) attributes {dimension_semantics = [#tpu.dimension_semantics<arbitrary>], iteration_bounds = array<i64: 1>, scalar_prefetch = 0 : i64, scratch_operands = 0 : i64, tpu.core_type = #tpu.core_type<tc>, window_params = [{pipeline_mode = #tpu.pipeline_mode<synchronous>, transform_indices = @transform_0, window_bounds = array<i64: 24, 32>}, {pipeline_mode = #tpu.pipeline_mode<synchronous>, transform_indices = @transform_1, window_bounds = array<i64: 24, 24>}, {pipeline_mode = #tpu.pipeline_mode<synchronous>, transform_indices = @transform_2, window_bounds = array<i64: 24, 24>}, {pipeline_mode = #tpu.pipeline_mode<synchronous>, transform_indices = @transform_3, window_bounds = array<i64: 24, 1>}, {pipeline_mode = #tpu.pipeline_mode<synchronous>, transform_indices = @transform_4, window_bounds = array<i64: 24, 1>}, {pipeline_mode = #tpu.pipeline_mode<synchronous>, transform_indices = @transform_5, window_bounds = array<i64: 32, 32>}, {pipeline_mode = #tpu.pipeline_mode<synchronous>, transform_indices = @transform_6, window_bounds = array<i64: 1, 32>}, {pipeline_mode = #tpu.pipeline_mode<synchronous>, transform_indices = @transform_7, window_bounds = array<i64: 32, 32>}, {pipeline_mode = #tpu.pipeline_mode<synchronous>, transform_indices = @transform_8, window_bounds = array<i64: 1, 32>}, {pipeline_mode = #tpu.pipeline_mode<synchronous>, transform_indices = @transform_9, window_bounds = array<i64: 32, 32>}, {pipeline_mode = #tpu.pipeline_mode<synchronous>, transform_indices = @transform_10, window_bounds = array<i64: 1, 32>}, {pipeline_mode = #tpu.pipeline_mode<synchronous>, transform_indices = @transform_11, window_bounds = array<i64: 32, 32>}, {pipeline_mode = #tpu.pipeline_mode<synchronous>, transform_indices = @transform_12, window_bounds = array<i64: 1, 32>}, {pipeline_mode = #tpu.pipeline_mode<synchronous>, transform_indices = @transform_13, window_bounds = array<i64: 32, 16>}, {pipeline_mode = #tpu.pipeline_mode<synchronous>, transform_indices = @transform_14, window_bounds = array<i64: 1, 16>}, {pipeline_mode = #tpu.pipeline_mode<synchronous>, transform_indices = @transform_15, window_bounds = array<i64: 32, 16>}, {pipeline_mode = #tpu.pipeline_mode<synchronous>, transform_indices = @transform_16, window_bounds = array<i64: 1, 16>}, {pipeline_mode = #tpu.pipeline_mode<synchronous>, transform_indices = @transform_17, window_bounds = array<i64: 32, 16>}, {pipeline_mode = #tpu.pipeline_mode<synchronous>, transform_indices = @transform_18, window_bounds = array<i64: 1, 16>}, {pipeline_mode = #tpu.pipeline_mode<synchronous>, transform_indices = @transform_19, window_bounds = array<i64: 32, 16>}, {pipeline_mode = #tpu.pipeline_mode<synchronous>, transform_indices = @transform_20, window_bounds = array<i64: 1, 16>}, {pipeline_mode = #tpu.pipeline_mode<synchronous>, transform_indices = @transform_21, window_bounds = array<i64: 16, 32>}, {pipeline_mode = #tpu.pipeline_mode<synchronous>, transform_indices = @transform_22, window_bounds = array<i64: 16, 32>}, {pipeline_mode = #tpu.pipeline_mode<synchronous>, transform_indices = @transform_23, window_bounds = array<i64: 16, 32>}, {pipeline_mode = #tpu.pipeline_mode<synchronous>, transform_indices = @transform_24, window_bounds = array<i64: 16, 32>}, {pipeline_mode = #tpu.pipeline_mode<synchronous>, transform_indices = @transform_25, window_bounds = array<i64: 1, 32>}, {pipeline_mode = #tpu.pipeline_mode<synchronous>, transform_indices = @transform_26, window_bounds = array<i64: 32, 32>}, {pipeline_mode = #tpu.pipeline_mode<synchronous>, transform_indices = @transform_27, window_bounds = array<i64: 1, 32>}, {pipeline_mode = #tpu.pipeline_mode<synchronous>, transform_indices = @transform_28, window_bounds = array<i64: 32, 32>}, {pipeline_mode = #tpu.pipeline_mode<synchronous>, transform_indices = @transform_29, window_bounds = array<i64: 1, 32>}, {pipeline_mode = #tpu.pipeline_mode<synchronous>, transform_indices = @transform_30, window_bounds = array<i64: 32, 32>}, {pipeline_mode = #tpu.pipeline_mode<synchronous>, transform_indices = @transform_31, window_bounds = array<i64: 1, 32>}, {pipeline_mode = #tpu.pipeline_mode<synchronous>, transform_indices = @transform_32, window_bounds = array<i64: 32, 32>}, {pipeline_mode = #tpu.pipeline_mode<synchronous>, transform_indices = @transform_33, window_bounds = array<i64: 1, 32>}, {pipeline_mode = #tpu.pipeline_mode<synchronous>, transform_indices = @transform_34, window_bounds = array<i64: 32, 32>}, {pipeline_mode = #tpu.pipeline_mode<synchronous>, transform_indices = @transform_35, window_bounds = array<i64: 1, 32>}, {pipeline_mode = #tpu.pipeline_mode<synchronous>, transform_indices = @transform_36, window_bounds = array<i64: 32, 16>}, {pipeline_mode = #tpu.pipeline_mode<synchronous>, transform_indices = @transform_37, window_bounds = array<i64: 1, 16>}, {pipeline_mode = #tpu.pipeline_mode<synchronous>, transform_indices = @transform_38, window_bounds = array<i64: 32, 16>}, {pipeline_mode = #tpu.pipeline_mode<synchronous>, transform_indices = @transform_39, window_bounds = array<i64: 1, 16>}, {pipeline_mode = #tpu.pipeline_mode<synchronous>, transform_indices = @transform_40, window_bounds = array<i64: 32, 16>}, {pipeline_mode = #tpu.pipeline_mode<synchronous>, transform_indices = @transform_41, window_bounds = array<i64: 1, 16>}, {pipeline_mode = #tpu.pipeline_mode<synchronous>, transform_indices = @transform_42, window_bounds = array<i64: 32, 16>}, {pipeline_mode = #tpu.pipeline_mode<synchronous>, transform_indices = @transform_43, window_bounds = array<i64: 1, 16>}, {pipeline_mode = #tpu.pipeline_mode<synchronous>, transform_indices = @transform_44, window_bounds = array<i64: 16, 32>}, {pipeline_mode = #tpu.pipeline_mode<synchronous>, transform_indices = @transform_45, window_bounds = array<i64: 16, 32>}, {pipeline_mode = #tpu.pipeline_mode<synchronous>, transform_indices = @transform_46, window_bounds = array<i64: 16, 32>}, {pipeline_mode = #tpu.pipeline_mode<synchronous>, transform_indices = @transform_47, window_bounds = array<i64: 16, 32>}, {pipeline_mode = #tpu.pipeline_mode<synchronous>, transform_indices = @transform_48, window_bounds = array<i64: 1, 32>}, {pipeline_mode = #tpu.pipeline_mode<synchronous>, transform_indices = @transform_49, window_bounds = array<i64: 32, 32>}, {pipeline_mode = #tpu.pipeline_mode<synchronous>, transform_indices = @transform_50, window_bounds = array<i64: 1, 32>}, {pipeline_mode = #tpu.pipeline_mode<synchronous>, transform_indices = @transform_51, window_bounds = array<i64: 32, 16>}, {pipeline_mode = #tpu.pipeline_mode<synchronous>, transform_indices = @transform_52, window_bounds = array<i64: 1, 16>}, {pipeline_mode = #tpu.pipeline_mode<synchronous>, transform_indices = @transform_53, window_bounds = array<i64: 24, 16>}]} {
    %c0 = arith.constant 0 : index
    %c0_0 = arith.constant 0 : index
    %0 = vector.load %arg1[%c0, %c0_0] : memref<24x32xf32, #tpu.memory_space<vmem>>, vector<24x32xf32>
    %c0_1 = arith.constant 0 : index
    %c0_2 = arith.constant 0 : index
    %1 = vector.load %arg2[%c0_1, %c0_2] : memref<24x24xf32, #tpu.memory_space<vmem>>, vector<24x24xf32>
    %c0_3 = arith.constant 0 : index
    %c0_4 = arith.constant 0 : index
    %2 = vector.load %arg3[%c0_3, %c0_4] : memref<24x24xf32, #tpu.memory_space<vmem>>, vector<24x24xf32>
    %c0_5 = arith.constant 0 : index
    %c0_6 = arith.constant 0 : index
    %3 = vector.load %arg4[%c0_5, %c0_6] : memref<24x1xf32, #tpu.memory_space<vmem>>, vector<24x1xf32>
    %c0_7 = arith.constant 0 : index
    %c0_8 = arith.constant 0 : index
    %4 = vector.load %arg5[%c0_7, %c0_8] : memref<24x1xf32, #tpu.memory_space<vmem>>, vector<24x1xf32>
    %cst = arith.constant dense<0.000000e+00> : vector<24x32xf32>
    %5 = tpu.matmul %1, %0, %cst {dimension_numbers = #tpu.dot_dimension_numbers<[1], [0], [0], [1], [0, 0, 1, 1], [], []>} : vector<24x24xf32>, vector<24x32xf32>, vector<24x32xf32> -> vector<24x32xf32>
    %c0_9 = arith.constant 0 : index
    %c0_10 = arith.constant 0 : index
    %6 = vector.load %arg6[%c0_9, %c0_10] : memref<32x32xf32, #tpu.memory_space<vmem>>, vector<32x32xf32>
    %cst_11 = arith.constant dense<0.000000e+00> : vector<24x32xf32>
    %7 = tpu.matmul %0, %6, %cst_11 {dimension_numbers = #tpu.dot_dimension_numbers<[1], [0], [0], [1], [0, 0, 1, 1], [], []>} : vector<24x32xf32>, vector<32x32xf32>, vector<24x32xf32> -> vector<24x32xf32>
    %c0_12 = arith.constant 0 : index
    %c0_13 = arith.constant 0 : index
    %8 = vector.load %arg7[%c0_12, %c0_13] : memref<1x32xf32, #tpu.memory_space<vmem>>, vector<1x32xf32>
    %9 = vector.broadcast %8 : vector<1x32xf32> to vector<24x32xf32>
    %10 = arith.addf %7, %9 : vector<24x32xf32>
    %cst_14 = arith.constant 0.000000e+00 : f32
    %11 = vector.broadcast %cst_14 : f32 to vector<24x32xf32>
    %12 = arith.maximumf %10, %11 : vector<24x32xf32>
    %c0_15 = arith.constant 0 : index
    %c0_16 = arith.constant 0 : index
    %13 = vector.load %arg8[%c0_15, %c0_16] : memref<32x32xf32, #tpu.memory_space<vmem>>, vector<32x32xf32>
    %cst_17 = arith.constant dense<0.000000e+00> : vector<24x32xf32>
    %14 = tpu.matmul %12, %13, %cst_17 {dimension_numbers = #tpu.dot_dimension_numbers<[1], [0], [0], [1], [0, 0, 1, 1], [], []>} : vector<24x32xf32>, vector<32x32xf32>, vector<24x32xf32> -> vector<24x32xf32>
    %c0_18 = arith.constant 0 : index
    %c0_19 = arith.constant 0 : index
    %15 = vector.load %arg9[%c0_18, %c0_19] : memref<1x32xf32, #tpu.memory_space<vmem>>, vector<1x32xf32>
    %16 = vector.broadcast %15 : vector<1x32xf32> to vector<24x32xf32>
    %17 = arith.addf %14, %16 : vector<24x32xf32>
    %cst_20 = arith.constant 0.000000e+00 : f32
    %18 = vector.broadcast %cst_20 : f32 to vector<24x32xf32>
    %19 = arith.maximumf %17, %18 : vector<24x32xf32>
    %cst_21 = arith.constant dense<0.000000e+00> : vector<24x32xf32>
    %20 = tpu.matmul %2, %19, %cst_21 {dimension_numbers = #tpu.dot_dimension_numbers<[1], [0], [0], [1], [0, 0, 1, 1], [], []>} : vector<24x24xf32>, vector<24x32xf32>, vector<24x32xf32> -> vector<24x32xf32>
    %c0_22 = arith.constant 0 : index
    %c0_23 = arith.constant 0 : index
    %21 = vector.load %arg10[%c0_22, %c0_23] : memref<32x32xf32, #tpu.memory_space<vmem>>, vector<32x32xf32>
    %cst_24 = arith.constant dense<0.000000e+00> : vector<24x32xf32>
    %22 = tpu.matmul %5, %21, %cst_24 {dimension_numbers = #tpu.dot_dimension_numbers<[1], [0], [0], [1], [0, 0, 1, 1], [], []>} : vector<24x32xf32>, vector<32x32xf32>, vector<24x32xf32> -> vector<24x32xf32>
    %c0_25 = arith.constant 0 : index
    %c0_26 = arith.constant 0 : index
    %23 = vector.load %arg11[%c0_25, %c0_26] : memref<1x32xf32, #tpu.memory_space<vmem>>, vector<1x32xf32>
    %24 = vector.broadcast %23 : vector<1x32xf32> to vector<24x32xf32>
    %25 = arith.addf %22, %24 : vector<24x32xf32>
    %cst_27 = arith.constant 0.000000e+00 : f32
    %26 = vector.broadcast %cst_27 : f32 to vector<24x32xf32>
    %27 = arith.maximumf %25, %26 : vector<24x32xf32>
    %c0_28 = arith.constant 0 : index
    %c0_29 = arith.constant 0 : index
    %28 = vector.load %arg12[%c0_28, %c0_29] : memref<32x32xf32, #tpu.memory_space<vmem>>, vector<32x32xf32>
    %cst_30 = arith.constant dense<0.000000e+00> : vector<24x32xf32>
    %29 = tpu.matmul %27, %28, %cst_30 {dimension_numbers = #tpu.dot_dimension_numbers<[1], [0], [0], [1], [0, 0, 1, 1], [], []>} : vector<24x32xf32>, vector<32x32xf32>, vector<24x32xf32> -> vector<24x32xf32>
    %c0_31 = arith.constant 0 : index
    %c0_32 = arith.constant 0 : index
    %30 = vector.load %arg13[%c0_31, %c0_32] : memref<1x32xf32, #tpu.memory_space<vmem>>, vector<1x32xf32>
    %31 = vector.broadcast %30 : vector<1x32xf32> to vector<24x32xf32>
    %32 = arith.addf %29, %31 : vector<24x32xf32>
    %cst_33 = arith.constant 0.000000e+00 : f32
    %33 = vector.broadcast %cst_33 : f32 to vector<24x32xf32>
    %34 = arith.maximumf %32, %33 : vector<24x32xf32>
    %cst_34 = arith.constant dense<0.000000e+00> : vector<24x32xf32>
    %35 = tpu.matmul %2, %34, %cst_34 {dimension_numbers = #tpu.dot_dimension_numbers<[1], [0], [0], [1], [0, 0, 1, 1], [], []>} : vector<24x24xf32>, vector<24x32xf32>, vector<24x32xf32> -> vector<24x32xf32>
    %c0_35 = arith.constant 0 : index
    %c0_36 = arith.constant 0 : index
    %36 = vector.load %arg14[%c0_35, %c0_36] : memref<32x16xf32, #tpu.memory_space<vmem>>, vector<32x16xf32>
    %cst_37 = arith.constant dense<0.000000e+00> : vector<24x16xf32>
    %37 = tpu.matmul %0, %36, %cst_37 {dimension_numbers = #tpu.dot_dimension_numbers<[1], [0], [0], [1], [0, 0, 1, 1], [], []>} : vector<24x32xf32>, vector<32x16xf32>, vector<24x16xf32> -> vector<24x16xf32>
    %c0_38 = arith.constant 0 : index
    %c0_39 = arith.constant 0 : index
    %38 = vector.load %arg15[%c0_38, %c0_39] : memref<1x16xf32, #tpu.memory_space<vmem>>, vector<1x16xf32>
    %39 = vector.broadcast %38 : vector<1x16xf32> to vector<24x16xf32>
    %40 = arith.addf %37, %39 : vector<24x16xf32>
    %cst_40 = arith.constant 0.000000e+00 : f32
    %41 = vector.broadcast %cst_40 : f32 to vector<24x16xf32>
    %42 = arith.maximumf %40, %41 : vector<24x16xf32>
    %c0_41 = arith.constant 0 : index
    %c0_42 = arith.constant 0 : index
    %43 = vector.load %arg16[%c0_41, %c0_42] : memref<32x16xf32, #tpu.memory_space<vmem>>, vector<32x16xf32>
    %cst_43 = arith.constant dense<0.000000e+00> : vector<24x16xf32>
    %44 = tpu.matmul %5, %43, %cst_43 {dimension_numbers = #tpu.dot_dimension_numbers<[1], [0], [0], [1], [0, 0, 1, 1], [], []>} : vector<24x32xf32>, vector<32x16xf32>, vector<24x16xf32> -> vector<24x16xf32>
    %c0_44 = arith.constant 0 : index
    %c0_45 = arith.constant 0 : index
    %45 = vector.load %arg17[%c0_44, %c0_45] : memref<1x16xf32, #tpu.memory_space<vmem>>, vector<1x16xf32>
    %46 = vector.broadcast %45 : vector<1x16xf32> to vector<24x16xf32>
    %47 = arith.addf %44, %46 : vector<24x16xf32>
    %cst_46 = arith.constant 0.000000e+00 : f32
    %48 = vector.broadcast %cst_46 : f32 to vector<24x16xf32>
    %49 = arith.maximumf %47, %48 : vector<24x16xf32>
    %c0_47 = arith.constant 0 : index
    %c0_48 = arith.constant 0 : index
    %50 = vector.load %arg18[%c0_47, %c0_48] : memref<32x16xf32, #tpu.memory_space<vmem>>, vector<32x16xf32>
    %cst_49 = arith.constant dense<0.000000e+00> : vector<24x16xf32>
    %51 = tpu.matmul %20, %50, %cst_49 {dimension_numbers = #tpu.dot_dimension_numbers<[1], [0], [0], [1], [0, 0, 1, 1], [], []>} : vector<24x32xf32>, vector<32x16xf32>, vector<24x16xf32> -> vector<24x16xf32>
    %c0_50 = arith.constant 0 : index
    %c0_51 = arith.constant 0 : index
    %52 = vector.load %arg19[%c0_50, %c0_51] : memref<1x16xf32, #tpu.memory_space<vmem>>, vector<1x16xf32>
    %53 = vector.broadcast %52 : vector<1x16xf32> to vector<24x16xf32>
    %54 = arith.addf %51, %53 : vector<24x16xf32>
    %cst_52 = arith.constant 0.000000e+00 : f32
    %55 = vector.broadcast %cst_52 : f32 to vector<24x16xf32>
    %56 = arith.maximumf %54, %55 : vector<24x16xf32>
    %c0_53 = arith.constant 0 : index
    %c0_54 = arith.constant 0 : index
    %57 = vector.load %arg20[%c0_53, %c0_54] : memref<32x16xf32, #tpu.memory_space<vmem>>, vector<32x16xf32>
    %cst_55 = arith.constant dense<0.000000e+00> : vector<24x16xf32>
    %58 = tpu.matmul %35, %57, %cst_55 {dimension_numbers = #tpu.dot_dimension_numbers<[1], [0], [0], [1], [0, 0, 1, 1], [], []>} : vector<24x32xf32>, vector<32x16xf32>, vector<24x16xf32> -> vector<24x16xf32>
    %c0_56 = arith.constant 0 : index
    %c0_57 = arith.constant 0 : index
    %59 = vector.load %arg21[%c0_56, %c0_57] : memref<1x16xf32, #tpu.memory_space<vmem>>, vector<1x16xf32>
    %60 = vector.broadcast %59 : vector<1x16xf32> to vector<24x16xf32>
    %61 = arith.addf %58, %60 : vector<24x16xf32>
    %cst_58 = arith.constant 0.000000e+00 : f32
    %62 = vector.broadcast %cst_58 : f32 to vector<24x16xf32>
    %63 = arith.maximumf %61, %62 : vector<24x16xf32>
    %64 = arith.subf %49, %42 : vector<24x16xf32>
    %65 = vector.broadcast %3 : vector<24x1xf32> to vector<24x16xf32>
    %66 = arith.mulf %65, %64 : vector<24x16xf32>
    %67 = arith.addf %42, %66 : vector<24x16xf32>
    %68 = arith.subf %56, %42 : vector<24x16xf32>
    %69 = vector.broadcast %4 : vector<24x1xf32> to vector<24x16xf32>
    %70 = arith.mulf %69, %68 : vector<24x16xf32>
    %71 = arith.addf %42, %70 : vector<24x16xf32>
    %72 = arith.subf %63, %42 : vector<24x16xf32>
    %73 = vector.broadcast %4 : vector<24x1xf32> to vector<24x16xf32>
    %74 = arith.mulf %73, %72 : vector<24x16xf32>
    %75 = arith.addf %42, %74 : vector<24x16xf32>
    %c0_59 = arith.constant 0 : index
    %c0_60 = arith.constant 0 : index
    %76 = vector.load %arg22[%c0_59, %c0_60] : memref<16x32xf32, #tpu.memory_space<vmem>>, vector<16x32xf32>
    %cst_61 = arith.constant dense<0.000000e+00> : vector<24x32xf32>
    %77 = tpu.matmul %42, %76, %cst_61 {dimension_numbers = #tpu.dot_dimension_numbers<[1], [0], [0], [1], [0, 0, 1, 1], [], []>} : vector<24x16xf32>, vector<16x32xf32>, vector<24x32xf32> -> vector<24x32xf32>
    %c0_62 = arith.constant 0 : index
    %c0_63 = arith.constant 0 : index
    %78 = vector.load %arg23[%c0_62, %c0_63] : memref<16x32xf32, #tpu.memory_space<vmem>>, vector<16x32xf32>
    %cst_64 = arith.constant dense<0.000000e+00> : vector<24x32xf32>
    %79 = tpu.matmul %67, %78, %cst_64 {dimension_numbers = #tpu.dot_dimension_numbers<[1], [0], [0], [1], [0, 0, 1, 1], [], []>} : vector<24x16xf32>, vector<16x32xf32>, vector<24x32xf32> -> vector<24x32xf32>
    %80 = arith.addf %77, %79 : vector<24x32xf32>
    %c0_65 = arith.constant 0 : index
    %c0_66 = arith.constant 0 : index
    %81 = vector.load %arg24[%c0_65, %c0_66] : memref<16x32xf32, #tpu.memory_space<vmem>>, vector<16x32xf32>
    %cst_67 = arith.constant dense<0.000000e+00> : vector<24x32xf32>
    %82 = tpu.matmul %71, %81, %cst_67 {dimension_numbers = #tpu.dot_dimension_numbers<[1], [0], [0], [1], [0, 0, 1, 1], [], []>} : vector<24x16xf32>, vector<16x32xf32>, vector<24x32xf32> -> vector<24x32xf32>
    %83 = arith.addf %80, %82 : vector<24x32xf32>
    %c0_68 = arith.constant 0 : index
    %c0_69 = arith.constant 0 : index
    %84 = vector.load %arg25[%c0_68, %c0_69] : memref<16x32xf32, #tpu.memory_space<vmem>>, vector<16x32xf32>
    %cst_70 = arith.constant dense<0.000000e+00> : vector<24x32xf32>
    %85 = tpu.matmul %75, %84, %cst_70 {dimension_numbers = #tpu.dot_dimension_numbers<[1], [0], [0], [1], [0, 0, 1, 1], [], []>} : vector<24x16xf32>, vector<16x32xf32>, vector<24x32xf32> -> vector<24x32xf32>
    %86 = arith.addf %83, %85 : vector<24x32xf32>
    %c0_71 = arith.constant 0 : index
    %c0_72 = arith.constant 0 : index
    %87 = vector.load %arg26[%c0_71, %c0_72] : memref<1x32xf32, #tpu.memory_space<vmem>>, vector<1x32xf32>
    %88 = vector.broadcast %87 : vector<1x32xf32> to vector<24x32xf32>
    %89 = arith.addf %86, %88 : vector<24x32xf32>
    %cst_73 = arith.constant 0.000000e+00 : f32
    %90 = vector.broadcast %cst_73 : f32 to vector<24x32xf32>
    %91 = arith.maximumf %89, %90 : vector<24x32xf32>
    %c0_74 = arith.constant 0 : index
    %c0_75 = arith.constant 0 : index
    %92 = vector.load %arg27[%c0_74, %c0_75] : memref<32x32xf32, #tpu.memory_space<vmem>>, vector<32x32xf32>
    %cst_76 = arith.constant dense<0.000000e+00> : vector<24x32xf32>
    %93 = tpu.matmul %91, %92, %cst_76 {dimension_numbers = #tpu.dot_dimension_numbers<[1], [0], [0], [1], [0, 0, 1, 1], [], []>} : vector<24x32xf32>, vector<32x32xf32>, vector<24x32xf32> -> vector<24x32xf32>
    %c0_77 = arith.constant 0 : index
    %c0_78 = arith.constant 0 : index
    %94 = vector.load %arg28[%c0_77, %c0_78] : memref<1x32xf32, #tpu.memory_space<vmem>>, vector<1x32xf32>
    %95 = vector.broadcast %94 : vector<1x32xf32> to vector<24x32xf32>
    %96 = arith.addf %93, %95 : vector<24x32xf32>
    %cst_79 = arith.constant 0.000000e+00 : f32
    %97 = vector.broadcast %cst_79 : f32 to vector<24x32xf32>
    %98 = arith.maximumf %96, %97 : vector<24x32xf32>
    %99 = arith.addf %0, %98 : vector<24x32xf32>
    %cst_80 = arith.constant dense<0.000000e+00> : vector<24x32xf32>
    %100 = tpu.matmul %1, %99, %cst_80 {dimension_numbers = #tpu.dot_dimension_numbers<[1], [0], [0], [1], [0, 0, 1, 1], [], []>} : vector<24x24xf32>, vector<24x32xf32>, vector<24x32xf32> -> vector<24x32xf32>
    %c0_81 = arith.constant 0 : index
    %c0_82 = arith.constant 0 : index
    %101 = vector.load %arg29[%c0_81, %c0_82] : memref<32x32xf32, #tpu.memory_space<vmem>>, vector<32x32xf32>
    %cst_83 = arith.constant dense<0.000000e+00> : vector<24x32xf32>
    %102 = tpu.matmul %99, %101, %cst_83 {dimension_numbers = #tpu.dot_dimension_numbers<[1], [0], [0], [1], [0, 0, 1, 1], [], []>} : vector<24x32xf32>, vector<32x32xf32>, vector<24x32xf32> -> vector<24x32xf32>
    %c0_84 = arith.constant 0 : index
    %c0_85 = arith.constant 0 : index
    %103 = vector.load %arg30[%c0_84, %c0_85] : memref<1x32xf32, #tpu.memory_space<vmem>>, vector<1x32xf32>
    %104 = vector.broadcast %103 : vector<1x32xf32> to vector<24x32xf32>
    %105 = arith.addf %102, %104 : vector<24x32xf32>
    %cst_86 = arith.constant 0.000000e+00 : f32
    %106 = vector.broadcast %cst_86 : f32 to vector<24x32xf32>
    %107 = arith.maximumf %105, %106 : vector<24x32xf32>
    %c0_87 = arith.constant 0 : index
    %c0_88 = arith.constant 0 : index
    %108 = vector.load %arg31[%c0_87, %c0_88] : memref<32x32xf32, #tpu.memory_space<vmem>>, vector<32x32xf32>
    %cst_89 = arith.constant dense<0.000000e+00> : vector<24x32xf32>
    %109 = tpu.matmul %107, %108, %cst_89 {dimension_numbers = #tpu.dot_dimension_numbers<[1], [0], [0], [1], [0, 0, 1, 1], [], []>} : vector<24x32xf32>, vector<32x32xf32>, vector<24x32xf32> -> vector<24x32xf32>
    %c0_90 = arith.constant 0 : index
    %c0_91 = arith.constant 0 : index
    %110 = vector.load %arg32[%c0_90, %c0_91] : memref<1x32xf32, #tpu.memory_space<vmem>>, vector<1x32xf32>
    %111 = vector.broadcast %110 : vector<1x32xf32> to vector<24x32xf32>
    %112 = arith.addf %109, %111 : vector<24x32xf32>
    %cst_92 = arith.constant 0.000000e+00 : f32
    %113 = vector.broadcast %cst_92 : f32 to vector<24x32xf32>
    %114 = arith.maximumf %112, %113 : vector<24x32xf32>
    %cst_93 = arith.constant dense<0.000000e+00> : vector<24x32xf32>
    %115 = tpu.matmul %2, %114, %cst_93 {dimension_numbers = #tpu.dot_dimension_numbers<[1], [0], [0], [1], [0, 0, 1, 1], [], []>} : vector<24x24xf32>, vector<24x32xf32>, vector<24x32xf32> -> vector<24x32xf32>
    %c0_94 = arith.constant 0 : index
    %c0_95 = arith.constant 0 : index
    %116 = vector.load %arg33[%c0_94, %c0_95] : memref<32x32xf32, #tpu.memory_space<vmem>>, vector<32x32xf32>
    %cst_96 = arith.constant dense<0.000000e+00> : vector<24x32xf32>
    %117 = tpu.matmul %100, %116, %cst_96 {dimension_numbers = #tpu.dot_dimension_numbers<[1], [0], [0], [1], [0, 0, 1, 1], [], []>} : vector<24x32xf32>, vector<32x32xf32>, vector<24x32xf32> -> vector<24x32xf32>
    %c0_97 = arith.constant 0 : index
    %c0_98 = arith.constant 0 : index
    %118 = vector.load %arg34[%c0_97, %c0_98] : memref<1x32xf32, #tpu.memory_space<vmem>>, vector<1x32xf32>
    %119 = vector.broadcast %118 : vector<1x32xf32> to vector<24x32xf32>
    %120 = arith.addf %117, %119 : vector<24x32xf32>
    %cst_99 = arith.constant 0.000000e+00 : f32
    %121 = vector.broadcast %cst_99 : f32 to vector<24x32xf32>
    %122 = arith.maximumf %120, %121 : vector<24x32xf32>
    %c0_100 = arith.constant 0 : index
    %c0_101 = arith.constant 0 : index
    %123 = vector.load %arg35[%c0_100, %c0_101] : memref<32x32xf32, #tpu.memory_space<vmem>>, vector<32x32xf32>
    %cst_102 = arith.constant dense<0.000000e+00> : vector<24x32xf32>
    %124 = tpu.matmul %122, %123, %cst_102 {dimension_numbers = #tpu.dot_dimension_numbers<[1], [0], [0], [1], [0, 0, 1, 1], [], []>} : vector<24x32xf32>, vector<32x32xf32>, vector<24x32xf32> -> vector<24x32xf32>
    %c0_103 = arith.constant 0 : index
    %c0_104 = arith.constant 0 : index
    %125 = vector.load %arg36[%c0_103, %c0_104] : memref<1x32xf32, #tpu.memory_space<vmem>>, vector<1x32xf32>
    %126 = vector.broadcast %125 : vector<1x32xf32> to vector<24x32xf32>
    %127 = arith.addf %124, %126 : vector<24x32xf32>
    %cst_105 = arith.constant 0.000000e+00 : f32
    %128 = vector.broadcast %cst_105 : f32 to vector<24x32xf32>
    %129 = arith.maximumf %127, %128 : vector<24x32xf32>
    %cst_106 = arith.constant dense<0.000000e+00> : vector<24x32xf32>
    %130 = tpu.matmul %2, %129, %cst_106 {dimension_numbers = #tpu.dot_dimension_numbers<[1], [0], [0], [1], [0, 0, 1, 1], [], []>} : vector<24x24xf32>, vector<24x32xf32>, vector<24x32xf32> -> vector<24x32xf32>
    %c0_107 = arith.constant 0 : index
    %c0_108 = arith.constant 0 : index
    %131 = vector.load %arg37[%c0_107, %c0_108] : memref<32x16xf32, #tpu.memory_space<vmem>>, vector<32x16xf32>
    %cst_109 = arith.constant dense<0.000000e+00> : vector<24x16xf32>
    %132 = tpu.matmul %99, %131, %cst_109 {dimension_numbers = #tpu.dot_dimension_numbers<[1], [0], [0], [1], [0, 0, 1, 1], [], []>} : vector<24x32xf32>, vector<32x16xf32>, vector<24x16xf32> -> vector<24x16xf32>
    %c0_110 = arith.constant 0 : index
    %c0_111 = arith.constant 0 : index
    %133 = vector.load %arg38[%c0_110, %c0_111] : memref<1x16xf32, #tpu.memory_space<vmem>>, vector<1x16xf32>
    %134 = vector.broadcast %133 : vector<1x16xf32> to vector<24x16xf32>
    %135 = arith.addf %132, %134 : vector<24x16xf32>
    %cst_112 = arith.constant 0.000000e+00 : f32
    %136 = vector.broadcast %cst_112 : f32 to vector<24x16xf32>
    %137 = arith.maximumf %135, %136 : vector<24x16xf32>
    %c0_113 = arith.constant 0 : index
    %c0_114 = arith.constant 0 : index
    %138 = vector.load %arg39[%c0_113, %c0_114] : memref<32x16xf32, #tpu.memory_space<vmem>>, vector<32x16xf32>
    %cst_115 = arith.constant dense<0.000000e+00> : vector<24x16xf32>
    %139 = tpu.matmul %100, %138, %cst_115 {dimension_numbers = #tpu.dot_dimension_numbers<[1], [0], [0], [1], [0, 0, 1, 1], [], []>} : vector<24x32xf32>, vector<32x16xf32>, vector<24x16xf32> -> vector<24x16xf32>
    %c0_116 = arith.constant 0 : index
    %c0_117 = arith.constant 0 : index
    %140 = vector.load %arg40[%c0_116, %c0_117] : memref<1x16xf32, #tpu.memory_space<vmem>>, vector<1x16xf32>
    %141 = vector.broadcast %140 : vector<1x16xf32> to vector<24x16xf32>
    %142 = arith.addf %139, %141 : vector<24x16xf32>
    %cst_118 = arith.constant 0.000000e+00 : f32
    %143 = vector.broadcast %cst_118 : f32 to vector<24x16xf32>
    %144 = arith.maximumf %142, %143 : vector<24x16xf32>
    %c0_119 = arith.constant 0 : index
    %c0_120 = arith.constant 0 : index
    %145 = vector.load %arg41[%c0_119, %c0_120] : memref<32x16xf32, #tpu.memory_space<vmem>>, vector<32x16xf32>
    %cst_121 = arith.constant dense<0.000000e+00> : vector<24x16xf32>
    %146 = tpu.matmul %115, %145, %cst_121 {dimension_numbers = #tpu.dot_dimension_numbers<[1], [0], [0], [1], [0, 0, 1, 1], [], []>} : vector<24x32xf32>, vector<32x16xf32>, vector<24x16xf32> -> vector<24x16xf32>
    %c0_122 = arith.constant 0 : index
    %c0_123 = arith.constant 0 : index
    %147 = vector.load %arg42[%c0_122, %c0_123] : memref<1x16xf32, #tpu.memory_space<vmem>>, vector<1x16xf32>
    %148 = vector.broadcast %147 : vector<1x16xf32> to vector<24x16xf32>
    %149 = arith.addf %146, %148 : vector<24x16xf32>
    %cst_124 = arith.constant 0.000000e+00 : f32
    %150 = vector.broadcast %cst_124 : f32 to vector<24x16xf32>
    %151 = arith.maximumf %149, %150 : vector<24x16xf32>
    %c0_125 = arith.constant 0 : index
    %c0_126 = arith.constant 0 : index
    %152 = vector.load %arg43[%c0_125, %c0_126] : memref<32x16xf32, #tpu.memory_space<vmem>>, vector<32x16xf32>
    %cst_127 = arith.constant dense<0.000000e+00> : vector<24x16xf32>
    %153 = tpu.matmul %130, %152, %cst_127 {dimension_numbers = #tpu.dot_dimension_numbers<[1], [0], [0], [1], [0, 0, 1, 1], [], []>} : vector<24x32xf32>, vector<32x16xf32>, vector<24x16xf32> -> vector<24x16xf32>
    %c0_128 = arith.constant 0 : index
    %c0_129 = arith.constant 0 : index
    %154 = vector.load %arg44[%c0_128, %c0_129] : memref<1x16xf32, #tpu.memory_space<vmem>>, vector<1x16xf32>
    %155 = vector.broadcast %154 : vector<1x16xf32> to vector<24x16xf32>
    %156 = arith.addf %153, %155 : vector<24x16xf32>
    %cst_130 = arith.constant 0.000000e+00 : f32
    %157 = vector.broadcast %cst_130 : f32 to vector<24x16xf32>
    %158 = arith.maximumf %156, %157 : vector<24x16xf32>
    %159 = arith.subf %144, %137 : vector<24x16xf32>
    %160 = vector.broadcast %3 : vector<24x1xf32> to vector<24x16xf32>
    %161 = arith.mulf %160, %159 : vector<24x16xf32>
    %162 = arith.addf %137, %161 : vector<24x16xf32>
    %163 = arith.subf %151, %137 : vector<24x16xf32>
    %164 = vector.broadcast %4 : vector<24x1xf32> to vector<24x16xf32>
    %165 = arith.mulf %164, %163 : vector<24x16xf32>
    %166 = arith.addf %137, %165 : vector<24x16xf32>
    %167 = arith.subf %158, %137 : vector<24x16xf32>
    %168 = vector.broadcast %4 : vector<24x1xf32> to vector<24x16xf32>
    %169 = arith.mulf %168, %167 : vector<24x16xf32>
    %170 = arith.addf %137, %169 : vector<24x16xf32>
    %c0_131 = arith.constant 0 : index
    %c0_132 = arith.constant 0 : index
    %171 = vector.load %arg45[%c0_131, %c0_132] : memref<16x32xf32, #tpu.memory_space<vmem>>, vector<16x32xf32>
    %cst_133 = arith.constant dense<0.000000e+00> : vector<24x32xf32>
    %172 = tpu.matmul %137, %171, %cst_133 {dimension_numbers = #tpu.dot_dimension_numbers<[1], [0], [0], [1], [0, 0, 1, 1], [], []>} : vector<24x16xf32>, vector<16x32xf32>, vector<24x32xf32> -> vector<24x32xf32>
    %c0_134 = arith.constant 0 : index
    %c0_135 = arith.constant 0 : index
    %173 = vector.load %arg46[%c0_134, %c0_135] : memref<16x32xf32, #tpu.memory_space<vmem>>, vector<16x32xf32>
    %cst_136 = arith.constant dense<0.000000e+00> : vector<24x32xf32>
    %174 = tpu.matmul %162, %173, %cst_136 {dimension_numbers = #tpu.dot_dimension_numbers<[1], [0], [0], [1], [0, 0, 1, 1], [], []>} : vector<24x16xf32>, vector<16x32xf32>, vector<24x32xf32> -> vector<24x32xf32>
    %175 = arith.addf %172, %174 : vector<24x32xf32>
    %c0_137 = arith.constant 0 : index
    %c0_138 = arith.constant 0 : index
    %176 = vector.load %arg47[%c0_137, %c0_138] : memref<16x32xf32, #tpu.memory_space<vmem>>, vector<16x32xf32>
    %cst_139 = arith.constant dense<0.000000e+00> : vector<24x32xf32>
    %177 = tpu.matmul %166, %176, %cst_139 {dimension_numbers = #tpu.dot_dimension_numbers<[1], [0], [0], [1], [0, 0, 1, 1], [], []>} : vector<24x16xf32>, vector<16x32xf32>, vector<24x32xf32> -> vector<24x32xf32>
    %178 = arith.addf %175, %177 : vector<24x32xf32>
    %c0_140 = arith.constant 0 : index
    %c0_141 = arith.constant 0 : index
    %179 = vector.load %arg48[%c0_140, %c0_141] : memref<16x32xf32, #tpu.memory_space<vmem>>, vector<16x32xf32>
    %cst_142 = arith.constant dense<0.000000e+00> : vector<24x32xf32>
    %180 = tpu.matmul %170, %179, %cst_142 {dimension_numbers = #tpu.dot_dimension_numbers<[1], [0], [0], [1], [0, 0, 1, 1], [], []>} : vector<24x16xf32>, vector<16x32xf32>, vector<24x32xf32> -> vector<24x32xf32>
    %181 = arith.addf %178, %180 : vector<24x32xf32>
    %c0_143 = arith.constant 0 : index
    %c0_144 = arith.constant 0 : index
    %182 = vector.load %arg49[%c0_143, %c0_144] : memref<1x32xf32, #tpu.memory_space<vmem>>, vector<1x32xf32>
    %183 = vector.broadcast %182 : vector<1x32xf32> to vector<24x32xf32>
    %184 = arith.addf %181, %183 : vector<24x32xf32>
    %cst_145 = arith.constant 0.000000e+00 : f32
    %185 = vector.broadcast %cst_145 : f32 to vector<24x32xf32>
    %186 = arith.maximumf %184, %185 : vector<24x32xf32>
    %c0_146 = arith.constant 0 : index
    %c0_147 = arith.constant 0 : index
    %187 = vector.load %arg50[%c0_146, %c0_147] : memref<32x32xf32, #tpu.memory_space<vmem>>, vector<32x32xf32>
    %cst_148 = arith.constant dense<0.000000e+00> : vector<24x32xf32>
    %188 = tpu.matmul %186, %187, %cst_148 {dimension_numbers = #tpu.dot_dimension_numbers<[1], [0], [0], [1], [0, 0, 1, 1], [], []>} : vector<24x32xf32>, vector<32x32xf32>, vector<24x32xf32> -> vector<24x32xf32>
    %c0_149 = arith.constant 0 : index
    %c0_150 = arith.constant 0 : index
    %189 = vector.load %arg51[%c0_149, %c0_150] : memref<1x32xf32, #tpu.memory_space<vmem>>, vector<1x32xf32>
    %190 = vector.broadcast %189 : vector<1x32xf32> to vector<24x32xf32>
    %191 = arith.addf %188, %190 : vector<24x32xf32>
    %cst_151 = arith.constant 0.000000e+00 : f32
    %192 = vector.broadcast %cst_151 : f32 to vector<24x32xf32>
    %193 = arith.maximumf %191, %192 : vector<24x32xf32>
    %194 = arith.addf %99, %193 : vector<24x32xf32>
    %c0_152 = arith.constant 0 : index
    %c0_153 = arith.constant 0 : index
    %195 = vector.load %arg52[%c0_152, %c0_153] : memref<32x16xf32, #tpu.memory_space<vmem>>, vector<32x16xf32>
    %cst_154 = arith.constant dense<0.000000e+00> : vector<24x16xf32>
    %196 = tpu.matmul %194, %195, %cst_154 {dimension_numbers = #tpu.dot_dimension_numbers<[1], [0], [0], [1], [0, 0, 1, 1], [], []>} : vector<24x32xf32>, vector<32x16xf32>, vector<24x16xf32> -> vector<24x16xf32>
    %c0_155 = arith.constant 0 : index
    %c0_156 = arith.constant 0 : index
    %197 = vector.load %arg53[%c0_155, %c0_156] : memref<1x16xf32, #tpu.memory_space<vmem>>, vector<1x16xf32>
    %198 = vector.broadcast %197 : vector<1x16xf32> to vector<24x16xf32>
    %199 = arith.addf %196, %198 : vector<24x16xf32>
    %cst_157 = arith.constant 0.000000e+00 : f32
    %200 = vector.broadcast %cst_157 : f32 to vector<24x16xf32>
    %201 = arith.maximumf %199, %200 : vector<24x16xf32>
    %c0_158 = arith.constant 0 : index
    %c0_159 = arith.constant 0 : index
    %202 = vector.load %arg54[%c0_158, %c0_159] : memref<24x16xf32, #tpu.memory_space<vmem>>, vector<24x16xf32>
    tpu.vector_store %arg54[%c0_158, %c0_159], %201 {strides = array<i32>} : memref<24x16xf32, #tpu.memory_space<vmem>>, vector<24x16xf32>,
    return
  }
  func.func @transform_0(%arg0: i32) -> (i32, i32) {
    %c0_i32 = arith.constant 0 : i32
    %c0_i32_0 = arith.constant 0 : i32
    %c0_i32_1 = arith.constant 0 : i32
    return %c0_i32, %c0_i32_0 : i32, i32
  }
  func.func @transform_1(%arg0: i32) -> (i32, i32) {
    %c0_i32 = arith.constant 0 : i32
    %c0_i32_0 = arith.constant 0 : i32
    %c0_i32_1 = arith.constant 0 : i32
    return %c0_i32, %c0_i32_0 : i32, i32
  }
  func.func @transform_2(%arg0: i32) -> (i32, i32) {
    %c0_i32 = arith.constant 0 : i32
    %c0_i32_0 = arith.constant 0 : i32
    %c0_i32_1 = arith.constant 0 : i32
    return %c0_i32, %c0_i32_0 : i32, i32
  }
  func.func @transform_3(%arg0: i32) -> (i32, i32) {
    %c0_i32 = arith.constant 0 : i32
    %c0_i32_0 = arith.constant 0 : i32
    %c0_i32_1 = arith.constant 0 : i32
    return %c0_i32, %c0_i32_0 : i32, i32
  }
  func.func @transform_4(%arg0: i32) -> (i32, i32) {
    %c0_i32 = arith.constant 0 : i32
    %c0_i32_0 = arith.constant 0 : i32
    %c0_i32_1 = arith.constant 0 : i32
    return %c0_i32, %c0_i32_0 : i32, i32
  }
  func.func @transform_5(%arg0: i32) -> (i32, i32) {
    %c0_i32 = arith.constant 0 : i32
    %c0_i32_0 = arith.constant 0 : i32
    %c0_i32_1 = arith.constant 0 : i32
    return %c0_i32, %c0_i32_0 : i32, i32
  }
  func.func @transform_6(%arg0: i32) -> (i32, i32) {
    %c0_i32 = arith.constant 0 : i32
    %c0_i32_0 = arith.constant 0 : i32
    %c0_i32_1 = arith.constant 0 : i32
    return %c0_i32, %c0_i32_0 : i32, i32
  }
  func.func @transform_7(%arg0: i32) -> (i32, i32) {
    %c0_i32 = arith.constant 0 : i32
    %c0_i32_0 = arith.constant 0 : i32
    %c0_i32_1 = arith.constant 0 : i32
    return %c0_i32, %c0_i32_0 : i32, i32
  }
  func.func @transform_8(%arg0: i32) -> (i32, i32) {
    %c0_i32 = arith.constant 0 : i32
    %c0_i32_0 = arith.constant 0 : i32
    %c0_i32_1 = arith.constant 0 : i32
    return %c0_i32, %c0_i32_0 : i32, i32
  }
  func.func @transform_9(%arg0: i32) -> (i32, i32) {
    %c0_i32 = arith.constant 0 : i32
    %c0_i32_0 = arith.constant 0 : i32
    %c0_i32_1 = arith.constant 0 : i32
    return %c0_i32, %c0_i32_0 : i32, i32
  }
  func.func @transform_10(%arg0: i32) -> (i32, i32) {
    %c0_i32 = arith.constant 0 : i32
    %c0_i32_0 = arith.constant 0 : i32
    %c0_i32_1 = arith.constant 0 : i32
    return %c0_i32, %c0_i32_0 : i32, i32
  }
  func.func @transform_11(%arg0: i32) -> (i32, i32) {
    %c0_i32 = arith.constant 0 : i32
    %c0_i32_0 = arith.constant 0 : i32
    %c0_i32_1 = arith.constant 0 : i32
    return %c0_i32, %c0_i32_0 : i32, i32
  }
  func.func @transform_12(%arg0: i32) -> (i32, i32) {
    %c0_i32 = arith.constant 0 : i32
    %c0_i32_0 = arith.constant 0 : i32
    %c0_i32_1 = arith.constant 0 : i32
    return %c0_i32, %c0_i32_0 : i32, i32
  }
  func.func @transform_13(%arg0: i32) -> (i32, i32) {
    %c0_i32 = arith.constant 0 : i32
    %c0_i32_0 = arith.constant 0 : i32
    %c0_i32_1 = arith.constant 0 : i32
    return %c0_i32, %c0_i32_0 : i32, i32
  }
  func.func @transform_14(%arg0: i32) -> (i32, i32) {
    %c0_i32 = arith.constant 0 : i32
    %c0_i32_0 = arith.constant 0 : i32
    %c0_i32_1 = arith.constant 0 : i32
    return %c0_i32, %c0_i32_0 : i32, i32
  }
  func.func @transform_15(%arg0: i32) -> (i32, i32) {
    %c0_i32 = arith.constant 0 : i32
    %c0_i32_0 = arith.constant 0 : i32
    %c0_i32_1 = arith.constant 0 : i32
    return %c0_i32, %c0_i32_0 : i32, i32
  }
  func.func @transform_16(%arg0: i32) -> (i32, i32) {
    %c0_i32 = arith.constant 0 : i32
    %c0_i32_0 = arith.constant 0 : i32
    %c0_i32_1 = arith.constant 0 : i32
    return %c0_i32, %c0_i32_0 : i32, i32
  }
  func.func @transform_17(%arg0: i32) -> (i32, i32) {
    %c0_i32 = arith.constant 0 : i32
    %c0_i32_0 = arith.constant 0 : i32
    %c0_i32_1 = arith.constant 0 : i32
    return %c0_i32, %c0_i32_0 : i32, i32
  }
  func.func @transform_18(%arg0: i32) -> (i32, i32) {
    %c0_i32 = arith.constant 0 : i32
    %c0_i32_0 = arith.constant 0 : i32
    %c0_i32_1 = arith.constant 0 : i32
    return %c0_i32, %c0_i32_0 : i32, i32
  }
  func.func @transform_19(%arg0: i32) -> (i32, i32) {
    %c0_i32 = arith.constant 0 : i32
    %c0_i32_0 = arith.constant 0 : i32
    %c0_i32_1 = arith.constant 0 : i32
    return %c0_i32, %c0_i32_0 : i32, i32
  }
  func.func @transform_20(%arg0: i32) -> (i32, i32) {
    %c0_i32 = arith.constant 0 : i32
    %c0_i32_0 = arith.constant 0 : i32
    %c0_i32_1 = arith.constant 0 : i32
    return %c0_i32, %c0_i32_0 : i32, i32
  }
  func.func @transform_21(%arg0: i32) -> (i32, i32) {
    %c0_i32 = arith.constant 0 : i32
    %c0_i32_0 = arith.constant 0 : i32
    %c0_i32_1 = arith.constant 0 : i32
    return %c0_i32, %c0_i32_0 : i32, i32
  }
  func.func @transform_22(%arg0: i32) -> (i32, i32) {
    %c0_i32 = arith.constant 0 : i32
    %c0_i32_0 = arith.constant 0 : i32
    %c0_i32_1 = arith.constant 0 : i32
    return %c0_i32, %c0_i32_0 : i32, i32
  }
  func.func @transform_23(%arg0: i32) -> (i32, i32) {
    %c0_i32 = arith.constant 0 : i32
    %c0_i32_0 = arith.constant 0 : i32
    %c0_i32_1 = arith.constant 0 : i32
    return %c0_i32, %c0_i32_0 : i32, i32
  }
  func.func @transform_24(%arg0: i32) -> (i32, i32) {
    %c0_i32 = arith.constant 0 : i32
    %c0_i32_0 = arith.constant 0 : i32
    %c0_i32_1 = arith.constant 0 : i32
    return %c0_i32, %c0_i32_0 : i32, i32
  }
  func.func @transform_25(%arg0: i32) -> (i32, i32) {
    %c0_i32 = arith.constant 0 : i32
    %c0_i32_0 = arith.constant 0 : i32
    %c0_i32_1 = arith.constant 0 : i32
    return %c0_i32, %c0_i32_0 : i32, i32
  }
  func.func @transform_26(%arg0: i32) -> (i32, i32) {
    %c0_i32 = arith.constant 0 : i32
    %c0_i32_0 = arith.constant 0 : i32
    %c0_i32_1 = arith.constant 0 : i32
    return %c0_i32, %c0_i32_0 : i32, i32
  }
  func.func @transform_27(%arg0: i32) -> (i32, i32) {
    %c0_i32 = arith.constant 0 : i32
    %c0_i32_0 = arith.constant 0 : i32
    %c0_i32_1 = arith.constant 0 : i32
    return %c0_i32, %c0_i32_0 : i32, i32
  }
  func.func @transform_28(%arg0: i32) -> (i32, i32) {
    %c0_i32 = arith.constant 0 : i32
    %c0_i32_0 = arith.constant 0 : i32
    %c0_i32_1 = arith.constant 0 : i32
    return %c0_i32, %c0_i32_0 : i32, i32
  }
  func.func @transform_29(%arg0: i32) -> (i32, i32) {
    %c0_i32 = arith.constant 0 : i32
    %c0_i32_0 = arith.constant 0 : i32
    %c0_i32_1 = arith.constant 0 : i32
    return %c0_i32, %c0_i32_0 : i32, i32
  }
  func.func @transform_30(%arg0: i32) -> (i32, i32) {
    %c0_i32 = arith.constant 0 : i32
    %c0_i32_0 = arith.constant 0 : i32
    %c0_i32_1 = arith.constant 0 : i32
    return %c0_i32, %c0_i32_0 : i32, i32
  }
  func.func @transform_31(%arg0: i32) -> (i32, i32) {
    %c0_i32 = arith.constant 0 : i32
    %c0_i32_0 = arith.constant 0 : i32
    %c0_i32_1 = arith.constant 0 : i32
    return %c0_i32, %c0_i32_0 : i32, i32
  }
  func.func @transform_32(%arg0: i32) -> (i32, i32) {
    %c0_i32 = arith.constant 0 : i32
    %c0_i32_0 = arith.constant 0 : i32
    %c0_i32_1 = arith.constant 0 : i32
    return %c0_i32, %c0_i32_0 : i32, i32
  }
  func.func @transform_33(%arg0: i32) -> (i32, i32) {
    %c0_i32 = arith.constant 0 : i32
    %c0_i32_0 = arith.constant 0 : i32
    %c0_i32_1 = arith.constant 0 : i32
    return %c0_i32, %c0_i32_0 : i32, i32
  }
  func.func @transform_34(%arg0: i32) -> (i32, i32) {
    %c0_i32 = arith.constant 0 : i32
    %c0_i32_0 = arith.constant 0 : i32
    %c0_i32_1 = arith.constant 0 : i32
    return %c0_i32, %c0_i32_0 : i32, i32
  }
  func.func @transform_35(%arg0: i32) -> (i32, i32) {
    %c0_i32 = arith.constant 0 : i32
    %c0_i32_0 = arith.constant 0 : i32
    %c0_i32_1 = arith.constant 0 : i32
    return %c0_i32, %c0_i32_0 : i32, i32
  }
  func.func @transform_36(%arg0: i32) -> (i32, i32) {
    %c0_i32 = arith.constant 0 : i32
    %c0_i32_0 = arith.constant 0 : i32
    %c0_i32_1 = arith.constant 0 : i32
    return %c0_i32, %c0_i32_0 : i32, i32
  }
  func.func @transform_37(%arg0: i32) -> (i32, i32) {
    %c0_i32 = arith.constant 0 : i32
    %c0_i32_0 = arith.constant 0 : i32
    %c0_i32_1 = arith.constant 0 : i32
    return %c0_i32, %c0_i32_0 : i32, i32
  }
  func.func @transform_38(%arg0: i32) -> (i32, i32) {
    %c0_i32 = arith.constant 0 : i32
    %c0_i32_0 = arith.constant 0 : i32
    %c0_i32_1 = arith.constant 0 : i32
    return %c0_i32, %c0_i32_0 : i32, i32
  }
  func.func @transform_39(%arg0: i32) -> (i32, i32) {
    %c0_i32 = arith.constant 0 : i32
    %c0_i32_0 = arith.constant 0 : i32
    %c0_i32_1 = arith.constant 0 : i32
    return %c0_i32, %c0_i32_0 : i32, i32
  }
  func.func @transform_40(%arg0: i32) -> (i32, i32) {
    %c0_i32 = arith.constant 0 : i32
    %c0_i32_0 = arith.constant 0 : i32
    %c0_i32_1 = arith.constant 0 : i32
    return %c0_i32, %c0_i32_0 : i32, i32
  }
  func.func @transform_41(%arg0: i32) -> (i32, i32) {
    %c0_i32 = arith.constant 0 : i32
    %c0_i32_0 = arith.constant 0 : i32
    %c0_i32_1 = arith.constant 0 : i32
    return %c0_i32, %c0_i32_0 : i32, i32
  }
  func.func @transform_42(%arg0: i32) -> (i32, i32) {
    %c0_i32 = arith.constant 0 : i32
    %c0_i32_0 = arith.constant 0 : i32
    %c0_i32_1 = arith.constant 0 : i32
    return %c0_i32, %c0_i32_0 : i32, i32
  }
  func.func @transform_43(%arg0: i32) -> (i32, i32) {
    %c0_i32 = arith.constant 0 : i32
    %c0_i32_0 = arith.constant 0 : i32
    %c0_i32_1 = arith.constant 0 : i32
    return %c0_i32, %c0_i32_0 : i32, i32
  }
  func.func @transform_44(%arg0: i32) -> (i32, i32) {
    %c0_i32 = arith.constant 0 : i32
    %c0_i32_0 = arith.constant 0 : i32
    %c0_i32_1 = arith.constant 0 : i32
    return %c0_i32, %c0_i32_0 : i32, i32
  }
  func.func @transform_45(%arg0: i32) -> (i32, i32) {
    %c0_i32 = arith.constant 0 : i32
    %c0_i32_0 = arith.constant 0 : i32
    %c0_i32_1 = arith.constant 0 : i32
    return %c0_i32, %c0_i32_0 : i32, i32
  }
  func.func @transform_46(%arg0: i32) -> (i32, i32) {
    %c0_i32 = arith.constant 0 : i32
    %c0_i32_0 = arith.constant 0 : i32
    %c0_i32_1 = arith.constant 0 : i32
    return %c0_i32, %c0_i32_0 : i32, i32
  }
  func.func @transform_47(%arg0: i32) -> (i32, i32) {
    %c0_i32 = arith.constant 0 : i32
    %c0_i32_0 = arith.constant 0 : i32
    %c0_i32_1 = arith.constant 0 : i32
    return %c0_i32, %c0_i32_0 : i32, i32
  }
  func.func @transform_48(%arg0: i32) -> (i32, i32) {
    %c0_i32 = arith.constant 0 : i32
    %c0_i32_0 = arith.constant 0 : i32
    %c0_i32_1 = arith.constant 0 : i32
    return %c0_i32, %c0_i32_0 : i32, i32
  }
  func.func @transform_49(%arg0: i32) -> (i32, i32) {
    %c0_i32 = arith.constant 0 : i32
    %c0_i32_0 = arith.constant 0 : i32
    %c0_i32_1 = arith.constant 0 : i32
    return %c0_i32, %c0_i32_0 : i32, i32
  }
  func.func @transform_50(%arg0: i32) -> (i32, i32) {
    %c0_i32 = arith.constant 0 : i32
    %c0_i32_0 = arith.constant 0 : i32
    %c0_i32_1 = arith.constant 0 : i32
    return %c0_i32, %c0_i32_0 : i32, i32
  }
  func.func @transform_51(%arg0: i32) -> (i32, i32) {
    %c0_i32 = arith.constant 0 : i32
    %c0_i32_0 = arith.constant 0 : i32
    %c0_i32_1 = arith.constant 0 : i32
    return %c0_i32, %c0_i32_0 : i32, i32
  }
  func.func @transform_52(%arg0: i32) -> (i32, i32) {
    %c0_i32 = arith.constant 0 : i32
    %c0_i32_0 = arith.constant 0 : i32
    %c0_i32_1 = arith.constant 0 : i32
    return %c0_i32, %c0_i32_0 : i32, i32
  }
  func.func @transform_53(%arg0: i32) -> (i32, i32) {
    %c0_i32 = arith.constant 0 : i32
    %c0_i32_0 = arith.constant 0 : i32
    %c0_i32_1 = arith.constant 0 : i32
    return %c0_i32, %c0_i32_0 : i32, i32
  }
}

</mosaic_0001>

<bundles_post_ra>
// kernel: tpu_custom_call.1
= control target key start
LH: loop header
LB: loop body
LE: loop exit
PB: predicated region body
PF: predicated region fallthrough
CT: control target
= control target key end

     0   :  { %s5253_s6 = smov 1   ;;  %s5254_s10 = smov 2   ;;  %s6361_s0 = inlined_call_operand.smem [shape: u32[54], index: -1, kind: input, shape index: {}] }
   0x1   :  { %s5341_s5 = sld [smem:[%s6361_s0]]   ;;  %s5255_s14 = smov 3  }
   0x2   :  { %s5346_s9 = sld [smem:[%s6361_s0 + %s5253_s6]]   ;;  %s5256_s18 = smov 4  }
   0x3   :  { %s5351_s13 = sld [smem:[%s6361_s0 + %s5254_s10]]   ;;  %s5257_s22 = smov 5  }
   0x4   :  { %s5356_s17 = sld [smem:[%s6361_s0 + %s5255_s14]]   ;;  %s5258_s26 = smov 6  }
   0x5   :  { %s5361_s21 = sld [smem:[%s6361_s0 + %s5256_s18]]   ;;  %s5259_s30 = smov 7  }
   0x6   :  { %s5366_s25 = sld [smem:[%s6361_s0 + %s5257_s22]]   ;;  %s5260_s4 = smov 8  }
   0x7   :  { %6386 = sst [smem:[#allocation48_spill]] %s5341_s5  ;;  %s5261_s10 = smov 9  }
   0x8   :  { %6387 = sst [smem:[#allocation49_spill]] %s5346_s9  ;;  %s5262_s15 = smov 10  }
   0x9   :  { %6388 = sst [smem:[#allocation50_spill]] %s5351_s13  ;;  %s5263_s20 = smov 11  }
   0xa   :  { %6389 = sst [smem:[#allocation51_spill]] %s5356_s17  ;;  %s5265_s1 = smov 13  }
   0xb   :  { %6390 = sst [smem:[#allocation52_spill]] %s5361_s21  ;;  %s5266_s7 = smov 14  }
   0xc   :  { %6391 = sst [smem:[#allocation53_spill]] %s5366_s25  ;;  %s5268_s22 = smov 16  }
   0xd   :  { %s5371_s29 = sld [smem:[%s6361_s0 + %s5258_s26]]   ;;  %s5264_s26 = smov 12  }
   0xe   :  { %s5376_s3 = sld [smem:[%s6361_s0 + %s5259_s30]]   ;;  %s5269_s28 = smov 17  }
   0xf   :  { %s5381_s8 = sld [smem:[%s6361_s0 + %s5260_s4]]  }
  0x10   :  { %s5386_s14 = sld [smem:[%s6361_s0 + %s5261_s10]]  }
  0x11   :  { %s5391_s19 = sld [smem:[%s6361_s0 + %s5262_s15]]   ;;  %s5267_s15 = smov 15  }
  0x12   :  { %s5396_s24 = sld [smem:[%s6361_s0 + %s5263_s20]]  }
  0x13   :  { %s5401_s30 = sld [smem:[%s6361_s0 + %s5264_s26]]  }
  0x14   :  { %6392 = sst [smem:[#allocation54_spill]] %s5376_s3 }
  0x15   :  { %s5406_s6 = sld [smem:[%s6361_s0 + %s5265_s1]]  }
  0x16   :  { %6393 = sst [smem:[#allocation55_spill]] %s5386_s14 }
  0x17   :  { %s5411_s12 = sld [smem:[%s6361_s0 + %s5266_s7]]   ;;  %s5270_s7 = smov 18  }
  0x18   :  { %6394 = sst [smem:[#allocation56_spill]] %s5396_s24 }
  0x19   :  { %s5416_s20 = sld [smem:[%s6361_s0 + %s5267_s15]]   ;;  %s5271_s15 = smov 19  }
  0x1a   :  { %s5421_s27 = sld [smem:[%s6361_s0 + %s5268_s22]]   ;;  %s5272_s22 = smov 20  }
  0x1b   :  { %6395 = sst [smem:[#allocation57_spill]] %s5406_s6 }
  0x1c   :  { %s5426_s4 = sld [smem:[%s6361_s0 + %s5269_s28]]   ;;  %s5273_s28 = smov 21  }
  0x1d   :  { %s5431_s21 = sld [smem:[%s6361_s0 + %s5270_s7]]   ;;  %s5274_s7 = smov 22  }
  0x1e   :  { %s5441_s17 = sld [smem:[%s6361_s0 + %s5272_s22]]   ;;  %s5276_s22 = smov 24  }
  0x1f   :  { %6396 = sst [smem:[#allocation58_spill]] %s5416_s20 }
  0x20   :  { %s5436_s20 = sld [smem:[%s6361_s0 + %s5271_s15]]   ;;  %s5275_s15 = smov 23  }
  0x21   :  { %s5451_s6 = sld [smem:[%s6361_s0 + %s5274_s7]]   ;;  %s5278_s7 = smov 26  }
  0x22   :  { %6397 = sst [smem:[#allocation59_spill]] %s5426_s4 }
  0x23   :  { %s5446_s4 = sld [smem:[%s6361_s0 + %s5273_s28]]   ;;  %s5277_s28 = smov 25  }
  0x24   :  { %s5461_s24 = sld [smem:[%s6361_s0 + %s5276_s22]]   ;;  %s5280_s22 = smov 28  }
  0x25   :  { %s5466_s13 = sld [smem:[%s6361_s0 + %s5277_s28]]   ;;  %s5281_s28 = smov 29  }
  0x26   :  { %6398 = sst [smem:[#allocation60_spill]] %s5436_s20 }
  0x27   :  { %s5456_s20 = sld [smem:[%s6361_s0 + %s5275_s15]]   ;;  %s5279_s15 = smov 27  }
  0x28   :  { %s5471_s14 = sld [smem:[%s6361_s0 + %s5278_s7]]   ;;  %s5282_s7 = smov 30  }
  0x29   :  { %6399 = sst [smem:[#allocation61_spill]] %s5446_s4 }
  0x2a   :  { %s5476_s3 = sld [smem:[%s6361_s0 + %s5279_s15]]   ;;  %s5283_s15 = smov 31  }
  0x2b   :  { %6401 = sst [smem:[#allocation63_spill]] %s5466_s13 }
  0x2c   :  { %s5481_s25 = sld [smem:[%s6361_s0 + %s5280_s22]]   ;;  %s5284_s22 = smov 32  }
  0x2d   :  { %6400 = sst [smem:[#allocation62_spill]] %s5456_s20 }
  0x2e   :  { %6402 = sst [smem:[#allocation64_spill]] %s5471_s14 }
  0x2f   :  { %s5486_s9 = sld [smem:[%s6361_s0 + %s5281_s28]]   ;;  %s5285_s28 = smov 33  }
  0x30   :  { %s5491_s14 = sld [smem:[%s6361_s0 + %s5282_s7]]   ;;  %s5286_s7 = smov 34  }
  0x31   :  { %s5496_s5 = sld [smem:[%s6361_s0 + %s5283_s15]]   ;;  %s5287_s15 = smov 35  }
  0x32   :  { %6403 = sst [smem:[#allocation65_spill]] %s5481_s25 }
  0x33   :  { %s5501_s25 = sld [smem:[%s6361_s0 + %s5284_s22]]   ;;  %s5288_s22 = smov 36  }
  0x34   :  { %s5516_s13 = sld [smem:[%s6361_s0 + %s5287_s15]]   ;;  %s5291_s15 = smov 39  }
  0x35   :  { %6404 = sst [smem:[#allocation66_spill]] %s5486_s9 }
  0x36   :  { %6405 = sst [smem:[#allocation67_spill]] %s5491_s14 }
  0x37   :  { %s5506_s9 = sld [smem:[%s6361_s0 + %s5285_s28]]   ;;  %s5289_s28 = smov 37  }
  0x38   :  { %s5511_s14 = sld [smem:[%s6361_s0 + %s5286_s7]]   ;;  %s5290_s7 = smov 38  }
  0x39   :  { %6406 = sst [smem:[#allocation68_spill]] %s5501_s25 }
  0x3a   :  { %6409 = sst [smem:[#allocation71_spill]] %s5516_s13 }
  0x3b   :  { %s5521_s25 = sld [smem:[%s6361_s0 + %s5288_s22]]   ;;  %s5292_s22 = smov 40  }
  0x3c   :  { %s5536_s13 = sld [smem:[%s6361_s0 + %s5291_s15]]   ;;  %s5295_s15 = smov 43  }
  0x3d   :  { %6407 = sst [smem:[#allocation69_spill]] %s5506_s9 }
  0x3e   :  { %6408 = sst [smem:[#allocation70_spill]] %s5511_s14 }
  0x3f   :  { %s5526_s9 = sld [smem:[%s6361_s0 + %s5289_s28]]   ;;  %s5293_s28 = smov 41  }
  0x40   :  { %s5531_s14 = sld [smem:[%s6361_s0 + %s5290_s7]]   ;;  %s5294_s7 = smov 42  }
  0x41   :  { %6410 = sst [smem:[#allocation72_spill]] %s5521_s25 }
  0x42   :  { %6413 = sst [smem:[#allocation75_spill]] %s5536_s13 }
  0x43   :  { %s5541_s25 = sld [smem:[%s6361_s0 + %s5292_s22]]   ;;  %s5296_s22 = smov 44  }
  0x44   :  { %s5556_s13 = sld [smem:[%s6361_s0 + %s5295_s15]]   ;;  %s5299_s15 = smov 47  }
  0x45   :  { %6411 = sst [smem:[#allocation73_spill]] %s5526_s9 }
  0x46   :  { %6412 = sst [smem:[#allocation74_spill]] %s5531_s14 }
  0x47   :  { %s5546_s9 = sld [smem:[%s6361_s0 + %s5293_s28]]   ;;  %s5297_s28 = smov 45  }
  0x48   :  { %s5551_s14 = sld [smem:[%s6361_s0 + %s5294_s7]]   ;;  %s5298_s7 = smov 46  }
  0x49   :  { %6414 = sst [smem:[#allocation76_spill]] %s5541_s25 }
  0x4a   :  { %6416 = sst [smem:[#allocation78_spill]] %s5556_s13 }
  0x4b   :  { %s5561_s25 = sld [smem:[%s6361_s0 + %s5296_s22]]   ;;  %s5300_s22 = smov 48  }
  0x4c   :  { %s5566_s20 = sld [smem:[%s6361_s0 + %s5297_s28]]   ;;  %s5301_s28 = smov 49  }
  0x4d   :  { %s5576_s13 = sld [smem:[%s6361_s0 + %s5299_s15]]   ;;  %s5303_s15 = smov 51  }
  0x4e   :  { %6415 = sst [smem:[#allocation77_spill]] %s5551_s14 }
  0x4f   :  { %s5571_s14 = sld [smem:[%s6361_s0 + %s5298_s7]]   ;;  %s5302_s7 = smov 50  }
  0x50   :  { %s5586_s4 = sld [smem:[%s6361_s0 + %s5301_s28]]   ;;  %s5305_s28 = smov 53  }
  0x51   :  { %6417 = sst [smem:[#allocation79_spill]] %s5561_s25 }
  0x52   :  { %s5581_s25 = sld [smem:[%s6361_s0 + %s5300_s22]]   ;;  %s5304_s22 = smov 52  }
  0x53   :  { %6419 = sst [smem:[#allocation81_spill]] %s5576_s13 }
  0x54   :  { %s5596_s13 = sld [smem:[%s6361_s0 + %s5303_s15]]  }
  0x55   :  { %6418 = sst [smem:[#allocation80_spill]] %s5571_s14 }
  0x56   :  { %6421 = sst [smem:[#allocation83_spill]] %s5586_s4 }
  0x57   :  { %s5591_s14 = sld [smem:[%s6361_s0 + %s5302_s7]]  }
  0x58   :  { %6420 = sst [smem:[#allocation82_spill]] %s5581_s25 }
  0x59   :  { %s5601_s25 = sld [smem:[%s6361_s0 + %s5304_s22]]  }
  0x5a   :  { %s5606_s4 = sld [smem:[%s6361_s0 + %s5305_s28]]  }
  0x5b   :  { %112 = vsyncpa [#allocation3], 0 }
  0x5c   :  { %113 = vsyncpa [#allocation5], 0 }
  0x5d   :  { %114 = vsyncpa [#allocation8], 0 }
  0x5e   :  { %115 = vsyncpa [#allocation11], 0 }
  0x5f   :  { %116 = vsyncpa [#allocation14], 0 }
  0x60   :  { %117 = vsyncpa [#allocation17], 0 }
  0x61   :  { %118 = vsyncpa [#allocation20], 0 }
  0x62   :  { %119 = vsyncpa [#allocation23], 0 }
  0x63   :  { %120 = vsyncpa [#allocation26], 0 }
  0x64   :  { %121 = vsyncpa [#allocation29], 0 }
  0x65   :  { %122 = vsyncpa [#allocation32], 0 }
  0x66   :  { %123 = vsyncpa [#allocation35], 0  ;;  %s5306_s7 = smov [#allocation4]   ;;  %s5307_s11 = smov [#allocation7]  }
  0x67   :  { %s154_s10 = sshll.u32 %s5306_s7, 4  ;;  %s178_s15 = sshll.u32 %s5307_s11, 4  ;;  %s155_s10 = int_to_ptr.vmem [resolvable:$true] %s154_s10  ;;  %s179_s15 = int_to_ptr.vmem [resolvable:$true] %s178_s15 }
  0x68   :  { %s4797_s0 = scalar_lea.vmem %s155_s10, 16  ;;  %s4801_s16 = scalar_lea.vmem %s155_s10, 32 }
  0x69   :  { %p4798_p0 = scmp.ne.s32.totalorder %s155_s10, %s4797_s0  ;;  %p4802_p1 = scmp.lt.s32.totalorder %s155_s10, %s155_s10 }
  0x6a   :  { %p4803_p2 = scmp.lt.s32.totalorder %s4801_s16, %s4797_s0 }
  0x6c   :  { %p4804_p3 = por %p4803_p2, %p4802_p1 }
  0x6e   :  { %p4805_p4 = pnand %p4804_p3, %p4798_p0 }
  0x70   :  { %4808 = shalt.err (!%p4805_p4)
}
  0x71   :  { %157 = dma.hbm_to_vmem [thread:$0]  %s5381_s8, 16, %s155_s10, [#allocation5]  }
  0x72   :  { %s4817_s18 = scalar_lea.vmem %s179_s15, 16  ;;  %s4821_s22 = scalar_lea.vmem %s179_s15, 32 }
  0x73   :  { %p4818_p5 = scmp.ne.s32.totalorder %s179_s15, %s4817_s18  ;;  %p4822_p6 = scmp.lt.s32.totalorder %s179_s15, %s179_s15 }
  0x74   :  { %p4823_p7 = scmp.lt.s32.totalorder %s4821_s22, %s4817_s18 }
  0x76   :  { %p4824_p8 = por %p4823_p7, %p4822_p6 }
  0x78   :  { %p4825_p9 = pnand %p4824_p8, %p4818_p5 }
  0x7a   :  { %4828 = shalt.err (!%p4825_p9)
}
  0x7b   :  { %181 = dma.hbm_to_vmem [thread:$0]  %s5401_s30, 16, %s179_s15, [#allocation8]  }
  0x7c   :  { %s5308_s23 = smov [#allocation10]   ;;  %s5309_s28 = smov [#allocation13]  }
  0x7d   :  { %s202_s26 = sshll.u32 %s5308_s23, 4  ;;  %s226_s1 = sshll.u32 %s5309_s28, 4  ;;  %s203_s26 = int_to_ptr.vmem [resolvable:$true] %s202_s26  ;;  %s227_s1 = int_to_ptr.vmem [resolvable:$true] %s226_s1 }
  0x7e   :  { %s4837_s2 = scalar_lea.vmem %s203_s26, 16  ;;  %s4841_s7 = scalar_lea.vmem %s203_s26, 32 }
  0x7f   :  { %p4838_p10 = scmp.ne.s32.totalorder %s203_s26, %s4837_s2  ;;  %p4842_p11 = scmp.lt.s32.totalorder %s203_s26, %s203_s26 }
  0x80   :  { %p4843_p12 = scmp.lt.s32.totalorder %s4841_s7, %s4837_s2 }
  0x82   :  { %p4844_p13 = por %p4843_p12, %p4842_p11 }
  0x84   :  { %p4845_p0 = pnand %p4844_p13, %p4838_p10 }
  0x86   :  { %4848 = shalt.err (!%p4845_p0)
}
  0x87   :  { %205 = dma.hbm_to_vmem [thread:$0]  %s5421_s27, 16, %s203_s26, [#allocation11]  }
  0x88   :  { %s4857_s8 = scalar_lea.vmem %s227_s1, 16  ;;  %s4861_s10 = scalar_lea.vmem %s227_s1, 32 }
  0x89   :  { %p4858_p1 = scmp.ne.s32.totalorder %s227_s1, %s4857_s8  ;;  %p4862_p2 = scmp.lt.s32.totalorder %s227_s1, %s227_s1 }
  0x8a   :  { %p4863_p3 = scmp.lt.s32.totalorder %s4861_s10, %s4857_s8 }
  0x8c   :  { %p4864_p4 = por %p4863_p3, %p4862_p2 }
  0x8e   :  { %p4865_p5 = pnand %p4864_p4, %p4858_p1 }
  0x90   :  { %4868 = shalt.err (!%p4865_p5)
}
  0x91   :  { %229 = dma.hbm_to_vmem [thread:$0]  %s5441_s17, 16, %s227_s1, [#allocation14]  }
  0x92   :  { %s5310_s30 = smov [#allocation16]   ;;  %s5311_s15 = smov [#allocation19]  }
  0x93   :  { %s247_s11 = sshll.u32 %s5310_s30, 4  ;;  %s271_s0 = sshll.u32 %s5311_s15, 4  ;;  %s248_s11 = int_to_ptr.vmem [resolvable:$true] %s247_s11  ;;  %s272_s0 = int_to_ptr.vmem [resolvable:$true] %s271_s0 }
  0x94   :  { %s4877_s16 = scalar_lea.vmem %s248_s11, 256  ;;  %p4882_p7 = scmp.lt.s32.totalorder %s248_s11, %s248_s11 }
  0x95   :  { %p4878_p6 = scmp.ne.s32.totalorder %s248_s11, %s4877_s16  ;;  %p4883_p8 = scmp.lt.s32.totalorder %s4877_s16, %s4877_s16 }
  0x97   :  { %p4884_p9 = por %p4883_p8, %p4882_p7 }
  0x99   :  { %p4885_p10 = pnand %p4884_p9, %p4878_p6 }
  0x9b   :  { %4888 = shalt.err (!%p4885_p10)
}
  0x9c   :  { %s5312_s27 = smov 128   ;;  %s5313_s18 = smov 8  }
  0x9d   :  { %253 = dma.hbm_to_vmem [thread:$0]  %s5451_s6, 256, %s248_s11, [#allocation17], %s5312_s27, %s5312_s27, %s5313_s18  }
  0x9e   :  { %s4897_s17 = scalar_lea.vmem %s272_s0, 256  ;;  %p4902_p12 = scmp.lt.s32.totalorder %s272_s0, %s272_s0 }
  0x9f   :  { %p4898_p11 = scmp.ne.s32.totalorder %s272_s0, %s4897_s17  ;;  %p4903_p13 = scmp.lt.s32.totalorder %s4897_s17, %s4897_s17 }
  0xa1   :  { %p4904_p0 = por %p4903_p13, %p4902_p12 }
  0xa3   :  { %p4905_p1 = pnand %p4904_p0, %p4898_p11 }
  0xa5   :  { %4908 = shalt.err (!%p4905_p1)
}
  0xa6   :  { %277 = dma.hbm_to_vmem [thread:$0]  %s5461_s24, 256, %s272_s0, [#allocation20], %s5312_s27, %s5312_s27, %s5313_s18  }
  0xa7   :  { %s5314_s22 = smov [#allocation22]   ;;  %s5315_s26 = smov [#allocation25]  }
  0xa8   :  { %s296_s23 = sshll.u32 %s5314_s22, 4  ;;  %s320_s28 = sshll.u32 %s5315_s26, 4  ;;  %s297_s23 = int_to_ptr.vmem [resolvable:$true] %s296_s23  ;;  %s321_s28 = int_to_ptr.vmem [resolvable:$true] %s320_s28 }
  0xa9   :  { %s4917_s1 = scalar_lea.vmem %s297_s23, 16  ;;  %s4921_s6 = scalar_lea.vmem %s297_s23, 32 }
  0xaa   :  { %p4918_p2 = scmp.ne.s32.totalorder %s297_s23, %s4917_s1  ;;  %p4922_p3 = scmp.lt.s32.totalorder %s297_s23, %s297_s23 }
  0xab   :  { %p4923_p4 = scmp.lt.s32.totalorder %s4921_s6, %s4917_s1 }
  0xad   :  { %p4924_p5 = por %p4923_p4, %p4922_p3 }
  0xaf   :  { %p4925_p6 = pnand %p4924_p5, %p4918_p2 }
  0xb1   :  { %4928 = shalt.err (!%p4925_p6)
}
  0xb2   :  { %299 = dma.hbm_to_vmem [thread:$0]  %s5476_s3, 16, %s297_s23, [#allocation23]  }
  0xb3   :  { %s4937_s2 = scalar_lea.vmem %s321_s28, 16  ;;  %s4941_s7 = scalar_lea.vmem %s321_s28, 32 }
  0xb4   :  { %p4938_p7 = scmp.ne.s32.totalorder %s321_s28, %s4937_s2  ;;  %p4942_p8 = scmp.lt.s32.totalorder %s321_s28, %s321_s28 }
  0xb5   :  { %p4943_p9 = scmp.lt.s32.totalorder %s4941_s7, %s4937_s2 }
  0xb7   :  { %p4944_p10 = por %p4943_p9, %p4942_p8 }
  0xb9   :  { %p4945_p11 = pnand %p4944_p10, %p4938_p7 }
  0xbb   :  { %4948 = shalt.err (!%p4945_p11)
}
  0xbc   :  { %323 = dma.hbm_to_vmem [thread:$0]  %s5496_s5, 16, %s321_s28, [#allocation26]  }
  0xbd   :  { %s5316_s24 = smov [#allocation28]   ;;  %s5317_s10 = smov [#allocation31]  }
  0xbe   :  { %s356_s8 = sshll.u32 %s5316_s24, 4  ;;  %s379_s30 = sshll.u32 %s5317_s10, 4  ;;  %s357_s8 = int_to_ptr.vmem [resolvable:$true] %s356_s8  ;;  %s380_s30 = int_to_ptr.vmem [resolvable:$true] %s379_s30 }
  0xbf   :  { %s4957_s11 = scalar_lea.vmem %s357_s8, 16  ;;  %s4961_s15 = scalar_lea.vmem %s357_s8, 32 }
  0xc0   :  { %p4958_p12 = scmp.ne.s32.totalorder %s357_s8, %s4957_s11  ;;  %p4962_p13 = scmp.lt.s32.totalorder %s357_s8, %s357_s8 }
  0xc1   :  { %p4963_p0 = scmp.lt.s32.totalorder %s4961_s15, %s4957_s11 }
  0xc3   :  { %p4964_p1 = por %p4963_p0, %p4962_p13 }
  0xc5   :  { %p4965_p2 = pnand %p4964_p1, %p4958_p12 }
  0xc7   :  { %4968 = shalt.err (!%p4965_p2)
}
  0xc8   :  { %359 = dma.hbm_to_vmem [thread:$0]  %s5546_s9, 16, %s357_s8, [#allocation29]  }
  0xc9   :  { %s4977_s3 = scalar_lea.vmem %s380_s30, 256  ;;  %p4982_p4 = scmp.lt.s32.totalorder %s380_s30, %s380_s30 }
  0xca   :  { %p4978_p3 = scmp.ne.s32.totalorder %s380_s30, %s4977_s3  ;;  %p4983_p5 = scmp.lt.s32.totalorder %s4977_s3, %s4977_s3 }
  0xcc   :  { %p4984_p6 = por %p4983_p5, %p4982_p4 }
  0xce   :  { %p4985_p7 = pnand %p4984_p6, %p4978_p3 }
  0xd0   :  { %4988 = shalt.err (!%p4985_p7)
}
  0xd1   :  { %385 = dma.hbm_to_vmem [thread:$0]  %s5566_s20, 256, %s380_s30, [#allocation32], %s5312_s27, %s5312_s27, %s5313_s18  }
  0xd2   :  { %s5318_s5 = smov [#allocation2]   ;;  %s5319_s16 = smov [#allocation6]  }
  0xd3   :  { %s142_s0 = sshll.u32 %s5318_s5, 4  ;;  %s166_s17 = sshll.u32 %s5319_s16, 4  ;;  %s143_s0 = int_to_ptr.vmem [resolvable:$true] %s142_s0  ;;  %s167_s17 = int_to_ptr.vmem [resolvable:$true] %s166_s17 }
  0xd4   :  { %s4997_s22 = scalar_lea.vmem %s143_s0, 16  ;;  %s5001_s9 = scalar_lea.vmem %s143_s0, 32 }
  0xd5   :  { %p4998_p8 = scmp.ne.s32.totalorder %s143_s0, %s4997_s22  ;;  %p5002_p9 = scmp.lt.s32.totalorder %s143_s0, %s143_s0 }
  0xd6   :  { %p5003_p10 = scmp.lt.s32.totalorder %s5001_s9, %s4997_s22 }
  0xd8   :  { %p5004_p11 = por %p5003_p10, %p5002_p9 }
  0xda   :  { %p5005_p12 = pnand %p5004_p11, %p4998_p8 }
  0xdc   :  { %5008 = shalt.err (!%p5005_p12)
}
  0xdd   :  { %145 = dma.hbm_to_vmem [thread:$0]  %s5371_s29, 16, %s143_s0, [#allocation3]  }
  0xde   :  { %s5017_s23 = scalar_lea.vmem %s167_s17, 16  ;;  %s5021_s26 = scalar_lea.vmem %s167_s17, 32 }
  0xdf   :  { %p5018_p13 = scmp.ne.s32.totalorder %s167_s17, %s5017_s23  ;;  %p5022_p0 = scmp.lt.s32.totalorder %s167_s17, %s167_s17 }
  0xe0   :  { %p5023_p1 = scmp.lt.s32.totalorder %s5021_s26, %s5017_s23 }
  0xe2   :  { %p5024_p2 = por %p5023_p1, %p5022_p0 }
  0xe4   :  { %p5025_p3 = pnand %p5024_p2, %p5018_p13 }
  0xe6   :  { %5028 = shalt.err (!%p5025_p3)
}
  0xe7   :  { %169 = dma.hbm_to_vmem [thread:$0]  %s5391_s19, 16, %s167_s17, [#allocation5]  }
  0xe8   :  { %s5320_s20 = smov [#allocation9]   ;;  %s5321_s1 = smov [#allocation12]  }
  0xe9   :  { %s190_s28 = sshll.u32 %s5320_s20, 4  ;;  %s214_s6 = sshll.u32 %s5321_s1, 4  ;;  %s191_s28 = int_to_ptr.vmem [resolvable:$true] %s190_s28  ;;  %s215_s6 = int_to_ptr.vmem [resolvable:$true] %s214_s6 }
  0xea   :  { %s5037_s2 = scalar_lea.vmem %s191_s28, 16  ;;  %s5041_s7 = scalar_lea.vmem %s191_s28, 32 }
  0xeb   :  { %p5038_p4 = scmp.ne.s32.totalorder %s191_s28, %s5037_s2  ;;  %p5042_p5 = scmp.lt.s32.totalorder %s191_s28, %s191_s28 }
  0xec   :  { %p5043_p6 = scmp.lt.s32.totalorder %s5041_s7, %s5037_s2 }
  0xee   :  { %p5044_p7 = por %p5043_p6, %p5042_p5 }
  0xf0   :  { %p5045_p8 = pnand %p5044_p7, %p5038_p4 }
  0xf2   :  { %5048 = shalt.err (!%p5045_p8)
}
  0xf3   :  { %193 = dma.hbm_to_vmem [thread:$0]  %s5411_s12, 16, %s191_s28, [#allocation8]  }
  0xf4   :  { %s5057_s29 = scalar_lea.vmem %s215_s6, 16  ;;  %s5061_s24 = scalar_lea.vmem %s215_s6, 32 }
  0xf5   :  { %p5058_p9 = scmp.ne.s32.totalorder %s215_s6, %s5057_s29  ;;  %p5062_p10 = scmp.lt.s32.totalorder %s215_s6, %s215_s6 }
  0xf6   :  { %p5063_p11 = scmp.lt.s32.totalorder %s5061_s24, %s5057_s29 }
  0xf8   :  { %p5064_p12 = por %p5063_p11, %p5062_p10 }
  0xfa   :  { %p5065_p13 = pnand %p5064_p12, %p5058_p9 }
  0xfc   :  { %5068 = shalt.err (!%p5065_p13)
}
  0xfd   :  { %217 = dma.hbm_to_vmem [thread:$0]  %s5431_s21, 16, %s215_s6, [#allocation11]  }
  0xfe   :  { %s5322_s19 = smov [#allocation15]   ;;  %s5323_s10 = smov [#allocation18]  }
  0xff   :  { %s235_s8 = sshll.u32 %s5322_s19, 4  ;;  %s259_s30 = sshll.u32 %s5323_s10, 4  ;;  %s236_s8 = int_to_ptr.vmem [resolvable:$true] %s235_s8  ;;  %s260_s30 = int_to_ptr.vmem [resolvable:$true] %s259_s30 }
 0x100   :  { %s5077_s11 = scalar_lea.vmem %s236_s8, 256  ;;  %p5082_p1 = scmp.lt.s32.totalorder %s236_s8, %s236_s8 }
 0x101   :  { %p5078_p0 = scmp.ne.s32.totalorder %s236_s8, %s5077_s11  ;;  %p5083_p2 = scmp.lt.s32.totalorder %s5077_s11, %s5077_s11 }
 0x103   :  { %p5084_p3 = por %p5083_p2, %p5082_p1 }
 0x105   :  { %p5085_p4 = pnand %p5084_p3, %p5078_p0 }
 0x107   :  { %5088 = shalt.err (!%p5085_p4)
}
 0x108   :  { %s6422_s12 = sld [smem:[#allocation61_spill]]  ;;  %s5097_s15 = scalar_lea.vmem %s260_s30, 256 }
 0x109   :  { %p5098_p5 = scmp.ne.s32.totalorder %s260_s30, %s5097_s15  ;;  %p5102_p6 = scmp.lt.s32.totalorder %s260_s30, %s260_s30 }
 0x10a   :  { %p5103_p7 = scmp.lt.s32.totalorder %s5097_s15, %s5097_s15 }
 0x10c   :  { %p5104_p8 = por %p5103_p7, %p5102_p6 }
 0x10e   :  { %241 = dma.hbm_to_vmem [thread:$0]  %s6422_s12, 256, %s236_s8, [#allocation14], %s5312_s27, %s5312_s27, %s5313_s18  }
 0x10f   :  { %p5105_p9 = pnand %p5104_p8, %p5098_p5 }
 0x111   :  { %5108 = shalt.err (!%p5105_p9)
}
 0x112   :  { %s6423_s21 = sld [smem:[#allocation62_spill]]  ;;  %s5324_s3 = smov [#allocation21]  }
 0x113   :  { %s284_s5 = sshll.u32 %s5324_s3, 4  ;;  %s5325_s0 = smov [#allocation24]   ;;  %s285_s5 = int_to_ptr.vmem [resolvable:$true] %s284_s5 }
 0x114   :  { %s308_s16 = sshll.u32 %s5325_s0, 4  ;;  %s5117_s17 = scalar_lea.vmem %s285_s5, 16  ;;  %s309_s16 = int_to_ptr.vmem [resolvable:$true] %s308_s16 }
 0x115   :  { %p5118_p10 = scmp.ne.s32.totalorder %s285_s5, %s5117_s17  ;;  %s5121_s22 = scalar_lea.vmem %s285_s5, 32 }
 0x116   :  { %p5122_p11 = scmp.lt.s32.totalorder %s285_s5, %s285_s5  ;;  %p5123_p12 = scmp.lt.s32.totalorder %s5121_s22, %s5117_s17 }
 0x118   :  { %265 = dma.hbm_to_vmem [thread:$0]  %s6423_s21, 256, %s260_s30, [#allocation17], %s5312_s27, %s5312_s27, %s5313_s18  }
 0x119   :  { %p5124_p13 = por %p5123_p12, %p5122_p11 }
 0x11b   :  { %p5125_p0 = pnand %p5124_p13, %p5118_p10 }
 0x11d   :  { %5128 = shalt.err (!%p5125_p0)
}
 0x11e   :  { %s6424_s9 = sld [smem:[#allocation63_spill]]  ;;  %s5137_s23 = scalar_lea.vmem %s309_s16, 16 }
 0x11f   :  { %p5138_p1 = scmp.ne.s32.totalorder %s309_s16, %s5137_s23  ;;  %s5141_s26 = scalar_lea.vmem %s309_s16, 32 }
 0x120   :  { %p5142_p2 = scmp.lt.s32.totalorder %s309_s16, %s309_s16  ;;  %p5143_p3 = scmp.lt.s32.totalorder %s5141_s26, %s5137_s23 }
 0x122   :  { %p5144_p4 = por %p5143_p3, %p5142_p2 }
 0x124   :  { %287 = dma.hbm_to_vmem [thread:$0]  %s6424_s9, 16, %s285_s5, [#allocation20]  }
 0x125   :  { %p5145_p5 = pnand %p5144_p4, %p5138_p1 }
 0x127   :  { %5148 = shalt.err (!%p5145_p5)
}
 0x128   :  { %s6425_s20 = sld [smem:[#allocation66_spill]]  ;;  %s5326_s28 = smov [#allocation27]  }
 0x129   :  { %s344_s1 = sshll.u32 %s5326_s28, 4  ;;  %s5327_s6 = smov [#allocation30]   ;;  %s345_s1 = int_to_ptr.vmem [resolvable:$true] %s344_s1 }
 0x12a   :  { %s368_s2 = sshll.u32 %s5327_s6, 4  ;;  %s5157_s7 = scalar_lea.vmem %s345_s1, 16  ;;  %s369_s2 = int_to_ptr.vmem [resolvable:$true] %s368_s2 }
 0x12b   :  { %p5158_p6 = scmp.ne.s32.totalorder %s345_s1, %s5157_s7  ;;  %s5161_s29 = scalar_lea.vmem %s345_s1, 32 }
 0x12c   :  { %p5162_p7 = scmp.lt.s32.totalorder %s345_s1, %s345_s1  ;;  %p5163_p8 = scmp.lt.s32.totalorder %s5161_s29, %s5157_s7 }
 0x12e   :  { %311 = dma.hbm_to_vmem [thread:$0]  %s6425_s20, 16, %s309_s16, [#allocation23]  }
 0x12f   :  { %p5164_p9 = por %p5163_p8, %p5162_p7 }
 0x131   :  { %p5165_p10 = pnand %p5164_p9, %p5158_p6 }
 0x133   :  { %5168 = shalt.err (!%p5165_p10)
}
 0x134   :  { %s6426_s24 = sld [smem:[#allocation75_spill]]  ;;  %s5177_s19 = scalar_lea.vmem %s369_s2, 16 }
 0x135   :  { %p5178_p11 = scmp.ne.s32.totalorder %s369_s2, %s5177_s19  ;;  %s5181_s8 = scalar_lea.vmem %s369_s2, 32 }
 0x136   :  { %p5182_p12 = scmp.lt.s32.totalorder %s369_s2, %s369_s2  ;;  %p5183_p13 = scmp.lt.s32.totalorder %s5181_s8, %s5177_s19 }
 0x138   :  { %p5184_p0 = por %p5183_p13, %p5182_p12 }
 0x13a   :  { %347 = dma.hbm_to_vmem [thread:$0]  %s6426_s24, 16, %s345_s1, [#allocation26]  }
 0x13b   :  { %p5185_p1 = pnand %p5184_p0, %p5178_p11 }
 0x13d   :  { %5188 = shalt.err (!%p5185_p1)
}
 0x13e   :  { %s6427_s10 = sld [smem:[#allocation78_spill]]  ;;  %s5328_s30 = smov [#allocation33]  }
 0x13f   :  { %s391_s11 = sshll.u32 %s5328_s30, 4  ;;  %s5329_s12 = smov [#allocation34]   ;;  %s392_s11 = int_to_ptr.vmem [resolvable:$true] %s391_s11 }
 0x140   :  { %s403_s15 = sshll.u32 %s5329_s12, 4  ;;  %s5197_s21 = scalar_lea.vmem %s392_s11, 256  ;;  %s404_s15 = int_to_ptr.vmem [resolvable:$true] %s403_s15 }
 0x141   :  { %p5198_p2 = scmp.ne.s32.totalorder %s392_s11, %s5197_s21  ;;  %p5202_p3 = scmp.lt.s32.totalorder %s392_s11, %s392_s11 }
 0x142   :  { %p5203_p4 = scmp.lt.s32.totalorder %s5197_s21, %s5197_s21 }
 0x144   :  { %371 = dma.hbm_to_vmem [thread:$0]  %s6427_s10, 16, %s369_s2, [#allocation29]  }
 0x145   :  { %p5204_p5 = por %p5203_p4, %p5202_p3 }
 0x147   :  { %p5205_p6 = pnand %p5204_p5, %p5198_p2 }
 0x149   :  { %5208 = shalt.err (!%p5205_p6)
}
 0x14a   :  { %s6428_s3 = sld [smem:[#allocation80_spill]]  ;;  %s5217_s5 = scalar_lea.vmem %s404_s15, 256 }
 0x14b   :  { %p5218_p7 = scmp.ne.s32.totalorder %s404_s15, %s5217_s5  ;;  %p5222_p8 = scmp.lt.s32.totalorder %s404_s15, %s404_s15 }
 0x14c   :  { %p5223_p9 = scmp.lt.s32.totalorder %s5217_s5, %s5217_s5 }
 0x14e   :  { %p5224_p10 = por %p5223_p9, %p5222_p8 }
 0x150   :  { %397 = dma.hbm_to_vmem [thread:$0]  %s6428_s3, 256, %s392_s11, [#allocation32], %s5312_s27, %s5312_s27, %s5313_s18  }
 0x151   :  { %p5225_p11 = pnand %p5224_p10, %p5218_p7 }
 0x153   :  { %5228 = shalt.err (!%p5225_p11)
}
 0x154   :  { %s6429_s0 = sld [smem:[#allocation81_spill]] }
 0x15a   :  { %409 = dma.hbm_to_vmem [thread:$0]  %s6429_s0, 256, %s404_s15, [#allocation35], %s5312_s27, %s5312_s27, %s5313_s18  }
 0x15b   :  { %5229 = dma.done.wait [#allocation3], 16  }
 0x15c   :  { %5230 = vsyncadd [#allocation3], 4294967280 }
 0x15d   :  { %5231 = dma.done.wait [#allocation5], 32  }
 0x15e   :  { %5232 = vsyncadd [#allocation5], 4294967264 }
 0x15f   :  { %5233 = dma.done.wait [#allocation8], 32  }
 0x160   :  { %5234 = vsyncadd [#allocation8], 4294967264 }
 0x161   :  { %5235 = dma.done.wait [#allocation11], 32  }
 0x162   :  { %5236 = vsyncadd [#allocation11], 4294967264 }
 0x163   :  { %5237 = dma.done.wait [#allocation14], 272  }
 0x164   :  { %5238 = vsyncadd [#allocation14], 4294967024 }
 0x165   :  { %5239 = dma.done.wait [#allocation17], 512  }
 0x166   :  { %5240 = vsyncadd [#allocation17], 4294966784 }
 0x167   :  { %5241 = dma.done.wait [#allocation20], 272  }
 0x168   :  { %5242 = vsyncadd [#allocation20], 4294967024 }
 0x169   :  { %5243 = dma.done.wait [#allocation23], 32  }
 0x16a   :  { %5244 = vsyncadd [#allocation23], 4294967264 }
 0x16b   :  { %5245 = dma.done.wait [#allocation26], 32  }
 0x16c   :  { %5246 = vsyncadd [#allocation26], 4294967264 }
 0x16d   :  { %5247 = dma.done.wait [#allocation29], 32  }
 0x16e   :  { %5248 = vsyncadd [#allocation29], 4294967264 }
 0x16f   :  { %5249 = dma.done.wait [#allocation32], 512  }
 0x170   :  { %5250 = vsyncadd [#allocation32], 4294966784 }
 0x171   :  { %5251 = dma.done.wait [#allocation35], 256  }
 0x172   :  { %5252 = vsyncadd [#allocation35], 4294967040  ;;  %s6430_s27 = sld [smem:[#allocation48_spill]]  ;;  %v5330_v0 = vmov 0.0   ;;  %vm5331_vm0 = vmmov 0   ;;  %vm501_vm1 = vcmask 195584  }
 0x173   :  { %s6431_s18 = sld [smem:[#allocation49_spill]]  ;;  %4697 = vmatprep.subr.mxu1 %v5330_v0  ;;  %4192 = vmatprep.mubr.msk.f32.mxu1 %vm5331_vm0, %v5330_v0  ;;  %vm602_vm2 = vcmask 261120   ;;  %v3854_v19 = vld [vmem:[#allocation2] ss:$0 sm:$0xff]  ;;  %v3858_v42 = vld [vmem:[#allocation4] ss:$0 sm:$0xff] }
 0x174   :  { %s6432_s16 = sld [smem:[#allocation53_spill]]  ;;  %4180 = vmatprep.subr.mxu0 %v5330_v0  ;;  %4186 = vmatprep.mubr.msk.f32.mxu0 %vm5331_vm0, %v5330_v0  ;;  %v3865_v61 = vld [vmem:[#allocation6] ss:$0 sm:$0xff]  ;;  %vm1628_vm3 = vcmask 130048  }
 0x175   :  { %s6433_s17 = sld [smem:[#allocation54_spill]] }
 0x176   :  { %s6434_s22 = sld [smem:[#allocation55_spill]] }
 0x177   :  { %s6435_s9 = sld [smem:[#allocation50_spill]] }
 0x178   :  { %v5658_v1 = vld [vmem:[%s6430_s27 + $0x10] sm:$0xff]  ;;  %v5661_v2 = vld [vmem:[%s6430_s27 + $0x8] sm:$0xff]  ;;  %v5667_v3 = vld [vmem:[%s6430_s27] sm:$0xff]  ;;  %s6436_s23 = sld [smem:[#allocation56_spill]] }
 0x179   :  { %4700 = vmatpush3.msra.mxu1 %v5658_v1  ;;  %4181 = vmatpush3.msra.mxu0 %v5658_v1  ;;  %v491_v4 = vld [vmem:[%s6431_s18 + $0x10] sm:$0xff]  ;;  %v5679_v6 = vld [vmem:[%s6431_s18] sm:$0xff]  ;;  %v5693_v9 = vld [vmem:[%s6431_s18 + $0x8] sm:$0xff]  ;;  %s6437_s26 = sld [smem:[#allocation57_spill]] }
 0x17a   :  { %4698 = vmatprep.subr.mxu1 %v5330_v0  ;;  %4182 = vmatprep.subr.mxu0 %v5330_v0  ;;  %v594_v5 = vld [vmem:[%s6432_s16 + $0x18] sm:$0xff]  ;;  %v593_v7 = vld [vmem:[%s6432_s16 + $0x10] sm:$0xff]  ;;  %v592_v8 = vld [vmem:[%s6432_s16 + $0x8] sm:$0xff]  ;;  %s6438_s20 = sld [smem:[#allocation59_spill]] }
 0x17b   :  { %4701 = vmatpush3.msra.mxu1 %v5661_v2  ;;  %4183 = vmatpush3.msra.mxu0 %v5661_v2  ;;  %v591_v10 = vld [vmem:[%s6432_s16] sm:$0xff]  ;;  %v698_v11 = vld [vmem:[%s6433_s17 + $0x18] sm:$0xff]  ;;  %v697_v12 = vld [vmem:[%s6433_s17 + $0x10] sm:$0xff]  ;;  %s6439_s28 = sld [smem:[#allocation51_spill]] }
 0x17c   :  { %4699 = vmatprep.subr.mxu1 %v5330_v0  ;;  %4184 = vmatprep.subr.mxu0 %v5330_v0  ;;  %v696_v13 = vld [vmem:[%s6433_s17 + $0x8] sm:$0xff]  ;;  %v695_v14 = vld [vmem:[%s6433_s17] sm:$0xff]  ;;  %v890_v26 = vld [vmem:[%s6434_s22 + $0x18] sm:$0xff]  ;;  %s6440_s1 = sld [smem:[#allocation52_spill]] }
 0x17d   :  { %4702 = vmatpush3.msra.mxu1 %v5667_v3  ;;  %4185 = vmatpush3.msra.mxu0 %v5667_v3  ;;  %v889_v29 = vld [vmem:[%s6434_s22 + $0x10] sm:$0xff]  ;;  %v888_v32 = vld [vmem:[%s6434_s22 + $0x8] sm:$0xff]  ;;  %v887_v35 = vld [vmem:[%s6434_s22] sm:$0xff]  ;;  %s6441_s6 = sld [smem:[#allocation58_spill]] }
 0x17e   :  { %4193 = vmatmul.mubr.msk.f32.vlgmr.msra.gmra.mxu1 %vm501_vm1, %v491_v4  ;;  %4195 = vmatprep.subr.mxu1 %v5330_v0  ;;  %v5761_v53 = vld [vmem:[%s6435_s9] sm:$0xff]  ;;  %v993_v55 = vld [vmem:[%s6436_s23 + $0x18] sm:$0xff]  ;;  %v992_v57 = vld [vmem:[%s6436_s23 + $0x10] sm:$0xff]  ;;  %s6442_s2 = sld [smem:[#allocation60_spill]] }
 0x17f   :  { %4196 = vmatpush3.msra.mxu1 %v594_v5  ;;  %4203 = vmatprep.mubr.msk.f32.mxu1 %vm5331_vm0, %v5330_v0  ;;  %v5772_v58 = vld [vmem:[%s6435_s9 + $0x8] sm:$0xff]  ;;  %v990_v4 = vld [vmem:[%s6436_s23] sm:$0xff]  ;;  %v5783_v5 = vld [vmem:[%s6435_s9 + $0x10] sm:$0xff]  ;;  %s6443_s7 = sld [smem:[#allocation64_spill]] }
 0x180   :  { %4197 = vmatprep.subr.mxu1 %v5330_v0  ;;  %4187 = vmatmul.mubr.msk.f32.vlgmr.msra.gmra.mxu0 %vm501_vm1, %v5679_v6  ;;  %v991_v60 = vld [vmem:[%s6436_s23 + $0x8] sm:$0xff]  ;;  %s6444_s29 = sld [smem:[#allocation65_spill]] }
 0x181   :  { %4198 = vmatpush3.msra.mxu1 %v593_v7  ;;  %4189 = vmatprep.mubr.msk.f32.mxu0 %vm5331_vm0, %v5330_v0  ;;  %s6445_s24 = sld [smem:[#allocation67_spill]] }
 0x182   :  { %4199 = vmatprep.subr.mxu1 %v5330_v0  ;;  %4212 = vmatprep.subr.mxu0 %v5330_v0  ;;  %s6446_s19 = sld [smem:[#allocation68_spill]] }
 0x183   :  { %4200 = vmatpush3.msra.mxu1 %v592_v8  ;;  %4213 = vmatpush3.msra.mxu0 %v698_v11  ;;  %s6447_s8 = sld [smem:[#allocation70_spill]] }
 0x184   :  { %4201 = vmatprep.subr.mxu1 %v5330_v0  ;;  %4190 = vmatmul.mubr.msk.f32.gmra.mxu0 %vm501_vm1, %v5693_v9  ;;  %s6448_s10 = sld [smem:[#allocation69_spill]] }
 0x185   :  { %4202 = vmatpush3.msra.mxu1 %v591_v10  ;;  %4220 = vmatprep.mubr.msk.f32.mxu0 %vm5331_vm0, %v5330_v0  ;;  %v1176_v10 = vld [vmem:[%s6437_s26 + $0x18] sm:$0xff]  ;;  %s6449_s30 = sld [smem:[#allocation72_spill]] }
 0x186   :  { %4204 = vmatmul.mubr.msk.f32.vlgmr.msra.gmra.mxu1 %vm602_vm2, %v5667_v3  ;;  %4229 = vmatprep.subr.mxu1 %v5330_v0  ;;  %s6450_s11 = sld [smem:[#allocation76_spill]] }
 0x187   :  { %4206 = vmatprep.mubr.msk.f32.mxu1 %vm5331_vm0, %v5330_v0  ;;  %4214 = vmatprep.subr.mxu0 %v5330_v0  ;;  %s6451_s12 = sld [smem:[#allocation71_spill]] }
 0x188   :  { %4215 = vmatpush3.msra.mxu0 %v697_v12  ;;  %v1175_v12 = vld [vmem:[%s6437_s26 + $0x10] sm:$0xff]  ;;  %s6452_s15 = sld [smem:[#allocation74_spill]] }
 0x189   :  { %4216 = vmatprep.subr.mxu0 %v5330_v0  ;;  %s6453_s21 = sld [smem:[#allocation77_spill]] }
 0x18a   :  { %4207 = vmatmul.mubr.msk.f32.gmra.mxu1 %vm602_vm2, %v5661_v2  ;;  %4217 = vmatpush3.msra.mxu0 %v696_v13  ;;  %s6454_s3 = sld [smem:[#allocation79_spill]] }
 0x18b   :  { %4209 = vmatprep.mubr.msk.f32.mxu1 %vm5331_vm0, %v5330_v0  ;;  %4218 = vmatprep.subr.mxu0 %v5330_v0  ;;  %s6455_s5 = sld [smem:[#allocation73_spill]] }
 0x18c   :  { %4219 = vmatpush3.msra.mxu0 %v695_v14  ;;  %v1174_v14 = vld [vmem:[%s6437_s26 + $0x8] sm:$0xff]  ;;  %s6456_s0 = sld [smem:[#allocation83_spill]] }
 0x18d   :  { %4244 = vmatprep.subr.mxu0 %v5330_v0  ;;  %s6457_s27 = sld [smem:[#allocation82_spill]] }
 0x18e   :  { %4210 = vmatmul.mubr.msk.f32.gmra.mxu1 %vm602_vm2, %v5658_v1 }
 0x18f   :  { %4235 = vmatprep.mubr.msk.f32.mxu1 %vm5331_vm0, %v5330_v0 }
 0x23e   :  { %v5724_v15 = vpop.f32.mrf.mxu1 }
 0x240   :  { %v4194_v16 = vpop.f32.mrf.mxu1  ;;  %v5726_v17 = vpop.f32.mrf.mxu0 }
 0x241   :  { %v1173_v16 = vld [vmem:[%s6437_s26] sm:$0xff] }
 0x242   :  { %v4188_v18 = vpop.f32.mrf.mxu0 }
 0x244   :  { %v5728_v20 = vpop.f32.mrf.mxu0 }
 0x246   :  { %v678_v21 = vpop.f32.mrf.mxu1  ;;  %v4191_v22 = vpop.f32.mrf.mxu0 }
 0x247   :  { %v679_v23 = vadd.f32 %v3854_v19, %v678_v21  ;;  %v1363_v21 = vld [vmem:[%s6438_s20 + $0x10] sm:$0xff]  ;;  %v1362_v22 = vld [vmem:[%s6438_s20 + $0x8] sm:$0xff] }
 0x248   :  { %v4205_v24 = vpop.f32.mrf.mxu1 }
 0x249   :  { %v692_v25 = vmax.f32 %v679_v23, 0.0  ;;  %v1361_v23 = vld [vmem:[%s6438_s20] sm:$0xff]  ;;  %v497_v24 = vld [vmem:[%s6439_s28 + $0x10] sm:$0xff] }
 0x24a   :  { %v683_v27 = vpop.f32.mrf.mxu1 }
 0x24b   :  { %v684_v28 = vadd.f32 %v3854_v19, %v683_v27  ;;  %4221 = vmatmul.mubr.msk.f32.vlgmr.msra.gmra.mxu0 %vm602_vm2, %v692_v25  ;;  %v495_v25 = vld [vmem:[%s6439_s28] sm:$0xff] }
 0x24c   :  { %v4208_v30 = vpop.f32.mrf.mxu1  ;;  %4223 = vmatprep.mubr.msk.f32.mxu0 %vm5331_vm0, %v5330_v0  ;;  %4245 = vmatpush3.msra.mxu0 %v890_v26  ;;  %v5332_v26 = vmov 0   ;;  %v498_v27 = vld [vmem:[%s6440_s1] sm:$0xff] }
 0x24d   :  { %v693_v31 = vmax.f32 %v684_v28, 0.0  ;;  %4246 = vmatprep.subr.mxu0 %v5330_v0  ;;  %4784 = vset.pattern.permute.xlu1 %v5332_v26  ;;  %v496_v28 = vld [vmem:[%s6439_s28 + $0x8] sm:$0xff]  ;;  %v500_v30 = vld [vmem:[%s6440_s1 + $0x10] sm:$0xff] }
 0x24e   :  { %v688_v33 = vpop.f32.mrf.mxu1  ;;  %4247 = vmatpush3.msra.mxu0 %v889_v29  ;;  %4783 = vset.pattern.permute.xlu0 %v5332_v26  ;;  %v499_v29 = vld [vmem:[%s6440_s1 + $0x8] sm:$0xff] }
 0x24f   :  { %v689_v34 = vadd.f32 %v3854_v19, %v688_v33  ;;  %4224 = vmatmul.mubr.msk.f32.gmra.mxu0 %vm602_vm2, %v693_v31  ;;  %4248 = vmatprep.subr.mxu0 %v5330_v0  ;;  %v1364_v19 = vld [vmem:[%s6438_s20 + $0x18] sm:$0xff] }
 0x250   :  { %v4211_v36 = vpop.f32.mrf.mxu1  ;;  %4226 = vmatprep.mubr.msk.f32.mxu0 %vm5331_vm0, %v5330_v0  ;;  %4249 = vmatpush3.msra.mxu0 %v888_v32 }
 0x251   :  { %v694_v37 = vmax.f32 %v689_v34, 0.0  ;;  %4250 = vmatprep.subr.mxu0 %v5330_v0  ;;  %1582 = vperm.xlu1 %4784, %v497_v24  }
 0x252   :  { %4251 = vmatpush3.msra.mxu0 %v887_v35  ;;  %1572 = vperm.xlu0 %4783, %v495_v25  }
 0x253   :  { %4227 = vmatmul.mubr.msk.f32.gmra.mxu0 %vm602_vm2, %v694_v37  ;;  %4278 = vmatprep.subr.mxu0 %v5330_v0 }
 0x254   :  { %4252 = vmatprep.mubr.msk.f32.mxu0 %vm5331_vm0, %v5330_v0 }
 0x255   :  { %1596 = vperm.xlu1 %4784, %v498_v27   ;;  %v3880_v27 = vld [vmem:[#allocation10] ss:$0 sm:$0xff] }
 0x256   :  { %1577 = vperm.xlu0 %4783, %v496_v28  }
 0x257   :  { %4253 = vmatmul.mubr.msk.f32.vlgmr.msra.gmra.mxu0 %vm602_vm2, %v5726_v17 }
 0x258   :  { %4255 = vmatprep.mubr.msk.f32.mxu0 %vm5331_vm0, %v5330_v0 }
 0x259   :  { %1606 = vperm.xlu1 %4784, %v500_v30  }
 0x25a   :  { %1601 = vperm.xlu0 %4783, %v499_v29  }
 0x25b   :  { %4256 = vmatmul.mubr.msk.f32.gmra.mxu0 %vm602_vm2, %v5728_v20 }
 0x25c   :  { %4258 = vmatprep.mubr.msk.f32.mxu0 %vm5331_vm0, %v5330_v0 }
 0x25f   :  { %4259 = vmatmul.mubr.msk.f32.gmra.mxu0 %vm602_vm2, %v5724_v15 }
 0x260   :  { %4284 = vmatprep.mubr.msk.f32.mxu0 %vm5331_vm0, %v5330_v0 }
 0x30b   :  { %v781_v38 = vpop.f32.mrf.mxu0 }
 0x30c   :  { %v782_v47 = vadd.f32 %v3858_v42, %v781_v38 }
 0x30d   :  { %v4222_v39 = vpop.f32.mrf.mxu0 }
 0x30e   :  { %v795_v52 = vmax.f32 %v782_v47, 0.0 }
 0x30f   :  { %v786_v40 = vpop.f32.mrf.mxu0 }
 0x310   :  { %v787_v44 = vadd.f32 %v3858_v42, %v786_v40 }
 0x311   :  { %v4225_v41 = vpop.f32.mrf.mxu0 }
 0x312   :  { %v796_v50 = vmax.f32 %v787_v44, 0.0  ;;  %v3869_v41 = vld [vmem:[#allocation7] ss:$0 sm:$0xff] }
 0x313   :  { %v791_v43 = vpop.f32.mrf.mxu0 }
 0x314   :  { %v792_v45 = vadd.f32 %v3858_v42, %v791_v43 }
 0x315   :  { %v4228_v46 = vpop.f32.mrf.mxu0 }
 0x316   :  { %v797_v48 = vmax.f32 %v792_v45, 0.0 }
 0x317   :  { %v973_v49 = vpop.f32.mrf.mxu0 }
 0x318   :  { %4230 = vmatpush3.msra.mxu1 %v797_v48  ;;  %v974_v62 = vadd.f32 %v3865_v61, %v973_v49 }
 0x319   :  { %4231 = vmatprep.subr.mxu1 %v5330_v0  ;;  %v4254_v51 = vpop.f32.mrf.mxu0 }
 0x31a   :  { %4232 = vmatpush3.msra.mxu1 %v796_v50  ;;  %v987_v7 = vmax.f32 %v974_v62, 0.0  ;;  %v1467_v62 = vld [vmem:[%s6442_s2 + $0x18] sm:$0xff] }
 0x31b   :  { %4233 = vmatprep.subr.mxu1 %v5330_v0  ;;  %v978_v54 = vpop.f32.mrf.mxu0 }
 0x31c   :  { %4234 = vmatpush3.msra.mxu1 %v795_v52  ;;  %v979_v8 = vadd.f32 %v3865_v61, %v978_v54  ;;  %v1270_v52 = vld [vmem:[%s6441_s6 + $0x18] sm:$0xff] }
 0x31d   :  { %4236 = vmatmul.mubr.msk.f32.vlgmr.msra.gmra.mxu1 %vm501_vm1, %v5761_v53  ;;  %v4257_v56 = vpop.f32.mrf.mxu0  ;;  %4261 = vmatprep.subr.mxu1 %v5330_v0 }
 0x31e   :  { %4238 = vmatprep.mubr.msk.f32.mxu1 %vm5331_vm0, %v5330_v0  ;;  %4262 = vmatpush3.msra.mxu1 %v993_v55  ;;  %v988_v11 = vmax.f32 %v979_v8, 0.0  ;;  %v1269_v55 = vld [vmem:[%s6441_s6 + $0x10] sm:$0xff] }
 0x31f   :  { %v983_v59 = vpop.f32.mrf.mxu0  ;;  %4263 = vmatprep.subr.mxu1 %v5330_v0 }
 0x320   :  { %4264 = vmatpush3.msra.mxu1 %v992_v57  ;;  %v984_v13 = vadd.f32 %v3865_v61, %v983_v59  ;;  %v1268_v57 = vld [vmem:[%s6441_s6 + $0x8] sm:$0xff] }
 0x321   :  { %4239 = vmatmul.mubr.msk.f32.gmra.mxu1 %vm501_vm1, %v5772_v58  ;;  %v4260_v63 = vpop.f32.mrf.mxu0  ;;  %4265 = vmatprep.subr.mxu1 %v5330_v0 }
 0x322   :  { %4241 = vmatprep.mubr.msk.f32.mxu1 %vm5331_vm0, %v5330_v0  ;;  %4266 = vmatpush3.msra.mxu1 %v991_v60  ;;  %v989_v18 = vmax.f32 %v984_v13, 0.0  ;;  %v1267_v60 = vld [vmem:[%s6441_s6] sm:$0xff]  ;;  %v1466_v63 = vld [vmem:[%s6442_s2 + $0x10] sm:$0xff] }
 0x323   :  { %4267 = vmatprep.subr.mxu1 %v5330_v0 }
 0x324   :  { %4268 = vmatpush3.msra.mxu1 %v990_v4  ;;  %v1626_v4 = vld [vmem:[#allocation16] sm:$0xff] }
 0x325   :  { %4242 = vmatmul.mubr.msk.f32.gmra.mxu1 %vm501_vm1, %v5783_v5  ;;  %4293 = vmatprep.subr.mxu1 %v5330_v0 }
 0x326   :  { %4269 = vmatprep.mubr.msk.f32.mxu1 %vm5331_vm0, %v5330_v0 }
 0x329   :  { %4270 = vmatmul.mubr.msk.f32.vlgmr.msra.gmra.mxu1 %vm602_vm2, %v987_v7 }
 0x32a   :  { %4272 = vmatprep.mubr.msk.f32.mxu1 %vm5331_vm0, %v5330_v0  ;;  %4294 = vmatpush3.msra.mxu1 %v1176_v10 }
 0x32b   :  { %4295 = vmatprep.subr.mxu1 %v5330_v0 }
 0x32c   :  { %4296 = vmatpush3.msra.mxu1 %v1175_v12 }
 0x32d   :  { %4273 = vmatmul.mubr.msk.f32.gmra.mxu1 %vm602_vm2, %v988_v11  ;;  %4297 = vmatprep.subr.mxu1 %v5330_v0 }
 0x32e   :  { %4275 = vmatprep.mubr.msk.f32.mxu1 %vm5331_vm0, %v5330_v0  ;;  %4298 = vmatpush3.msra.mxu1 %v1174_v14  ;;  %v1625_v14 = vld [vmem:[#allocation15 + $0x8] sm:$0xff] }
 0x32f   :  { %4299 = vmatprep.subr.mxu1 %v5330_v0 }
 0x330   :  { %4300 = vmatpush3.msra.mxu1 %v1173_v16 }
 0x331   :  { %4276 = vmatmul.mubr.msk.f32.gmra.mxu1 %vm602_vm2, %v989_v18  ;;  %4327 = vmatprep.subr.mxu1 %v5330_v0  ;;  %v1624_v18 = vld [vmem:[#allocation15] sm:$0xff] }
 0x332   :  { %4301 = vmatprep.mubr.msk.f32.mxu1 %vm5331_vm0, %v5330_v0 }
 0x335   :  { %4302 = vmatmul.mubr.msk.f32.vlgmr.msra.gmra.mxu1 %vm602_vm2, %v5667_v3 }
 0x336   :  { %4304 = vmatprep.mubr.msk.f32.mxu1 %vm5331_vm0, %v5330_v0  ;;  %4328 = vmatpush3.msra.mxu1 %v1364_v19 }
 0x337   :  { %4329 = vmatprep.subr.mxu1 %v5330_v0 }
 0x338   :  { %4330 = vmatpush3.msra.mxu1 %v1363_v21  ;;  %v3876_v21 = vld [vmem:[#allocation9] ss:$0 sm:$0xff] }
 0x339   :  { %4305 = vmatmul.mubr.msk.f32.gmra.mxu1 %vm602_vm2, %v5661_v2  ;;  %4331 = vmatprep.subr.mxu1 %v5330_v0 }
 0x33a   :  { %4307 = vmatprep.mubr.msk.f32.mxu1 %vm5331_vm0, %v5330_v0  ;;  %4332 = vmatpush3.msra.mxu1 %v1362_v22 }
 0x33b   :  { %4333 = vmatprep.subr.mxu1 %v5330_v0 }
 0x33c   :  { %4334 = vmatpush3.msra.mxu1 %v1361_v23 }
 0x33d   :  { %4308 = vmatmul.mubr.msk.f32.gmra.mxu1 %vm602_vm2, %v5658_v1  ;;  %4361 = vmatprep.subr.mxu1 %v5330_v0 }
 0x33e   :  { %4335 = vmatprep.mubr.msk.f32.mxu1 %vm5331_vm0, %v5330_v0 }
 0x3dd   :  { %v873_v31 = vpop.f32.mrf.mxu1 }
 0x3de   :  { %4336 = vmatmul.mubr.msk.f32.vlgmr.msra.gmra.mxu1 %vm602_vm2, %v873_v31  ;;  %v3884_v31 = vld [vmem:[#allocation12] ss:$0 sm:$0xff] }
 0x3df   :  { %v4237_v32 = vpop.f32.mrf.mxu1  ;;  %4338 = vmatprep.mubr.msk.f32.mxu1 %vm5331_vm0, %v5330_v0 }
 0x3e1   :  { %v878_v33 = vpop.f32.mrf.mxu1 }
 0x3e2   :  { %4339 = vmatmul.mubr.msk.f32.gmra.mxu1 %vm602_vm2, %v878_v33 }
 0x3e3   :  { %v4240_v34 = vpop.f32.mrf.mxu1  ;;  %4341 = vmatprep.mubr.msk.f32.mxu1 %vm5331_vm0, %v5330_v0 }
 0x3e5   :  { %v883_v35 = vpop.f32.mrf.mxu1 }
 0x3e6   :  { %4342 = vmatmul.mubr.msk.f32.gmra.mxu1 %vm602_vm2, %v883_v35 }
 0x3e7   :  { %v4243_v36 = vpop.f32.mrf.mxu1  ;;  %4365 = vmatprep.mubr.msk.f32.mxu1 %vm5331_vm0, %v5330_v0 }
 0x3e9   :  { %v1076_v37 = vpop.f32.mrf.mxu1 }
 0x3ea   :  { %v1077_v46 = vadd.f32 %v3869_v41, %v1076_v37 }
 0x3eb   :  { %v4271_v38 = vpop.f32.mrf.mxu1 }
 0x3ec   :  { %v1090_v51 = vmax.f32 %v1077_v46, 0.0  ;;  %v5918_v38 = vpop.permute.xlu0 %1572 }
 0x3ed   :  { %v1081_v39 = vpop.f32.mrf.mxu1 }
 0x3ee   :  { %v1082_v43 = vadd.f32 %v3869_v41, %v1081_v39 }
 0x3ef   :  { %v4274_v40 = vpop.f32.mrf.mxu1 }
 0x3f0   :  { %v1091_v49 = vmax.f32 %v1082_v43, 0.0 }
 0x3f1   :  { %v1086_v42 = vpop.f32.mrf.mxu1 }
 0x3f2   :  { %v1087_v44 = vadd.f32 %v3869_v41, %v1086_v42 }
 0x3f3   :  { %v4277_v45 = vpop.f32.mrf.mxu1 }
 0x3f4   :  { %v1092_v47 = vmax.f32 %v1087_v44, 0.0 }
 0x3f5   :  { %v5843_v48 = vpop.f32.mrf.mxu1 }
 0x3f6   :  { %4279 = vmatpush3.msra.mxu0 %v1092_v47  ;;  %v1251_v24 = vadd.f32 %v3876_v21, %v5843_v48  ;;  %v5928_v47 = vpop.permute.xlu1 %1582 }
 0x3f7   :  { %4280 = vmatprep.subr.mxu0 %v5330_v0  ;;  %v4303_v50 = vpop.f32.mrf.mxu1 }
 0x3f8   :  { %4281 = vmatpush3.msra.mxu0 %v1091_v49  ;;  %v5908_v28 = vmax.f32 %v1251_v24, 0.0  ;;  %v1901_v24 = vld [vmem:[#allocation19] sm:$0xff] }
 0x3f9   :  { %4282 = vmatprep.subr.mxu0 %v5330_v0  ;;  %v5848_v54 = vpop.f32.mrf.mxu1 }
 0x3fa   :  { %4283 = vmatpush3.msra.mxu0 %v1090_v51  ;;  %v1256_v29 = vadd.f32 %v3876_v21, %v5848_v54  ;;  %v1808_v54 = vld [vmem:[#allocation18 + $0x8] sm:$0xff] }
 0x3fb   :  { %4285 = vmatmul.mubr.msk.f32.vlgmr.msra.gmra.mxu0 %vm501_vm1, %v5761_v53  ;;  %4310 = vmatprep.subr.mxu0 %v5330_v0  ;;  %v4306_v56 = vpop.f32.mrf.mxu1 }
 0x3fc   :  { %4287 = vmatprep.mubr.msk.f32.mxu0 %vm5331_vm0, %v5330_v0  ;;  %4311 = vmatpush3.msra.mxu0 %v1270_v52  ;;  %v5915_v34 = vmax.f32 %v1256_v29, 0.0 }
 0x3fd   :  { %4312 = vmatprep.subr.mxu0 %v5330_v0  ;;  %v5858_v59 = vpop.f32.mrf.mxu1 }
 0x3fe   :  { %4313 = vmatpush3.msra.mxu0 %v1269_v55  ;;  %v1261_v35 = vadd.f32 %v3876_v21, %v5858_v59  ;;  %v5934_v55 = vpop.permute.xlu0 %1577 }
 0x3ff   :  { %4288 = vmatmul.mubr.msk.f32.gmra.mxu0 %vm501_vm1, %v5772_v58  ;;  %4314 = vmatprep.subr.mxu0 %v5330_v0  ;;  %v4309_v61 = vpop.f32.mrf.mxu1 }
 0x400   :  { %4290 = vmatprep.mubr.msk.f32.mxu0 %vm5331_vm0, %v5330_v0  ;;  %4315 = vmatpush3.msra.mxu0 %v1268_v57  ;;  %v5925_v43 = vmax.f32 %v1261_v35, 0.0 }
 0x401   :  { %4316 = vmatprep.subr.mxu0 %v5330_v0 }
 0x402   :  { %4317 = vmatpush3.msra.mxu0 %v1267_v60  ;;  %v1807_v60 = vld [vmem:[#allocation18] sm:$0xff] }
 0x403   :  { %4291 = vmatmul.mubr.msk.f32.gmra.mxu0 %vm501_vm1, %v5783_v5  ;;  %4344 = vmatprep.subr.mxu0 %v5330_v0 }
 0x404   :  { %4318 = vmatprep.mubr.msk.f32.mxu0 %vm5331_vm0, %v5330_v0 }
 0x407   :  { %4319 = vmatmul.mubr.msk.f32.vlgmr.msra.gmra.mxu0 %vm602_vm2, %v5726_v17  ;;  %v1465_v17 = vld [vmem:[%s6442_s2 + $0x8] sm:$0xff] }
 0x408   :  { %4321 = vmatprep.mubr.msk.f32.mxu0 %vm5331_vm0, %v5330_v0  ;;  %4345 = vmatpush3.msra.mxu0 %v1467_v62 }
 0x409   :  { %4346 = vmatprep.subr.mxu0 %v5330_v0 }
 0x40a   :  { %4347 = vmatpush3.msra.mxu0 %v1466_v63 }
 0x40b   :  { %4322 = vmatmul.mubr.msk.f32.gmra.mxu0 %vm602_vm2, %v5728_v20  ;;  %4348 = vmatprep.subr.mxu0 %v5330_v0  ;;  %v1464_v20 = vld [vmem:[%s6442_s2] sm:$0xff] }
 0x40c   :  { %4324 = vmatprep.mubr.msk.f32.mxu0 %vm5331_vm0, %v5330_v0  ;;  %4349 = vmatpush3.msra.mxu0 %v1465_v17 }
 0x40d   :  { %4350 = vmatprep.subr.mxu0 %v5330_v0 }
 0x40e   :  { %4351 = vmatpush3.msra.mxu0 %v1464_v20 }
 0x40f   :  { %4325 = vmatmul.mubr.msk.f32.gmra.mxu0 %vm602_vm2, %v5724_v15  ;;  %4374 = vmatprep.subr.mxu0 %v5330_v0  ;;  %v1627_v15 = vld [vmem:[#allocation16 + $0x8] sm:$0xff] }
 0x410   :  { %4352 = vmatprep.mubr.msk.f32.mxu0 %vm5331_vm0, %v5330_v0  ;;  %4362 = vmatpush3.msra.mxu1 %v1627_v15  ;;  %v5947_v15 = vpop.permute.xlu1 %1596 }
 0x411   :  { %4363 = vmatprep.subr.mxu1 %v5330_v0 }
 0x412   :  { %4364 = vmatpush3.msra.mxu1 %v1626_v4 }
 0x413   :  { %4387 = vmatprep.subr.mxu1 %v5330_v0 }
 0x49e   :  { %v1447_v7 = vpop.f32.mrf.mxu1 }
 0x49f   :  { %v1448_v37 = vadd.f32 %v3884_v31, %v1447_v7 }
 0x4a0   :  { %v4337_v8 = vpop.f32.mrf.mxu1 }
 0x4a1   :  { %v1461_v46 = vmax.f32 %v1448_v37, 0.0 }
 0x4a2   :  { %v1452_v10 = vpop.f32.mrf.mxu1 }
 0x4a3   :  { %v1453_v49 = vadd.f32 %v3884_v31, %v1452_v10  ;;  %v1591_v61 = vsub.f32 %v1461_v46, %v5908_v28 }
 0x4a4   :  { %v4340_v11 = vpop.f32.mrf.mxu1 }
 0x4a5   :  { %v1462_v62 = vmax.f32 %v1453_v49, 0.0  ;;  %v1609_v8 = vmul.f32 %v5947_v15, %v1591_v61 }
 0x4a6   :  { %v5894_v12 = vpop.f32.mrf.mxu1 }
 0x4a7   :  { %v1458_v63 = vadd.f32 %v3884_v31, %v5894_v12  ;;  %v1592_v7 = vsub.f32 %v1462_v62, %v5915_v34  ;;  %v5957_v12 = vpop.permute.xlu0 %1601 }
 0x4a8   :  { %v4343_v13 = vpop.f32.mrf.mxu1 }
 0x4a9   :  { %v1463_v10 = vmax.f32 %v1458_v63, 0.0  ;;  %v1612_v13 = vadd.f32 %v1609_v8, %v5908_v28 }
 0x4bb   :  { %v1159_v16 = vpop.f32.mrf.mxu0 }
 0x4bc   :  { %4353 = vmatmul.mubr.msk.f32.vlgmr.msra.gmra.mxu0 %vm602_vm2, %v1159_v16  ;;  %v1610_v16 = vmul.f32 %v5957_v12, %v1592_v7 }
 0x4bd   :  { %v4286_v19 = vpop.f32.mrf.mxu0  ;;  %4355 = vmatprep.mubr.msk.f32.mxu0 %vm5331_vm0, %v5330_v0  ;;  %4375 = vmatpush3.msra.mxu0 %v1625_v14  ;;  %v1593_v14 = vsub.f32 %v1463_v10, %v5925_v43 }
 0x4be   :  { %4376 = vmatprep.subr.mxu0 %v5330_v0  ;;  %v1613_v19 = vadd.f32 %v1610_v16, %v5915_v34 }
 0x4bf   :  { %v1164_v22 = vpop.f32.mrf.mxu0  ;;  %4377 = vmatpush3.msra.mxu0 %v1624_v18  ;;  %v5965_v18 = vpop.permute.xlu1 %1606 }
 0x4c0   :  { %4356 = vmatmul.mubr.msk.f32.gmra.mxu0 %vm602_vm2, %v1164_v22  ;;  %4400 = vmatprep.subr.mxu0 %v5330_v0  ;;  %v1611_v21 = vmul.f32 %v5965_v18, %v1593_v14 }
 0x4c1   :  { %v4289_v23 = vpop.f32.mrf.mxu0  ;;  %4358 = vmatprep.mubr.msk.f32.mxu0 %vm5331_vm0, %v5330_v0 }
 0x4c2   :  { %v1614_v22 = vadd.f32 %v1611_v21, %v5925_v43  ;;  %v1902_v23 = vld [vmem:[#allocation19 + $0x8] sm:$0xff] }
 0x4c3   :  { %v1169_v25 = vpop.f32.mrf.mxu0 }
 0x4c4   :  { %4359 = vmatmul.mubr.msk.f32.gmra.mxu0 %vm602_vm2, %v1169_v25  ;;  %v3888_v25 = vld [vmem:[#allocation13] ss:$0 sm:$0xff] }
 0x4c5   :  { %v4292_v26 = vpop.f32.mrf.mxu0  ;;  %4378 = vmatprep.mubr.msk.f32.mxu0 %vm5331_vm0, %v5330_v0 }
 0x4c7   :  { %v1344_v30 = vpop.f32.mrf.mxu0 }
 0x4c8   :  { %v1345_v32 = vadd.f32 %v3880_v27, %v1344_v30  ;;  %4379 = vmatmul.mubr.msk.f32.vlgmr.msra.gmra.mxu0 %vm1628_vm3, %v5908_v28 }
 0x4c9   :  { %v4320_v33 = vpop.f32.mrf.mxu0  ;;  %4381 = vmatprep.mubr.msk.f32.mxu0 %vm5331_vm0, %v5330_v0  ;;  %4401 = vmatpush3.msra.mxu0 %v1902_v23  ;;  %v2010_v23 = vld [vmem:[%s6443_s7 + $0x10] sm:$0xff] }
 0x4ca   :  { %v1358_v36 = vmax.f32 %v1345_v32, 0.0  ;;  %4402 = vmatprep.subr.mxu0 %v5330_v0 }
 0x4cb   :  { %v1349_v39 = vpop.f32.mrf.mxu0  ;;  %4403 = vmatpush3.msra.mxu0 %v1901_v24  ;;  %v2009_v24 = vld [vmem:[%s6443_s7 + $0x8] sm:$0xff] }
 0x4cc   :  { %v1567_v40 = vsub.f32 %v1358_v36, %v5908_v28  ;;  %v1350_v41 = vadd.f32 %v3880_v27, %v1349_v39  ;;  %4382 = vmatmul.mubr.msk.f32.gmra.mxu0 %vm1628_vm3, %v5915_v34  ;;  %4430 = vmatprep.subr.mxu0 %v5330_v0 }
 0x4cd   :  { %v4323_v42 = vpop.f32.mrf.mxu0  ;;  %4384 = vmatprep.mubr.msk.f32.mxu0 %vm5331_vm0, %v5330_v0 }
 0x4ce   :  { %v1585_v44 = vmul.f32 %v5918_v38, %v1567_v40  ;;  %v1359_v45 = vmax.f32 %v1350_v41, 0.0 }
 0x4cf   :  { %v1354_v48 = vpop.f32.mrf.mxu0 }
 0x4d0   :  { %v1588_v50 = vadd.f32 %v1585_v44, %v5908_v28  ;;  %v1568_v51 = vsub.f32 %v1359_v45, %v5915_v34  ;;  %v1355_v52 = vadd.f32 %v3880_v27, %v1354_v48  ;;  %4385 = vmatmul.mubr.msk.f32.gmra.mxu0 %vm1628_vm3, %v5925_v43 }
 0x4d1   :  { %v4326_v56 = vpop.f32.mrf.mxu0  ;;  %4404 = vmatprep.mubr.msk.f32.mxu0 %vm5331_vm0, %v5330_v0 }
 0x4d2   :  { %v1586_v57 = vmul.f32 %v5934_v55, %v1568_v51  ;;  %v1360_v59 = vmax.f32 %v1355_v52, 0.0  ;;  %4366 = vmatmul.mubr.msk.f32.vlgmr.msra.gmra.mxu1 %vm1628_vm3, %v1588_v50 }
 0x4d3   :  { %4368 = vmatprep.mubr.msk.f32.mxu1 %vm5331_vm0, %v5330_v0  ;;  %4388 = vmatpush3.msra.mxu1 %v1808_v54 }
 0x4d4   :  { %v1589_v17 = vadd.f32 %v1586_v57, %v5915_v34  ;;  %v1569_v20 = vsub.f32 %v1360_v59, %v5925_v43  ;;  %4389 = vmatprep.subr.mxu1 %v5330_v0 }
 0x4d5   :  { %4390 = vmatpush3.msra.mxu1 %v1807_v60 }
 0x4d6   :  { %v1587_v4 = vmul.f32 %v5928_v47, %v1569_v20  ;;  %4369 = vmatmul.mubr.msk.f32.gmra.mxu1 %vm1628_vm3, %v1589_v17  ;;  %4413 = vmatprep.subr.mxu1 %v5330_v0 }
 0x4d7   :  { %4371 = vmatprep.mubr.msk.f32.mxu1 %vm5331_vm0, %v5330_v0 }
 0x4d8   :  { %v1590_v11 = vadd.f32 %v1587_v4, %v5925_v43 }
 0x4da   :  { %4372 = vmatmul.mubr.msk.f32.gmra.mxu1 %vm1628_vm3, %v1590_v11 }
 0x4db   :  { %4391 = vmatprep.mubr.msk.f32.mxu1 %vm5331_vm0, %v5330_v0 }
 0x4de   :  { %4392 = vmatmul.mubr.msk.f32.vlgmr.msra.gmra.mxu1 %vm1628_vm3, %v1612_v13 }
 0x4df   :  { %4394 = vmatprep.mubr.msk.f32.mxu1 %vm5331_vm0, %v5330_v0 }
 0x4e2   :  { %4395 = vmatmul.mubr.msk.f32.gmra.mxu1 %vm1628_vm3, %v1613_v19 }
 0x4e3   :  { %4397 = vmatprep.mubr.msk.f32.mxu1 %vm5331_vm0, %v5330_v0 }
 0x4e6   :  { %4398 = vmatmul.mubr.msk.f32.gmra.mxu1 %vm1628_vm3, %v1614_v22  ;;  %v2011_v22 = vld [vmem:[%s6443_s7 + $0x18] sm:$0xff] }
 0x4e7   :  { %4421 = vmatprep.mubr.msk.f32.mxu1 %vm5331_vm0, %v5330_v0  ;;  %4414 = vmatpush3.msra.mxu1 %v2011_v22 }
 0x4e8   :  { %4415 = vmatprep.subr.mxu1 %v5330_v0 }
 0x4e9   :  { %4416 = vmatpush3.msra.mxu1 %v2010_v23 }
 0x4ea   :  { %4417 = vmatprep.subr.mxu1 %v5330_v0 }
 0x4eb   :  { %4418 = vmatpush3.msra.mxu1 %v2009_v24  ;;  %v2481_v24 = vld [vmem:[%s6446_s19 + $0x8] sm:$0xff] }
 0x4ec   :  { %4419 = vmatprep.subr.mxu1 %v5330_v0 }
 0x57c   :  { %v1550_v26 = vpop.f32.mrf.mxu0 }
 0x57d   :  { %v1551_v27 = vadd.f32 %v3888_v25, %v1550_v26 }
 0x57e   :  { %v4354_v29 = vpop.f32.mrf.mxu0 }
 0x57f   :  { %v1564_v30 = vmax.f32 %v1551_v27, 0.0  ;;  %v3904_v27 = vld [vmem:[#allocation21] ss:$0 sm:$0xff] }
 0x580   :  { %v1555_v31 = vpop.f32.mrf.mxu0 }
 0x581   :  { %v1615_v32 = vsub.f32 %v1564_v30, %v5908_v28  ;;  %v1556_v33 = vadd.f32 %v3888_v25, %v1555_v31 }
 0x582   :  { %v4357_v35 = vpop.f32.mrf.mxu0 }
 0x583   :  { %v1618_v36 = vmul.f32 %v1615_v32, %v5947_v15  ;;  %v1565_v37 = vmax.f32 %v1556_v33, 0.0 }
 0x584   :  { %v1560_v39 = vpop.f32.mrf.mxu0 }
 0x585   :  { %v1621_v40 = vadd.f32 %v1618_v36, %v5908_v28  ;;  %v1616_v41 = vsub.f32 %v1565_v37, %v5915_v34  ;;  %v1561_v42 = vadd.f32 %v3888_v25, %v1560_v39  ;;  %v2008_v25 = vld [vmem:[%s6443_s7] sm:$0xff] }
 0x586   :  { %v4360_v44 = vpop.f32.mrf.mxu0  ;;  %4420 = vmatpush3.msra.mxu1 %v2008_v25 }
 0x587   :  { %v1619_v45 = vmul.f32 %v1616_v41, %v5957_v12  ;;  %v1566_v46 = vmax.f32 %v1561_v42, 0.0  ;;  %4405 = vmatmul.mubr.msk.f32.vlgmr.msra.gmra.mxu0 %vm1628_vm3, %v1621_v40  ;;  %4445 = vmatprep.subr.mxu1 %v5330_v0 }
 0x588   :  { %4407 = vmatprep.mubr.msk.f32.mxu0 %vm5331_vm0, %v5330_v0  ;;  %v1793_v48 = vpop.f32.mrf.mxu0 }
 0x589   :  { %v1622_v49 = vadd.f32 %v1619_v45, %v5915_v34  ;;  %v1617_v50 = vsub.f32 %v1566_v46, %v5925_v43  ;;  %v2197_v46 = vld [vmem:[%s6444_s29 + $0x18] sm:$0xff] }
 0x58a   :  { %v4380_v51 = vpop.f32.mrf.mxu0 }
 0x58b   :  { %v1620_v28 = vmul.f32 %v1617_v50, %v5965_v18  ;;  %4408 = vmatmul.mubr.msk.f32.gmra.mxu0 %vm1628_vm3, %v1622_v49  ;;  %v2195_v49 = vld [vmem:[%s6444_s29 + $0x8] sm:$0xff]  ;;  %v2194_v50 = vld [vmem:[%s6444_s29] sm:$0xff]  ;;  %v3905_v51 = vld [vmem:[#allocation22] ss:$0 sm:$0xff] }
 0x58c   :  { %4410 = vmatprep.mubr.msk.f32.mxu0 %vm5331_vm0, %v5330_v0  ;;  %v1798_v52 = vpop.f32.mrf.mxu0 }
 0x58d   :  { %v1623_v54 = vadd.f32 %v1620_v28, %v5925_v43 }
 0x58e   :  { %v4383_v56 = vpop.f32.mrf.mxu0 }
 0x58f   :  { %4411 = vmatmul.mubr.msk.f32.gmra.mxu0 %vm1628_vm3, %v1623_v54 }
 0x590   :  { %v1803_v57 = vpop.f32.mrf.mxu0  ;;  %4436 = vmatprep.mubr.msk.f32.mxu0 %vm5331_vm0, %v5330_v0 }
 0x592   :  { %v1704_v34 = vpop.f32.mrf.mxu1  ;;  %v4386_v59 = vpop.f32.mrf.mxu0 }
 0x593   :  { %v1794_v60 = vadd.f32 %v1793_v48, %v1704_v34  ;;  %v2196_v48 = vld [vmem:[%s6444_s29 + $0x10] sm:$0xff] }
 0x594   :  { %v4367_v61 = vpop.f32.mrf.mxu1 }
 0x596   :  { %v1709_v62 = vpop.f32.mrf.mxu1 }
 0x597   :  { %v1799_v63 = vadd.f32 %v1798_v52, %v1709_v62 }
 0x598   :  { %v4370_v17 = vpop.f32.mrf.mxu1 }
 0x59a   :  { %v1714_v20 = vpop.f32.mrf.mxu1 }
 0x59b   :  { %v1804_v4 = vadd.f32 %v1803_v57, %v1714_v20 }
 0x59c   :  { %v4373_v7 = vpop.f32.mrf.mxu1 }
 0x59d   :  { %v2298_v7 = vld [vmem:[%s6445_s24 + $0x8] sm:$0xff] }
 0x59e   :  { %v1884_v43 = vpop.f32.mrf.mxu1 }
 0x59f   :  { %v1898_v8 = vadd.f32 %v1884_v43, %v1794_v60  ;;  %v3912_v43 = vld [vmem:[#allocation24] ss:$0 sm:$0xff] }
 0x5a0   :  { %v4393_v10 = vpop.f32.mrf.mxu1 }
 0x5a2   :  { %v1889_v11 = vpop.f32.mrf.mxu1 }
 0x5a3   :  { %v1899_v13 = vadd.f32 %v1889_v11, %v1799_v63 }
 0x5a4   :  { %v4396_v14 = vpop.f32.mrf.mxu1 }
 0x5a5   :  { %v2483_v14 = vld [vmem:[%s6446_s19 + $0x18] sm:$0xff] }
 0x5a6   :  { %v1894_v16 = vpop.f32.mrf.mxu1 }
 0x5a7   :  { %v1900_v19 = vadd.f32 %v1894_v16, %v1804_v4 }
 0x5a8   :  { %v4399_v21 = vpop.f32.mrf.mxu1 }
 0x5a9   :  { %v2482_v21 = vld [vmem:[%s6446_s19 + $0x10] sm:$0xff] }
 0x647   :  { %v1978_v26 = vpop.f32.mrf.mxu0 }
 0x648   :  { %v1992_v29 = vadd.f32 %v1978_v26, %v1898_v8 }
 0x649   :  { %v4406_v30 = vpop.f32.mrf.mxu0 }
 0x64a   :  { %v2002_v31 = vadd.f32 %v3904_v27, %v1992_v29 }
 0x64b   :  { %v1983_v32 = vpop.f32.mrf.mxu0 }
 0x64c   :  { %v2005_v33 = vmax.f32 %v2002_v31, 0.0  ;;  %v1993_v35 = vadd.f32 %v1983_v32, %v1899_v13 }
 0x64d   :  { %v4409_v36 = vpop.f32.mrf.mxu0 }
 0x64e   :  { %v2003_v37 = vadd.f32 %v3904_v27, %v1993_v35  ;;  %4422 = vmatmul.mubr.msk.f32.vlgmr.msra.gmra.mxu1 %vm602_vm2, %v2005_v33 }
 0x64f   :  { %v1988_v39 = vpop.f32.mrf.mxu0  ;;  %4424 = vmatprep.mubr.msk.f32.mxu1 %vm5331_vm0, %v5330_v0  ;;  %4446 = vmatpush3.msra.mxu1 %v2197_v46 }
 0x650   :  { %v2006_v40 = vmax.f32 %v2003_v37, 0.0  ;;  %v1994_v41 = vadd.f32 %v1988_v39, %v1900_v19  ;;  %4447 = vmatprep.subr.mxu1 %v5330_v0 }
 0x651   :  { %v4412_v42 = vpop.f32.mrf.mxu0  ;;  %4448 = vmatpush3.msra.mxu1 %v2196_v48 }
 0x652   :  { %v2004_v44 = vadd.f32 %v3904_v27, %v1994_v41  ;;  %4425 = vmatmul.mubr.msk.f32.gmra.mxu1 %vm602_vm2, %v2006_v40  ;;  %4449 = vmatprep.subr.mxu1 %v5330_v0  ;;  %v2480_v27 = vld [vmem:[%s6446_s19] sm:$0xff] }
 0x653   :  { %4427 = vmatprep.mubr.msk.f32.mxu1 %vm5331_vm0, %v5330_v0  ;;  %4450 = vmatpush3.msra.mxu1 %v2195_v49 }
 0x654   :  { %v2007_v45 = vmax.f32 %v2004_v44, 0.0  ;;  %4451 = vmatprep.subr.mxu1 %v5330_v0  ;;  %v3916_v44 = vld [vmem:[#allocation25] ss:$0 sm:$0xff] }
 0x655   :  { %4452 = vmatpush3.msra.mxu1 %v2194_v50 }
 0x656   :  { %4428 = vmatmul.mubr.msk.f32.gmra.mxu1 %vm602_vm2, %v2007_v45  ;;  %4479 = vmatprep.subr.mxu1 %v5330_v0 }
 0x657   :  { %4453 = vmatprep.mubr.msk.f32.mxu1 %vm5331_vm0, %v5330_v0 }
 0x70e   :  { %v2094_v28 = vpop.f32.mrf.mxu1 }
 0x70f   :  { %v2095_v52 = vadd.f32 %v3905_v51, %v2094_v28 }
 0x710   :  { %v4423_v54 = vpop.f32.mrf.mxu1 }
 0x711   :  { %v2108_v56 = vmax.f32 %v2095_v52, 0.0 }
 0x712   :  { %v2099_v57 = vpop.f32.mrf.mxu1 }
 0x713   :  { %v6025_v34 = vadd.f32 %v2108_v56, %v5667_v3  ;;  %v2100_v59 = vadd.f32 %v3905_v51, %v2099_v57  ;;  %v2586_v57 = vld [vmem:[%s6447_s8 + $0x18] sm:$0xff] }
 0x714   :  { %v4426_v60 = vpop.f32.mrf.mxu1 }
 0x715   :  { %v2109_v61 = vmax.f32 %v2100_v59, 0.0  ;;  %4454 = vmatmul.mubr.msk.f32.vlgmr.msra.gmra.mxu1 %vm602_vm2, %v6025_v34  ;;  %v2585_v60 = vld [vmem:[%s6447_s8 + $0x10] sm:$0xff] }
 0x716   :  { %v2104_v62 = vpop.f32.mrf.mxu1  ;;  %4456 = vmatprep.mubr.msk.f32.mxu1 %vm5331_vm0, %v5330_v0 }
 0x717   :  { %v6032_v63 = vadd.f32 %v2109_v61, %v5661_v2  ;;  %v2105_v17 = vadd.f32 %v3905_v51, %v2104_v62  ;;  %v2300_v2 = vld [vmem:[%s6445_s24 + $0x18] sm:$0xff]  ;;  %v3923_v62 = vld [vmem:[%s6448_s10] ss:$0 sm:$0xff] }
 0x718   :  { %v4429_v20 = vpop.f32.mrf.mxu1 }
 0x719   :  { %v2110_v4 = vmax.f32 %v2105_v17, 0.0  ;;  %4457 = vmatmul.mubr.msk.f32.gmra.mxu1 %vm602_vm2, %v6032_v63  ;;  %v2584_v17 = vld [vmem:[%s6447_s8 + $0x8] sm:$0xff] }
 0x71a   :  { %4459 = vmatprep.mubr.msk.f32.mxu1 %vm5331_vm0, %v5330_v0 }
 0x71b   :  { %v6039_v3 = vadd.f32 %v2110_v4, %v5658_v1  ;;  %v4785_v1 = vld [vmem:[%s6431_s18 + $0x10] sm:$0xff] }
 0x71d   :  { %4431 = vmatpush3.msra.mxu0 %v6039_v3  ;;  %4460 = vmatmul.mubr.msk.f32.gmra.mxu1 %vm602_vm2, %v6039_v3 }
 0x71e   :  { %4432 = vmatprep.subr.mxu0 %v5330_v0  ;;  %4485 = vmatprep.mubr.msk.f32.mxu1 %vm5331_vm0, %v5330_v0 }
 0x71f   :  { %4433 = vmatpush3.msra.mxu0 %v6032_v63 }
 0x720   :  { %4434 = vmatprep.subr.mxu0 %v5330_v0 }
 0x721   :  { %4435 = vmatpush3.msra.mxu0 %v6025_v34 }
 0x722   :  { %4437 = vmatmul.mubr.msk.f32.vlgmr.msra.gmra.mxu0 %vm501_vm1, %v5679_v6  ;;  %4462 = vmatprep.subr.mxu0 %v5330_v0  ;;  %v2299_v6 = vld [vmem:[%s6445_s24 + $0x10] sm:$0xff] }
 0x723   :  { %4439 = vmatprep.mubr.msk.f32.mxu0 %vm5331_vm0, %v5330_v0  ;;  %4463 = vmatpush3.msra.mxu0 %v2300_v2 }
 0x724   :  { %4464 = vmatprep.subr.mxu0 %v5330_v0 }
 0x725   :  { %4465 = vmatpush3.msra.mxu0 %v2299_v6 }
 0x726   :  { %4440 = vmatmul.mubr.msk.f32.gmra.mxu0 %vm501_vm1, %v5693_v9  ;;  %4466 = vmatprep.subr.mxu0 %v5330_v0  ;;  %v2297_v9 = vld [vmem:[%s6445_s24] sm:$0xff] }
 0x727   :  { %4442 = vmatprep.mubr.msk.f32.mxu0 %vm5331_vm0, %v5330_v0  ;;  %4467 = vmatpush3.msra.mxu0 %v2298_v7 }
 0x728   :  { %4468 = vmatprep.subr.mxu0 %v5330_v0 }
 0x729   :  { %4469 = vmatpush3.msra.mxu0 %v2297_v9 }
 0x72a   :  { %4443 = vmatmul.mubr.msk.f32.gmra.mxu0 %vm501_vm1, %v4785_v1  ;;  %4494 = vmatprep.subr.mxu0 %v5330_v0 }
 0x72b   :  { %4470 = vmatprep.mubr.msk.f32.mxu0 %vm5331_vm0, %v5330_v0 }
 0x7d5   :  { %v2280_v8 = vpop.f32.mrf.mxu1 }
 0x7d6   :  { %v2281_v10 = vadd.f32 %v3912_v43, %v2280_v8 }
 0x7d7   :  { %v4455_v11 = vpop.f32.mrf.mxu1 }
 0x7d8   :  { %v2294_v13 = vmax.f32 %v2281_v10, 0.0  ;;  %v2766_v10 = vld [vmem:[%s6449_s30] sm:$0xff]  ;;  %v2957_v11 = vld [vmem:[%s6450_s11 + $0x18] sm:$0xff] }
 0x7d9   :  { %v2285_v16 = vpop.f32.mrf.mxu1 }
 0x7da   :  { %v2286_v19 = vadd.f32 %v3912_v43, %v2285_v16  ;;  %4471 = vmatmul.mubr.msk.f32.vlgmr.msra.gmra.mxu0 %vm602_vm2, %v2294_v13  ;;  %v2956_v13 = vld [vmem:[%s6450_s11 + $0x10] sm:$0xff]  ;;  %v2954_v16 = vld [vmem:[%s6450_s11] sm:$0xff] }
 0x7db   :  { %v4458_v22 = vpop.f32.mrf.mxu1  ;;  %4473 = vmatprep.mubr.msk.f32.mxu0 %vm5331_vm0, %v5330_v0  ;;  %4495 = vmatpush3.msra.mxu0 %v2483_v14  ;;  %v2955_v14 = vld [vmem:[%s6450_s11 + $0x8] sm:$0xff] }
 0x7dc   :  { %v2295_v23 = vmax.f32 %v2286_v19, 0.0  ;;  %4496 = vmatprep.subr.mxu0 %v5330_v0 }
 0x7dd   :  { %v2290_v25 = vpop.f32.mrf.mxu1  ;;  %4497 = vmatpush3.msra.mxu0 %v2482_v21 }
 0x7de   :  { %v2291_v26 = vadd.f32 %v3912_v43, %v2290_v25  ;;  %4474 = vmatmul.mubr.msk.f32.gmra.mxu0 %vm602_vm2, %v2295_v23  ;;  %4498 = vmatprep.subr.mxu0 %v5330_v0  ;;  %v2768_v43 = vld [vmem:[%s6449_s30 + $0x10] sm:$0xff] }
 0x7df   :  { %v4461_v29 = vpop.f32.mrf.mxu1  ;;  %4476 = vmatprep.mubr.msk.f32.mxu0 %vm5331_vm0, %v5330_v0  ;;  %4499 = vmatpush3.msra.mxu0 %v2481_v24 }
 0x7e0   :  { %v2296_v30 = vmax.f32 %v2291_v26, 0.0  ;;  %4500 = vmatprep.subr.mxu0 %v5330_v0 }
 0x7e1   :  { %4501 = vmatpush3.msra.mxu0 %v2480_v27 }
 0x7e2   :  { %4477 = vmatmul.mubr.msk.f32.gmra.mxu0 %vm602_vm2, %v2296_v30  ;;  %v6085_v31 = vpop.f32.mrf.mxu0  ;;  %4528 = vmatprep.subr.mxu0 %v5330_v0 }
 0x7e3   :  { %4502 = vmatprep.mubr.msk.f32.mxu0 %vm5331_vm0, %v5330_v0 }
 0x7e4   :  { %v4438_v32 = vpop.f32.mrf.mxu0 }
 0x7e5   :  { %v3927_v32 = vld [vmem:[%s6451_s12] ss:$0 sm:$0xff] }
 0x7e6   :  { %4503 = vmatmul.mubr.msk.f32.vlgmr.msra.gmra.mxu0 %vm602_vm2, %v6085_v31  ;;  %v6092_v33 = vpop.f32.mrf.mxu0 }
 0x7e7   :  { %4505 = vmatprep.mubr.msk.f32.mxu0 %vm5331_vm0, %v5330_v0 }
 0x7e8   :  { %v4441_v35 = vpop.f32.mrf.mxu0 }
 0x7ea   :  { %4506 = vmatmul.mubr.msk.f32.gmra.mxu0 %vm602_vm2, %v6092_v33  ;;  %v6098_v36 = vpop.f32.mrf.mxu0 }
 0x7eb   :  { %4508 = vmatprep.mubr.msk.f32.mxu0 %vm5331_vm0, %v5330_v0 }
 0x7ec   :  { %v4444_v37 = vpop.f32.mrf.mxu0 }
 0x7ee   :  { %4509 = vmatmul.mubr.msk.f32.gmra.mxu0 %vm602_vm2, %v6098_v36 }
 0x7ef   :  { %4534 = vmatprep.mubr.msk.f32.mxu0 %vm5331_vm0, %v5330_v0 }
 0x89a   :  { %v2383_v39 = vpop.f32.mrf.mxu0 }
 0x89b   :  { %v2384_v50 = vadd.f32 %v3916_v44, %v2383_v39 }
 0x89c   :  { %v4472_v40 = vpop.f32.mrf.mxu0 }
 0x89d   :  { %v2397_v56 = vmax.f32 %v2384_v50, 0.0  ;;  %v2863_v50 = vld [vmem:[%s6452_s15 + $0x18] sm:$0xff] }
 0x89e   :  { %v2388_v41 = vpop.f32.mrf.mxu0 }
 0x89f   :  { %v2389_v46 = vadd.f32 %v3916_v44, %v2388_v41 }
 0x8a0   :  { %v4475_v42 = vpop.f32.mrf.mxu0 }
 0x8a1   :  { %v2398_v52 = vmax.f32 %v2389_v46, 0.0 }
 0x8a2   :  { %v2393_v45 = vpop.f32.mrf.mxu0 }
 0x8a3   :  { %v2394_v48 = vadd.f32 %v3916_v44, %v2393_v45 }
 0x8a4   :  { %v4478_v49 = vpop.f32.mrf.mxu0 }
 0x8a5   :  { %v2399_v51 = vmax.f32 %v2394_v48, 0.0 }
 0x8a6   :  { %v2566_v28 = vpop.f32.mrf.mxu0 }
 0x8a7   :  { %4480 = vmatpush3.msra.mxu1 %v2399_v51  ;;  %v2567_v4 = vadd.f32 %v3923_v62, %v2566_v28  ;;  %v4786_v51 = vld [vmem:[%s6435_s9] sm:$0xff] }
 0x8a8   :  { %4481 = vmatprep.subr.mxu1 %v5330_v0  ;;  %v4504_v54 = vpop.f32.mrf.mxu0 }
 0x8a9   :  { %4482 = vmatpush3.msra.mxu1 %v2398_v52  ;;  %v2580_v1 = vmax.f32 %v2567_v4, 0.0  ;;  %v2862_v52 = vld [vmem:[%s6452_s15 + $0x10] sm:$0xff] }
 0x8aa   :  { %4483 = vmatprep.subr.mxu1 %v5330_v0  ;;  %v2571_v59 = vpop.f32.mrf.mxu0 }
 0x8ab   :  { %4484 = vmatpush3.msra.mxu1 %v2397_v56  ;;  %v2572_v6 = vadd.f32 %v3923_v62, %v2571_v59  ;;  %v2861_v56 = vld [vmem:[%s6452_s15 + $0x8] sm:$0xff] }
 0x8ac   :  { %4486 = vmatmul.mubr.msk.f32.vlgmr.msra.gmra.mxu1 %vm501_vm1, %v5761_v53  ;;  %4511 = vmatprep.subr.mxu1 %v5330_v0  ;;  %v4507_v61 = vpop.f32.mrf.mxu0  ;;  %v2583_v53 = vld [vmem:[%s6447_s8] sm:$0xff] }
 0x8ad   :  { %4488 = vmatprep.mubr.msk.f32.mxu1 %vm5331_vm0, %v5330_v0  ;;  %4512 = vmatpush3.msra.mxu1 %v2586_v57  ;;  %v2581_v7 = vmax.f32 %v2572_v6, 0.0  ;;  %v4787_v57 = vld [vmem:[%s6435_s9 + $0x8] sm:$0xff]  ;;  %v4788_v61 = vld [vmem:[%s6435_s9 + $0x10] sm:$0xff] }
 0x8ae   :  { %4513 = vmatprep.subr.mxu1 %v5330_v0  ;;  %v2576_v20 = vpop.f32.mrf.mxu0 }
 0x8af   :  { %4514 = vmatpush3.msra.mxu1 %v2585_v60  ;;  %v2577_v9 = vadd.f32 %v3923_v62, %v2576_v20  ;;  %v2860_v60 = vld [vmem:[%s6452_s15] sm:$0xff]  ;;  %v3060_v62 = vld [vmem:[%s6453_s21 + $0x18] sm:$0xff] }
 0x8b0   :  { %4489 = vmatmul.mubr.msk.f32.gmra.mxu1 %vm501_vm1, %v5772_v58  ;;  %4515 = vmatprep.subr.mxu1 %v5330_v0  ;;  %v4510_v2 = vpop.f32.mrf.mxu0  ;;  %v2769_v58 = vld [vmem:[%s6449_s30 + $0x18] sm:$0xff] }
 0x8b1   :  { %4491 = vmatprep.mubr.msk.f32.mxu1 %vm5331_vm0, %v5330_v0  ;;  %4516 = vmatpush3.msra.mxu1 %v2584_v17  ;;  %v2582_v8 = vmax.f32 %v2577_v9, 0.0  ;;  %v3059_v17 = vld [vmem:[%s6453_s21 + $0x10] sm:$0xff]  ;;  %v3189_v20 = vld [vmem:[#allocation31] sm:$0xff] }
 0x8b2   :  { %4517 = vmatprep.subr.mxu1 %v5330_v0 }
 0x8b3   :  { %4518 = vmatpush3.msra.mxu1 %v2583_v53 }
 0x8b4   :  { %4492 = vmatmul.mubr.msk.f32.gmra.mxu1 %vm501_vm1, %v5783_v5  ;;  %4543 = vmatprep.subr.mxu1 %v5330_v0  ;;  %v2767_v5 = vld [vmem:[%s6449_s30 + $0x8] sm:$0xff] }
 0x8b5   :  { %4519 = vmatprep.mubr.msk.f32.mxu1 %vm5331_vm0, %v5330_v0 }
 0x8b8   :  { %4520 = vmatmul.mubr.msk.f32.vlgmr.msra.gmra.mxu1 %vm602_vm2, %v2580_v1 }
 0x8b9   :  { %4522 = vmatprep.mubr.msk.f32.mxu1 %vm5331_vm0, %v5330_v0  ;;  %4544 = vmatpush3.msra.mxu1 %v2769_v58 }
 0x8ba   :  { %4545 = vmatprep.subr.mxu1 %v5330_v0 }
 0x8bb   :  { %4546 = vmatpush3.msra.mxu1 %v2768_v43  ;;  %v3187_v43 = vld [vmem:[%s6454_s3] sm:$0xff] }
 0x8bc   :  { %4523 = vmatmul.mubr.msk.f32.gmra.mxu1 %vm602_vm2, %v2581_v7  ;;  %4547 = vmatprep.subr.mxu1 %v5330_v0  ;;  %v3188_v7 = vld [vmem:[%s6454_s3 + $0x8] sm:$0xff] }
 0x8bd   :  { %4525 = vmatprep.mubr.msk.f32.mxu1 %vm5331_vm0, %v5330_v0  ;;  %4548 = vmatpush3.msra.mxu1 %v2767_v5 }
 0x8be   :  { %4549 = vmatprep.subr.mxu1 %v5330_v0 }
 0x8bf   :  { %4550 = vmatpush3.msra.mxu1 %v2766_v10 }
 0x8c0   :  { %4526 = vmatmul.mubr.msk.f32.gmra.mxu1 %vm602_vm2, %v2582_v8  ;;  %4577 = vmatprep.subr.mxu1 %v5330_v0  ;;  %v3934_v8 = vld [vmem:[%s6455_s5] ss:$0 sm:$0xff] }
 0x8c1   :  { %4551 = vmatprep.mubr.msk.f32.mxu1 %vm5331_vm0, %v5330_v0 }
 0x8c4   :  { %4552 = vmatmul.mubr.msk.f32.vlgmr.msra.gmra.mxu1 %vm602_vm2, %v6025_v34 }
 0x8c5   :  { %4554 = vmatprep.mubr.msk.f32.mxu1 %vm5331_vm0, %v5330_v0  ;;  %4578 = vmatpush3.msra.mxu1 %v2957_v11 }
 0x8c6   :  { %4579 = vmatprep.subr.mxu1 %v5330_v0 }
 0x8c7   :  { %4580 = vmatpush3.msra.mxu1 %v2956_v13 }
 0x8c8   :  { %4555 = vmatmul.mubr.msk.f32.gmra.mxu1 %vm602_vm2, %v6032_v63  ;;  %4581 = vmatprep.subr.mxu1 %v5330_v0 }
 0x8c9   :  { %4557 = vmatprep.mubr.msk.f32.mxu1 %vm5331_vm0, %v5330_v0  ;;  %4582 = vmatpush3.msra.mxu1 %v2955_v14 }
 0x8ca   :  { %4583 = vmatprep.subr.mxu1 %v5330_v0 }
 0x8cb   :  { %4584 = vmatpush3.msra.mxu1 %v2954_v16 }
 0x8cc   :  { %4558 = vmatmul.mubr.msk.f32.gmra.mxu1 %vm602_vm2, %v6039_v3  ;;  %4611 = vmatprep.subr.mxu1 %v5330_v0 }
 0x8cd   :  { %4585 = vmatprep.mubr.msk.f32.mxu1 %vm5331_vm0, %v5330_v0 }
 0x96c   :  { %v2466_v19 = vpop.f32.mrf.mxu1 }
 0x96d   :  { %4586 = vmatmul.mubr.msk.f32.vlgmr.msra.gmra.mxu1 %vm602_vm2, %v2466_v19  ;;  %v3938_v19 = vld [vmem:[#allocation27] ss:$0 sm:$0xff] }
 0x96e   :  { %v4487_v21 = vpop.f32.mrf.mxu1  ;;  %4588 = vmatprep.mubr.msk.f32.mxu1 %vm5331_vm0, %v5330_v0 }
 0x970   :  { %v2471_v22 = vpop.f32.mrf.mxu1 }
 0x971   :  { %4589 = vmatmul.mubr.msk.f32.gmra.mxu1 %vm602_vm2, %v2471_v22 }
 0x972   :  { %v4490_v23 = vpop.f32.mrf.mxu1  ;;  %4591 = vmatprep.mubr.msk.f32.mxu1 %vm5331_vm0, %v5330_v0 }
 0x974   :  { %v2476_v24 = vpop.f32.mrf.mxu1 }
 0x975   :  { %4592 = vmatmul.mubr.msk.f32.gmra.mxu1 %vm602_vm2, %v2476_v24  ;;  %v3942_v24 = vld [vmem:[#allocation28] ss:$0 sm:$0xff] }
 0x976   :  { %v4493_v25 = vpop.f32.mrf.mxu1  ;;  %4615 = vmatprep.mubr.msk.f32.mxu1 %vm5331_vm0, %v5330_v0 }
 0x978   :  { %v2669_v26 = vpop.f32.mrf.mxu1 }
 0x979   :  { %v2670_v41 = vadd.f32 %v3927_v32, %v2669_v26 }
 0x97a   :  { %v4521_v27 = vpop.f32.mrf.mxu1 }
 0x97b   :  { %v2683_v48 = vmax.f32 %v2670_v41, 0.0 }
 0x97c   :  { %v2674_v29 = vpop.f32.mrf.mxu1 }
 0x97d   :  { %v2675_v37 = vadd.f32 %v3927_v32, %v2674_v29 }
 0x97e   :  { %v4524_v30 = vpop.f32.mrf.mxu1 }
 0x97f   :  { %v2684_v45 = vmax.f32 %v2675_v37, 0.0 }
 0x980   :  { %v2679_v35 = vpop.f32.mrf.mxu1 }
 0x981   :  { %v2680_v39 = vadd.f32 %v3927_v32, %v2679_v35 }
 0x982   :  { %v4527_v40 = vpop.f32.mrf.mxu1 }
 0x983   :  { %v2685_v42 = vmax.f32 %v2680_v39, 0.0 }
 0x984   :  { %v6177_v44 = vpop.f32.mrf.mxu1 }
 0x985   :  { %4529 = vmatpush3.msra.mxu0 %v2685_v42  ;;  %v2844_v13 = vadd.f32 %v3934_v8, %v6177_v44 }
 0x986   :  { %4530 = vmatprep.subr.mxu0 %v5330_v0  ;;  %v4553_v46 = vpop.f32.mrf.mxu1 }
 0x987   :  { %4531 = vmatpush3.msra.mxu0 %v2684_v45  ;;  %v6243_v21 = vmax.f32 %v2844_v13, 0.0 }
 0x988   :  { %4532 = vmatprep.subr.mxu0 %v5330_v0  ;;  %v6181_v49 = vpop.f32.mrf.mxu1 }
 0x989   :  { %4533 = vmatpush3.msra.mxu0 %v2683_v48  ;;  %v2849_v22 = vadd.f32 %v3934_v8, %v6181_v49 }
 0x98a   :  { %4535 = vmatmul.mubr.msk.f32.vlgmr.msra.gmra.mxu0 %vm501_vm1, %v4786_v51  ;;  %v4556_v28 = vpop.f32.mrf.mxu1  ;;  %4560 = vmatprep.subr.mxu0 %v5330_v0 }
 0x98b   :  { %4537 = vmatprep.mubr.msk.f32.mxu0 %vm5331_vm0, %v5330_v0  ;;  %4561 = vmatpush3.msra.mxu0 %v2863_v50  ;;  %v6250_v27 = vmax.f32 %v2849_v22, 0.0  ;;  %v3370_v28 = vld [vmem:[#allocation33 + $0x8] sm:$0xff] }
 0x98c   :  { %v6190_v54 = vpop.f32.mrf.mxu1  ;;  %4562 = vmatprep.subr.mxu0 %v5330_v0 }
 0x98d   :  { %4563 = vmatpush3.msra.mxu0 %v2862_v52  ;;  %v2854_v29 = vadd.f32 %v3934_v8, %v6190_v54 }
 0x98e   :  { %4538 = vmatmul.mubr.msk.f32.gmra.mxu0 %vm501_vm1, %v4787_v57  ;;  %v4559_v59 = vpop.f32.mrf.mxu1  ;;  %4564 = vmatprep.subr.mxu0 %v5330_v0 }
 0x98f   :  { %4540 = vmatprep.mubr.msk.f32.mxu0 %vm5331_vm0, %v5330_v0  ;;  %4565 = vmatpush3.msra.mxu0 %v2861_v56  ;;  %v6258_v41 = vmax.f32 %v2854_v29, 0.0  ;;  %v3369_v56 = vld [vmem:[#allocation33] sm:$0xff] }
 0x990   :  { %4566 = vmatprep.subr.mxu0 %v5330_v0 }
 0x991   :  { %4567 = vmatpush3.msra.mxu0 %v2860_v60 }
 0x992   :  { %4541 = vmatmul.mubr.msk.f32.gmra.mxu0 %vm501_vm1, %v4788_v61  ;;  %4594 = vmatprep.subr.mxu0 %v5330_v0 }
 0x993   :  { %4568 = vmatprep.mubr.msk.f32.mxu0 %vm5331_vm0, %v5330_v0 }
 0x996   :  { %4569 = vmatmul.mubr.msk.f32.vlgmr.msra.gmra.mxu0 %vm602_vm2, %v6085_v31  ;;  %v3058_v31 = vld [vmem:[%s6453_s21 + $0x8] sm:$0xff] }
 0x997   :  { %4571 = vmatprep.mubr.msk.f32.mxu0 %vm5331_vm0, %v5330_v0  ;;  %4595 = vmatpush3.msra.mxu0 %v3060_v62 }
 0x998   :  { %4596 = vmatprep.subr.mxu0 %v5330_v0 }
 0x999   :  { %4597 = vmatpush3.msra.mxu0 %v3059_v17 }
 0x99a   :  { %4572 = vmatmul.mubr.msk.f32.gmra.mxu0 %vm602_vm2, %v6092_v33  ;;  %4598 = vmatprep.subr.mxu0 %v5330_v0  ;;  %v3057_v33 = vld [vmem:[%s6453_s21] sm:$0xff] }
 0x99b   :  { %4574 = vmatprep.mubr.msk.f32.mxu0 %vm5331_vm0, %v5330_v0  ;;  %4599 = vmatpush3.msra.mxu0 %v3058_v31 }
 0x99c   :  { %4600 = vmatprep.subr.mxu0 %v5330_v0 }
 0x99d   :  { %4601 = vmatpush3.msra.mxu0 %v3057_v33 }
 0x99e   :  { %4575 = vmatmul.mubr.msk.f32.gmra.mxu0 %vm602_vm2, %v6098_v36  ;;  %4624 = vmatprep.subr.mxu0 %v5330_v0  ;;  %v3190_v36 = vld [vmem:[#allocation31 + $0x8] sm:$0xff] }
 0x99f   :  { %4602 = vmatprep.mubr.msk.f32.mxu0 %vm5331_vm0, %v5330_v0  ;;  %4612 = vmatpush3.msra.mxu1 %v3190_v36 }
 0x9a0   :  { %4613 = vmatprep.subr.mxu1 %v5330_v0 }
 0x9a1   :  { %4614 = vmatpush3.msra.mxu1 %v3189_v20 }
 0x9a2   :  { %4637 = vmatprep.subr.mxu1 %v5330_v0 }
 0xa2d   :  { %v3040_v4 = vpop.f32.mrf.mxu1 }
 0xa2e   :  { %v3041_v32 = vadd.f32 %v3942_v24, %v3040_v4 }
 0xa2f   :  { %v4587_v53 = vpop.f32.mrf.mxu1 }
 0xa30   :  { %v3054_v45 = vmax.f32 %v3041_v32, 0.0 }
 0xa31   :  { %v3045_v2 = vpop.f32.mrf.mxu1 }
 0xa32   :  { %v3046_v48 = vadd.f32 %v3942_v24, %v3045_v2  ;;  %v3169_v57 = vsub.f32 %v3054_v45, %v6243_v21 }
 0xa33   :  { %v4590_v1 = vpop.f32.mrf.mxu1 }
 0xa34   :  { %v3055_v59 = vmax.f32 %v3046_v48, 0.0  ;;  %v3172_v17 = vmul.f32 %v3169_v57, %v5947_v15 }
 0xa35   :  { %v3050_v6 = vpop.f32.mrf.mxu1 }
 0xa36   :  { %v3051_v60 = vadd.f32 %v3942_v24, %v3050_v6  ;;  %v3170_v31 = vsub.f32 %v3055_v59, %v6250_v27  ;;  %v3464_v6 = vld [vmem:[#allocation34 + $0x8] sm:$0xff] }
 0xa37   :  { %v4593_v58 = vpop.f32.mrf.mxu1 }
 0xa38   :  { %v3056_v33 = vmax.f32 %v3051_v60, 0.0  ;;  %v3173_v20 = vmul.f32 %v3170_v31, %v5957_v12  ;;  %v3463_v58 = vld [vmem:[#allocation34] sm:$0xff] }
 0xa39   :  { %v3570_v31 = vld [vmem:[%s6456_s0] sm:$0xff] }
 0xa3a   :  { %v3171_v4 = vsub.f32 %v3056_v33, %v6258_v41  ;;  %v3176_v53 = vadd.f32 %v3173_v20, %v6250_v27 }
 0xa3c   :  { %v3174_v2 = vmul.f32 %v3171_v4, %v5965_v18 }
 0xa3e   :  { %v3177_v1 = vadd.f32 %v3174_v2, %v6258_v41 }
 0xa4a   :  { %v2752_v9 = vpop.f32.mrf.mxu0 }
 0xa4b   :  { %4603 = vmatmul.mubr.msk.f32.vlgmr.msra.gmra.mxu0 %vm602_vm2, %v2752_v9 }
 0xa4c   :  { %v4536_v5 = vpop.f32.mrf.mxu0  ;;  %4605 = vmatprep.mubr.msk.f32.mxu0 %vm5331_vm0, %v5330_v0  ;;  %4625 = vmatpush3.msra.mxu0 %v3188_v7  ;;  %v3946_v7 = vld [vmem:[#allocation30] ss:$0 sm:$0xff] }
 0xa4d   :  { %4626 = vmatprep.subr.mxu0 %v5330_v0 }
 0xa4e   :  { %v2757_v10 = vpop.f32.mrf.mxu0  ;;  %4627 = vmatpush3.msra.mxu0 %v3187_v43 }
 0xa4f   :  { %4606 = vmatmul.mubr.msk.f32.gmra.mxu0 %vm602_vm2, %v2757_v10  ;;  %4650 = vmatprep.subr.mxu0 %v5330_v0 }
 0xa50   :  { %v4539_v11 = vpop.f32.mrf.mxu0  ;;  %4608 = vmatprep.mubr.msk.f32.mxu0 %vm5331_vm0, %v5330_v0 }
 0xa52   :  { %v2762_v14 = vpop.f32.mrf.mxu0 }
 0xa53   :  { %4609 = vmatmul.mubr.msk.f32.gmra.mxu0 %vm602_vm2, %v2762_v14 }
 0xa54   :  { %v4542_v16 = vpop.f32.mrf.mxu0  ;;  %4628 = vmatprep.mubr.msk.f32.mxu0 %vm5331_vm0, %v5330_v0 }
 0xa56   :  { %v2937_v23 = vpop.f32.mrf.mxu0 }
 0xa57   :  { %v2938_v25 = vadd.f32 %v3938_v19, %v2937_v23  ;;  %4629 = vmatmul.mubr.msk.f32.vlgmr.msra.gmra.mxu0 %vm1628_vm3, %v6243_v21 }
 0xa58   :  { %v4570_v26 = vpop.f32.mrf.mxu0  ;;  %4631 = vmatprep.mubr.msk.f32.mxu0 %vm5331_vm0, %v5330_v0  ;;  %4651 = vmatpush3.msra.mxu0 %v3464_v6 }
 0xa59   :  { %v2951_v30 = vmax.f32 %v2938_v25, 0.0  ;;  %4652 = vmatprep.subr.mxu0 %v5330_v0 }
 0xa5a   :  { %v2942_v35 = vpop.f32.mrf.mxu0  ;;  %4653 = vmatpush3.msra.mxu0 %v3463_v58 }
 0xa5b   :  { %v3160_v37 = vsub.f32 %v2951_v30, %v6243_v21  ;;  %v2943_v39 = vadd.f32 %v3938_v19, %v2942_v35  ;;  %4632 = vmatmul.mubr.msk.f32.gmra.mxu0 %vm1628_vm3, %v6250_v27  ;;  %4680 = vmatprep.subr.mxu0 %v5330_v0 }
 0xa5c   :  { %v4573_v40 = vpop.f32.mrf.mxu0  ;;  %4634 = vmatprep.mubr.msk.f32.mxu0 %vm5331_vm0, %v5330_v0 }
 0xa5d   :  { %v3163_v42 = vmul.f32 %v3160_v37, %v5918_v38  ;;  %v2952_v44 = vmax.f32 %v2943_v39, 0.0 }
 0xa5e   :  { %v2947_v46 = vpop.f32.mrf.mxu0 }
 0xa5f   :  { %v3166_v49 = vadd.f32 %v3163_v42, %v6243_v21  ;;  %v3161_v50 = vsub.f32 %v2952_v44, %v6250_v27  ;;  %v2948_v51 = vadd.f32 %v3938_v19, %v2947_v46  ;;  %4635 = vmatmul.mubr.msk.f32.gmra.mxu0 %vm1628_vm3, %v6258_v41 }
 0xa60   :  { %v4576_v52 = vpop.f32.mrf.mxu0  ;;  %4654 = vmatprep.mubr.msk.f32.mxu0 %vm5331_vm0, %v5330_v0 }
 0xa61   :  { %v3164_v54 = vmul.f32 %v3161_v50, %v5934_v55  ;;  %v2953_v38 = vmax.f32 %v2948_v51, 0.0  ;;  %4616 = vmatmul.mubr.msk.f32.vlgmr.msra.gmra.mxu1 %vm1628_vm3, %v3166_v49 }
 0xa62   :  { %4618 = vmatprep.mubr.msk.f32.mxu1 %vm5331_vm0, %v5330_v0  ;;  %4638 = vmatpush3.msra.mxu1 %v3370_v28 }
 0xa63   :  { %v3167_v61 = vadd.f32 %v3164_v54, %v6250_v27  ;;  %v3162_v62 = vsub.f32 %v2953_v38, %v6258_v41  ;;  %4639 = vmatprep.subr.mxu1 %v5330_v0 }
 0xa64   :  { %4640 = vmatpush3.msra.mxu1 %v3369_v56 }
 0xa65   :  { %v3165_v55 = vmul.f32 %v3162_v62, %v5928_v47  ;;  %4619 = vmatmul.mubr.msk.f32.gmra.mxu1 %vm1628_vm3, %v3167_v61  ;;  %4663 = vmatprep.subr.mxu1 %v5330_v0  ;;  %v3175_v47 = vadd.f32 %v3172_v17, %v6243_v21  ;;  %v3573_v62 = vld [vmem:[%s6456_s0 + $0x18] sm:$0xff]  ;;  %v3571_v17 = vld [vmem:[%s6456_s0 + $0x8] sm:$0xff] }
 0xa66   :  { %4621 = vmatprep.mubr.msk.f32.mxu1 %vm5331_vm0, %v5330_v0 }
 0xa67   :  { %v3168_v36 = vadd.f32 %v3165_v55, %v6258_v41  ;;  %v3572_v55 = vld [vmem:[%s6456_s0 + $0x10] sm:$0xff] }
 0xa69   :  { %4622 = vmatmul.mubr.msk.f32.gmra.mxu1 %vm1628_vm3, %v3168_v36  ;;  %v3962_v36 = vld [vmem:[%s6457_s27] ss:$0 sm:$0xff] }
 0xa6a   :  { %4641 = vmatprep.mubr.msk.f32.mxu1 %vm5331_vm0, %v5330_v0 }
 0xa6d   :  { %4642 = vmatmul.mubr.msk.f32.vlgmr.msra.gmra.mxu1 %vm1628_vm3, %v3175_v47 }
 0xa6e   :  { %4644 = vmatprep.mubr.msk.f32.mxu1 %vm5331_vm0, %v5330_v0  ;;  %4664 = vmatpush3.msra.mxu1 %v3573_v62 }
 0xa6f   :  { %4665 = vmatprep.subr.mxu1 %v5330_v0 }
 0xa70   :  { %4666 = vmatpush3.msra.mxu1 %v3572_v55 }
 0xa71   :  { %4645 = vmatmul.mubr.msk.f32.gmra.mxu1 %vm1628_vm3, %v3176_v53  ;;  %4667 = vmatprep.subr.mxu1 %v5330_v0 }
 0xa72   :  { %4647 = vmatprep.mubr.msk.f32.mxu1 %vm5331_vm0, %v5330_v0  ;;  %4668 = vmatpush3.msra.mxu1 %v3571_v17 }
 0xa73   :  { %4669 = vmatprep.subr.mxu1 %v5330_v0 }
 0xa74   :  { %4670 = vmatpush3.msra.mxu1 %v3570_v31 }
 0xa75   :  { %4648 = vmatmul.mubr.msk.f32.gmra.mxu1 %vm1628_vm3, %v3177_v1 }
 0xa76   :  { %4671 = vmatprep.mubr.msk.f32.mxu1 %vm5331_vm0, %v5330_v0 }
 0xb0b   :  { %v3143_v9 = vpop.f32.mrf.mxu0 }
 0xb0c   :  { %v3144_v43 = vadd.f32 %v3946_v7, %v3143_v9 }
 0xb0d   :  { %v4604_v5 = vpop.f32.mrf.mxu0 }
 0xb0e   :  { %v3157_v8 = vmax.f32 %v3144_v43, 0.0 }
 0xb0f   :  { %v3148_v10 = vpop.f32.mrf.mxu0 }
 0xb10   :  { %v3178_v11 = vsub.f32 %v3157_v8, %v6243_v21  ;;  %v3149_v13 = vadd.f32 %v3946_v7, %v3148_v10 }
 0xb11   :  { %v4607_v14 = vpop.f32.mrf.mxu0 }
 0xb12   :  { %v3181_v16 = vmul.f32 %v3178_v11, %v5947_v15  ;;  %v3158_v19 = vmax.f32 %v3149_v13, 0.0  ;;  %v3679_v11 = vld [vmem:[%s5596_s13 + $0x18] sm:$0xff]  ;;  %v3678_v13 = vld [vmem:[%s5596_s13 + $0x10] sm:$0xff]  ;;  %v3677_v14 = vld [vmem:[%s5596_s13 + $0x8] sm:$0xff] }
 0xb13   :  { %v3153_v22 = vpop.f32.mrf.mxu0 }
 0xb14   :  { %v3184_v23 = vadd.f32 %v3181_v16, %v6243_v21  ;;  %v3179_v24 = vsub.f32 %v3158_v19, %v6250_v27  ;;  %v3154_v25 = vadd.f32 %v3946_v7, %v3153_v22  ;;  %v3676_v16 = vld [vmem:[%s5596_s13] sm:$0xff] }
 0xb15   :  { %v4610_v26 = vpop.f32.mrf.mxu0  ;;  %v3963_v19 = vld [vmem:[%s5591_s14] ss:$0 sm:$0xff] }
 0xb16   :  { %v3182_v29 = vmul.f32 %v3179_v24, %v5957_v12  ;;  %v3159_v30 = vmax.f32 %v3154_v25, 0.0  ;;  %4655 = vmatmul.mubr.msk.f32.vlgmr.msra.gmra.mxu0 %vm1628_vm3, %v3184_v23 }
 0xb17   :  { %v3355_v32 = vpop.f32.mrf.mxu0  ;;  %4657 = vmatprep.mubr.msk.f32.mxu0 %vm5331_vm0, %v5330_v0  ;;  %4681 = vmatpush3.msra.mxu0 %v3679_v11 }
 0xb18   :  { %v3185_v35 = vadd.f32 %v3182_v29, %v6250_v27  ;;  %v3180_v15 = vsub.f32 %v3159_v30, %v6258_v41  ;;  %4682 = vmatprep.subr.mxu0 %v5330_v0 }
 0xb19   :  { %v4630_v37 = vpop.f32.mrf.mxu0  ;;  %4683 = vmatpush3.msra.mxu0 %v3678_v13 }
 0xb1a   :  { %v3183_v21 = vmul.f32 %v3180_v15, %v5965_v18  ;;  %4658 = vmatmul.mubr.msk.f32.gmra.mxu0 %vm1628_vm3, %v3185_v35  ;;  %4684 = vmatprep.subr.mxu0 %v5330_v0 }
 0xb1b   :  { %v3360_v39 = vpop.f32.mrf.mxu0  ;;  %4660 = vmatprep.mubr.msk.f32.mxu0 %vm5331_vm0, %v5330_v0  ;;  %4685 = vmatpush3.msra.mxu0 %v3677_v14 }
 0xb1c   :  { %v3186_v12 = vadd.f32 %v3183_v21, %v6258_v41  ;;  %4686 = vmatprep.subr.mxu0 %v5330_v0 }
 0xb1d   :  { %v4633_v40 = vpop.f32.mrf.mxu0  ;;  %4687 = vmatpush3.msra.mxu0 %v3676_v16 }
 0xb1e   :  { %4661 = vmatmul.mubr.msk.f32.gmra.mxu0 %vm1628_vm3, %v3186_v12  ;;  %v3967_v40 = vld [vmem:[%s5601_s25] ss:$0 sm:$0xff] }
 0xb1f   :  { %v3365_v42 = vpop.f32.mrf.mxu0  ;;  %4688 = vmatprep.mubr.msk.f32.mxu0 %vm5331_vm0, %v5330_v0 }
 0xb21   :  { %v3266_v27 = vpop.f32.mrf.mxu1  ;;  %v4636_v44 = vpop.f32.mrf.mxu0 }
 0xb22   :  { %v3356_v45 = vadd.f32 %v3355_v32, %v3266_v27 }
 0xb23   :  { %v4617_v46 = vpop.f32.mrf.mxu1 }
 0xb25   :  { %v3271_v18 = vpop.f32.mrf.mxu1 }
 0xb26   :  { %v3361_v48 = vadd.f32 %v3360_v39, %v3271_v18 }
 0xb27   :  { %v4620_v49 = vpop.f32.mrf.mxu1 }
 0xb29   :  { %v3276_v50 = vpop.f32.mrf.mxu1 }
 0xb2a   :  { %v3366_v51 = vadd.f32 %v3365_v42, %v3276_v50 }
 0xb2b   :  { %v4623_v28 = vpop.f32.mrf.mxu1 }
 0xb2d   :  { %v3446_v41 = vpop.f32.mrf.mxu1 }
 0xb2e   :  { %v3460_v52 = vadd.f32 %v3446_v41, %v3356_v45 }
 0xb2f   :  { %v4643_v54 = vpop.f32.mrf.mxu1 }
 0xb31   :  { %v3451_v38 = vpop.f32.mrf.mxu1 }
 0xb32   :  { %v3461_v56 = vadd.f32 %v3451_v38, %v3361_v48 }
 0xb33   :  { %v4646_v57 = vpop.f32.mrf.mxu1 }
 0xb35   :  { %v3456_v59 = vpop.f32.mrf.mxu1 }
 0xb36   :  { %v3462_v60 = vadd.f32 %v3456_v59, %v3366_v51 }
 0xb37   :  { %v4649_v61 = vpop.f32.mrf.mxu1 }
 0xbd6   :  { %v3540_v33 = vpop.f32.mrf.mxu0 }
 0xbd7   :  { %v3554_v47 = vadd.f32 %v3540_v33, %v3460_v52 }
 0xbd8   :  { %v4656_v20 = vpop.f32.mrf.mxu0 }
 0xbd9   :  { %v3564_v4 = vadd.f32 %v3962_v36, %v3554_v47 }
 0xbda   :  { %v3545_v53 = vpop.f32.mrf.mxu0 }
 0xbdb   :  { %v3567_v2 = vmax.f32 %v3564_v4, 0.0  ;;  %v3555_v1 = vadd.f32 %v3545_v53, %v3461_v56 }
 0xbdc   :  { %v4659_v6 = vpop.f32.mrf.mxu0 }
 0xbdd   :  { %v3565_v58 = vadd.f32 %v3962_v36, %v3555_v1  ;;  %4672 = vmatmul.mubr.msk.f32.vlgmr.msra.gmra.mxu1 %vm602_vm2, %v3567_v2 }
 0xbde   :  { %v3550_v7 = vpop.f32.mrf.mxu0  ;;  %4674 = vmatprep.mubr.msk.f32.mxu1 %vm5331_vm0, %v5330_v0 }
 0xbdf   :  { %v3568_v9 = vmax.f32 %v3565_v58, 0.0  ;;  %v3556_v43 = vadd.f32 %v3550_v7, %v3462_v60 }
 0xbe0   :  { %v4662_v5 = vpop.f32.mrf.mxu0 }
 0xbe1   :  { %v3566_v8 = vadd.f32 %v3962_v36, %v3556_v43  ;;  %4675 = vmatmul.mubr.msk.f32.gmra.mxu1 %vm602_vm2, %v3568_v9 }
 0xbe2   :  { %4677 = vmatprep.mubr.msk.f32.mxu1 %vm5331_vm0, %v5330_v0 }
 0xbe3   :  { %v3569_v10 = vmax.f32 %v3566_v8, 0.0 }
 0xbe5   :  { %4678 = vmatmul.mubr.msk.f32.gmra.mxu1 %vm602_vm2, %v3569_v10 }
 0xc9d   :  { %v3656_v22 = vpop.f32.mrf.mxu1 }
 0xc9e   :  { %v3657_v23 = vadd.f32 %v3963_v19, %v3656_v22 }
 0xc9f   :  { %v4673_v24 = vpop.f32.mrf.mxu1 }
 0xca0   :  { %v3670_v25 = vmax.f32 %v3657_v23, 0.0 }
 0xca1   :  { %v3661_v26 = vpop.f32.mrf.mxu1 }
 0xca2   :  { %v3673_v29 = vadd.f32 %v3670_v25, %v6025_v34  ;;  %v3662_v30 = vadd.f32 %v3963_v19, %v3661_v26 }
 0xca3   :  { %v4676_v32 = vpop.f32.mrf.mxu1 }
 0xca4   :  { %v3671_v35 = vmax.f32 %v3662_v30, 0.0  ;;  %4689 = vmatmul.mubr.msk.f32.vlgmr.msra.gmra.mxu0 %vm602_vm2, %v3673_v29 }
 0xca5   :  { %v3666_v15 = vpop.f32.mrf.mxu1  ;;  %4691 = vmatprep.mubr.msk.f32.mxu0 %vm5331_vm0, %v5330_v0 }
 0xca6   :  { %v3674_v37 = vadd.f32 %v3671_v35, %v6032_v63  ;;  %v3667_v21 = vadd.f32 %v3963_v19, %v3666_v15 }
 0xca7   :  { %v4679_v39 = vpop.f32.mrf.mxu1 }
 0xca8   :  { %v3672_v12 = vmax.f32 %v3667_v21, 0.0  ;;  %4692 = vmatmul.mubr.msk.f32.gmra.mxu0 %vm602_vm2, %v3674_v37 }
 0xca9   :  { %4694 = vmatprep.mubr.msk.f32.mxu0 %vm5331_vm0, %v5330_v0 }
 0xcaa   :  { %v3675_v34 = vadd.f32 %v3672_v12, %v6039_v3 }
 0xcac   :  { %4695 = vmatmul.mubr.msk.f32.gmra.mxu0 %vm602_vm2, %v3675_v34 }
 0xd64   :  { %v3762_v42 = vpop.f32.mrf.mxu0 }
 0xd65   :  { %v3763_v27 = vadd.f32 %v3967_v40, %v3762_v42 }
 0xd66   :  { %v4690_v44 = vpop.f32.mrf.mxu0 }
 0xd67   :  { %v3776_v45 = vmax.f32 %v3763_v27, 0.0 }
 0xd68   :  { %v3767_v63 = vpop.f32.mrf.mxu0 }
 0xd69   :  { %3779 = vst.msk [vmem:[%s5606_s4] sm:$0xff] %vm1628_vm3, %v3776_v45  ;;  %v3768_v46 = vadd.f32 %v3967_v40, %v3767_v63 }
 0xd6a   :  { %v4693_v18 = vpop.f32.mrf.mxu0 }
 0xd6b   :  { %v3777_v48 = vmax.f32 %v3768_v46, 0.0 }
 0xd6c   :  { %v3772_v49 = vpop.f32.mrf.mxu0 }
 0xd6d   :  { %3780 = vst.msk [vmem:[%s5606_s4 + $0x8] sm:$0xff] %vm1628_vm3, %v3777_v48  ;;  %v3773_v0 = vadd.f32 %v3967_v40, %v3772_v49 }
 0xd6e   :  { %v4696_v50 = vpop.f32.mrf.mxu0 }
 0xd6f   :  { %v3778_v3 = vmax.f32 %v3773_v0, 0.0 }
 0xd71   :  { %3781 = vst.msk [vmem:[%s5606_s4 + $0x10] sm:$0xff] %vm1628_vm3, %v3778_v3 }
 0xd72   :  { %3786 = vsyncpa [#allocation3], 1 }
 0xd73   :  { %3787 = vsyncpa [#allocation5], 1 }
 0xd74   :  { %3788 = vsyncpa [#allocation8], 1 }
 0xd75   :  { %3789 = vsyncpa [#allocation11], 1 }
 0xd76   :  { %3790 = vsyncpa [#allocation14], 1 }
 0xd77   :  { %3791 = vsyncpa [#allocation17], 1 }
 0xd78   :  { %3792 = vsyncpa [#allocation20], 1 }
 0xd79   :  { %3793 = vsyncpa [#allocation23], 1 }
 0xd7a   :  { %3794 = vsyncpa [#allocation26], 1 }
 0xd7b   :  { %3795 = vsyncpa [#allocation29], 1 }
 0xd7c   :  { %3796 = vsyncpa [#allocation32], 1 }
 0xd7d   :  { %3797 = vsyncpa [#allocation35], 1 }

</bundles_post_ra>
